<compile_context>
chip_gen: v5e
topology: v5e:2x2
jax: 0.10.0
libtpu: 0.0.40
codegen_flags: <defaults>
</compile_context>

<pallas_src>
import jax
import jax.numpy as jnp
from jax.experimental import pallas as pl
from jax.experimental.pallas import tpu as pltpu

_LAYER_DIMS = [256, 512, 1024, 512, 256, 128, 64, 4]
_BN_EPS = 1e-5
_OUT_PAD = 128  # lane-dense padding for the final (N=4) output


def _ann_fused_kernel(x_ref, *refs):
    """Whole-network forward; params resident in VMEM, activations stay on-chip.

    refs = (w1, b1, w2, b2, ..., w8, b8, out_ref)
    weights: bf16 [K, N] (BN scale folded in); biases: f32 [1, N] (BN shift folded in).
    """
    o_ref = refs[-1]
    wb = refs[:-1]
    n_layers = len(wb) // 2

    h = x_ref[...].astype(jnp.bfloat16)
    for li in range(n_layers):  # unrolled at trace time (8 layers)
        w = wb[2 * li][...]
        b = wb[2 * li + 1][...]
        y = jnp.dot(h, w, preferred_element_type=jnp.float32) + b
        if li == n_layers - 1:
            h = jax.nn.sigmoid(y)                              # final layer
        else:
            y = jnp.where(y > 0, y, jnp.float32(0.01) * y)     # leaky_relu(0.01)
            h = y.astype(jnp.bfloat16)                         # feed MXU in bf16
    o_ref[...] = h.astype(o_ref.dtype)


def ann_forward(x, params):
    """Run the fused network. x: (B, inputsize) f32 -> (B, 4) f32."""
    B = x.shape[0]
    flat = []
    for w, b in params:
        flat += [w, b]
    vmem_spec = pl.BlockSpec(memory_space=pltpu.MemorySpace.VMEM)
    out_padded = pl.pallas_call(
        _ann_fused_kernel,
        out_shape=jax.ShapeDtypeStruct((B, _OUT_PAD), jnp.float32),
        in_specs=[vmem_spec] * (1 + len(flat)),
        out_specs=vmem_spec,
        compiler_params=pltpu.CompilerParams(
            vmem_limit_bytes=32 * 1024 * 1024,
        ),
    )(x, *flat)
    return out_padded[:, : _LAYER_DIMS[-1]]


# ---------------------------------------------------------------------------
# Parameter construction (deterministic, in-script) with BN folded into (W, b).
# ---------------------------------------------------------------------------
def init_params(inputsize, key):
    dims = [inputsize] + _LAYER_DIMS
    n_layers = len(_LAYER_DIMS)
    params = []
    for li in range(n_layers):
        k_in, k_out = dims[li], dims[li + 1]
        key, kw, kb, kg, kbeta, km, kv = jax.random.split(key, 7)
        bound = 1.0 / jnp.sqrt(jnp.float32(k_in))
        # PyTorch nn.Linear stores (out, in); keep (in, out) so kernel does h @ W.
        w = jax.random.uniform(kw, (k_in, k_out), jnp.float32, -bound, bound)
        b = jax.random.uniform(kb, (k_out,), jnp.float32, -bound, bound)
        if li < n_layers - 1:
            # Inference-mode BatchNorm1d folded into (W, b):
            #   BN(z) = (z - mean) * gamma / sqrt(var + eps) + beta
            gamma = 1.0 + 0.1 * jax.random.normal(kg, (k_out,), jnp.float32)
            beta = 0.1 * jax.random.normal(kbeta, (k_out,), jnp.float32)
            run_mean = 0.1 * jax.random.normal(km, (k_out,), jnp.float32)
            run_var = 1.0 + 0.1 * jax.random.uniform(kv, (k_out,), jnp.float32)
            scale = gamma / jnp.sqrt(run_var + _BN_EPS)
            shift = beta - run_mean * scale
            w = w * scale[None, :]
            b = b * scale + shift
        else:
            # Zero-pad the final layer to 128 output lanes (lane-dense store);
            # padded lanes are sliced away in the wrapper.
            pad = _OUT_PAD - k_out
            w = jnp.pad(w, ((0, 0), (0, pad)))
            b = jnp.pad(b, ((0, pad),))
        params.append((w.astype(jnp.bfloat16),
                       b.reshape(1, -1).astype(jnp.float32)))
    return params


def ann_reference(x, params):
    """Pure-JAX reference applying the same bf16 weight/activation casts."""
    h = x.astype(jnp.float32)
    n_layers = len(params)
    for li, (w, b) in enumerate(params):
        hb = h.astype(jnp.bfloat16).astype(jnp.float32)
        y = hb @ w.astype(jnp.float32) + b
        if li == n_layers - 1:
            h = jax.nn.sigmoid(y)
        else:
            h = jnp.where(y > 0, y, 0.01 * y)
    return h[:, : _LAYER_DIMS[-1]]


if __name__ == "__main__":
    key = jax.random.PRNGKey(0)
    k_x, k_p = jax.random.split(key)

    batch = 8        # TODO(synk): for large batches, add a "parallel" batch grid
                     # axis (v7x dual-TC) with 256-row MXU batch tiles (v6e).
    inputsize = 32   # small stand-in for X_train.shape[1]

    x = jax.random.normal(k_x, (batch, inputsize), jnp.float32)
    params = init_params(inputsize, k_p)

    out = jax.block_until_ready(ann_forward(x, params))
    ref = jax.block_until_ready(ann_reference(x, params))

    assert out.shape == (batch, 4), out.shape
    assert bool(jnp.all(jnp.isfinite(out)))
    assert bool(jnp.all((out >= 0.0) & (out <= 1.0)))  # sigmoid output range
    assert bool(jnp.allclose(out, ref, atol=1e-2, rtol=1e-2)), (
        float(jnp.max(jnp.abs(out - ref))))
    print("KERNEL_OK")
</pallas_src>

<mosaic_0001>
module attributes {stable_mosaic.version = 11 : i64} {
  func.func @_ann_fused_kernel(%arg0: memref<8x32xf32, #tpu.memory_space<vmem>>, %arg1: memref<32x256xbf16, #tpu.memory_space<vmem>>, %arg2: memref<1x256xf32, #tpu.memory_space<vmem>>, %arg3: memref<256x512xbf16, #tpu.memory_space<vmem>>, %arg4: memref<1x512xf32, #tpu.memory_space<vmem>>, %arg5: memref<512x1024xbf16, #tpu.memory_space<vmem>>, %arg6: memref<1x1024xf32, #tpu.memory_space<vmem>>, %arg7: memref<1024x512xbf16, #tpu.memory_space<vmem>>, %arg8: memref<1x512xf32, #tpu.memory_space<vmem>>, %arg9: memref<512x256xbf16, #tpu.memory_space<vmem>>, %arg10: memref<1x256xf32, #tpu.memory_space<vmem>>, %arg11: memref<256x128xbf16, #tpu.memory_space<vmem>>, %arg12: memref<1x128xf32, #tpu.memory_space<vmem>>, %arg13: memref<128x64xbf16, #tpu.memory_space<vmem>>, %arg14: memref<1x64xf32, #tpu.memory_space<vmem>>, %arg15: memref<64x128xbf16, #tpu.memory_space<vmem>>, %arg16: memref<1x128xf32, #tpu.memory_space<vmem>>, %arg17: memref<8x128xf32, #tpu.memory_space<vmem>>) attributes {dimension_semantics = [], scalar_prefetch = 0 : i64, scratch_operands = 0 : i64, tpu.core_type = #tpu.core_type<tc>} {
    %c0 = arith.constant 0 : index
    %c0_0 = arith.constant 0 : index
    %0 = vector.load %arg0[%c0, %c0_0] : memref<8x32xf32, #tpu.memory_space<vmem>>, vector<8x32xf32>
    %1 = arith.truncf %0 : vector<8x32xf32> to vector<8x32xbf16>
    %c0_1 = arith.constant 0 : index
    %c0_2 = arith.constant 0 : index
    %2 = vector.load %arg1[%c0_1, %c0_2] : memref<32x256xbf16, #tpu.memory_space<vmem>>, vector<32x256xbf16>
    %c0_3 = arith.constant 0 : index
    %c0_4 = arith.constant 0 : index
    %3 = vector.load %arg2[%c0_3, %c0_4] : memref<1x256xf32, #tpu.memory_space<vmem>>, vector<1x256xf32>
    %cst = arith.constant dense<0.000000e+00> : vector<8x256xf32>
    %4 = tpu.matmul %1, %2, %cst {dimension_numbers = #tpu.dot_dimension_numbers<[1], [0], [0], [1], [0, 0, 1, 1], [], []>} : vector<8x32xbf16>, vector<32x256xbf16>, vector<8x256xf32> -> vector<8x256xf32>
    %5 = vector.broadcast %3 : vector<1x256xf32> to vector<8x256xf32>
    %6 = arith.addf %4, %5 : vector<8x256xf32>
    %cst_5 = arith.constant 0.000000e+00 : f32
    %7 = vector.broadcast %cst_5 : f32 to vector<8x256xf32>
    %8 = arith.cmpf ogt, %6, %7 : vector<8x256xf32>
    %cst_6 = arith.constant 0.00999999977 : f32
    %9 = vector.broadcast %cst_6 : f32 to vector<8x256xf32>
    %10 = arith.mulf %9, %6 : vector<8x256xf32>
    %11 = arith.select %8, %6, %10 : vector<8x256xi1>, vector<8x256xf32>
    %12 = arith.truncf %11 : vector<8x256xf32> to vector<8x256xbf16>
    %c0_7 = arith.constant 0 : index
    %c0_8 = arith.constant 0 : index
    %13 = vector.load %arg3[%c0_7, %c0_8] : memref<256x512xbf16, #tpu.memory_space<vmem>>, vector<256x512xbf16>
    %c0_9 = arith.constant 0 : index
    %c0_10 = arith.constant 0 : index
    %14 = vector.load %arg4[%c0_9, %c0_10] : memref<1x512xf32, #tpu.memory_space<vmem>>, vector<1x512xf32>
    %cst_11 = arith.constant dense<0.000000e+00> : vector<8x512xf32>
    %15 = tpu.matmul %12, %13, %cst_11 {dimension_numbers = #tpu.dot_dimension_numbers<[1], [0], [0], [1], [0, 0, 1, 1], [], []>} : vector<8x256xbf16>, vector<256x512xbf16>, vector<8x512xf32> -> vector<8x512xf32>
    %16 = vector.broadcast %14 : vector<1x512xf32> to vector<8x512xf32>
    %17 = arith.addf %15, %16 : vector<8x512xf32>
    %cst_12 = arith.constant 0.000000e+00 : f32
    %18 = vector.broadcast %cst_12 : f32 to vector<8x512xf32>
    %19 = arith.cmpf ogt, %17, %18 : vector<8x512xf32>
    %cst_13 = arith.constant 0.00999999977 : f32
    %20 = vector.broadcast %cst_13 : f32 to vector<8x512xf32>
    %21 = arith.mulf %20, %17 : vector<8x512xf32>
    %22 = arith.select %19, %17, %21 : vector<8x512xi1>, vector<8x512xf32>
    %23 = arith.truncf %22 : vector<8x512xf32> to vector<8x512xbf16>
    %c0_14 = arith.constant 0 : index
    %c0_15 = arith.constant 0 : index
    %24 = vector.load %arg5[%c0_14, %c0_15] : memref<512x1024xbf16, #tpu.memory_space<vmem>>, vector<512x1024xbf16>
    %c0_16 = arith.constant 0 : index
    %c0_17 = arith.constant 0 : index
    %25 = vector.load %arg6[%c0_16, %c0_17] : memref<1x1024xf32, #tpu.memory_space<vmem>>, vector<1x1024xf32>
    %cst_18 = arith.constant dense<0.000000e+00> : vector<8x1024xf32>
    %26 = tpu.matmul %23, %24, %cst_18 {dimension_numbers = #tpu.dot_dimension_numbers<[1], [0], [0], [1], [0, 0, 1, 1], [], []>} : vector<8x512xbf16>, vector<512x1024xbf16>, vector<8x1024xf32> -> vector<8x1024xf32>
    %27 = vector.broadcast %25 : vector<1x1024xf32> to vector<8x1024xf32>
    %28 = arith.addf %26, %27 : vector<8x1024xf32>
    %cst_19 = arith.constant 0.000000e+00 : f32
    %29 = vector.broadcast %cst_19 : f32 to vector<8x1024xf32>
    %30 = arith.cmpf ogt, %28, %29 : vector<8x1024xf32>
    %cst_20 = arith.constant 0.00999999977 : f32
    %31 = vector.broadcast %cst_20 : f32 to vector<8x1024xf32>
    %32 = arith.mulf %31, %28 : vector<8x1024xf32>
    %33 = arith.select %30, %28, %32 : vector<8x1024xi1>, vector<8x1024xf32>
    %34 = arith.truncf %33 : vector<8x1024xf32> to vector<8x1024xbf16>
    %c0_21 = arith.constant 0 : index
    %c0_22 = arith.constant 0 : index
    %35 = vector.load %arg7[%c0_21, %c0_22] : memref<1024x512xbf16, #tpu.memory_space<vmem>>, vector<1024x512xbf16>
    %c0_23 = arith.constant 0 : index
    %c0_24 = arith.constant 0 : index
    %36 = vector.load %arg8[%c0_23, %c0_24] : memref<1x512xf32, #tpu.memory_space<vmem>>, vector<1x512xf32>
    %cst_25 = arith.constant dense<0.000000e+00> : vector<8x512xf32>
    %37 = tpu.matmul %34, %35, %cst_25 {dimension_numbers = #tpu.dot_dimension_numbers<[1], [0], [0], [1], [0, 0, 1, 1], [], []>} : vector<8x1024xbf16>, vector<1024x512xbf16>, vector<8x512xf32> -> vector<8x512xf32>
    %38 = vector.broadcast %36 : vector<1x512xf32> to vector<8x512xf32>
    %39 = arith.addf %37, %38 : vector<8x512xf32>
    %cst_26 = arith.constant 0.000000e+00 : f32
    %40 = vector.broadcast %cst_26 : f32 to vector<8x512xf32>
    %41 = arith.cmpf ogt, %39, %40 : vector<8x512xf32>
    %cst_27 = arith.constant 0.00999999977 : f32
    %42 = vector.broadcast %cst_27 : f32 to vector<8x512xf32>
    %43 = arith.mulf %42, %39 : vector<8x512xf32>
    %44 = arith.select %41, %39, %43 : vector<8x512xi1>, vector<8x512xf32>
    %45 = arith.truncf %44 : vector<8x512xf32> to vector<8x512xbf16>
    %c0_28 = arith.constant 0 : index
    %c0_29 = arith.constant 0 : index
    %46 = vector.load %arg9[%c0_28, %c0_29] : memref<512x256xbf16, #tpu.memory_space<vmem>>, vector<512x256xbf16>
    %c0_30 = arith.constant 0 : index
    %c0_31 = arith.constant 0 : index
    %47 = vector.load %arg10[%c0_30, %c0_31] : memref<1x256xf32, #tpu.memory_space<vmem>>, vector<1x256xf32>
    %cst_32 = arith.constant dense<0.000000e+00> : vector<8x256xf32>
    %48 = tpu.matmul %45, %46, %cst_32 {dimension_numbers = #tpu.dot_dimension_numbers<[1], [0], [0], [1], [0, 0, 1, 1], [], []>} : vector<8x512xbf16>, vector<512x256xbf16>, vector<8x256xf32> -> vector<8x256xf32>
    %49 = vector.broadcast %47 : vector<1x256xf32> to vector<8x256xf32>
    %50 = arith.addf %48, %49 : vector<8x256xf32>
    %cst_33 = arith.constant 0.000000e+00 : f32
    %51 = vector.broadcast %cst_33 : f32 to vector<8x256xf32>
    %52 = arith.cmpf ogt, %50, %51 : vector<8x256xf32>
    %cst_34 = arith.constant 0.00999999977 : f32
    %53 = vector.broadcast %cst_34 : f32 to vector<8x256xf32>
    %54 = arith.mulf %53, %50 : vector<8x256xf32>
    %55 = arith.select %52, %50, %54 : vector<8x256xi1>, vector<8x256xf32>
    %56 = arith.truncf %55 : vector<8x256xf32> to vector<8x256xbf16>
    %c0_35 = arith.constant 0 : index
    %c0_36 = arith.constant 0 : index
    %57 = vector.load %arg11[%c0_35, %c0_36] : memref<256x128xbf16, #tpu.memory_space<vmem>>, vector<256x128xbf16>
    %c0_37 = arith.constant 0 : index
    %c0_38 = arith.constant 0 : index
    %58 = vector.load %arg12[%c0_37, %c0_38] : memref<1x128xf32, #tpu.memory_space<vmem>>, vector<1x128xf32>
    %cst_39 = arith.constant dense<0.000000e+00> : vector<8x128xf32>
    %59 = tpu.matmul %56, %57, %cst_39 {dimension_numbers = #tpu.dot_dimension_numbers<[1], [0], [0], [1], [0, 0, 1, 1], [], []>} : vector<8x256xbf16>, vector<256x128xbf16>, vector<8x128xf32> -> vector<8x128xf32>
    %60 = vector.broadcast %58 : vector<1x128xf32> to vector<8x128xf32>
    %61 = arith.addf %59, %60 : vector<8x128xf32>
    %cst_40 = arith.constant 0.000000e+00 : f32
    %62 = vector.broadcast %cst_40 : f32 to vector<8x128xf32>
    %63 = arith.cmpf ogt, %61, %62 : vector<8x128xf32>
    %cst_41 = arith.constant 0.00999999977 : f32
    %64 = vector.broadcast %cst_41 : f32 to vector<8x128xf32>
    %65 = arith.mulf %64, %61 : vector<8x128xf32>
    %66 = arith.select %63, %61, %65 : vector<8x128xi1>, vector<8x128xf32>
    %67 = arith.truncf %66 : vector<8x128xf32> to vector<8x128xbf16>
    %c0_42 = arith.constant 0 : index
    %c0_43 = arith.constant 0 : index
    %68 = vector.load %arg13[%c0_42, %c0_43] : memref<128x64xbf16, #tpu.memory_space<vmem>>, vector<128x64xbf16>
    %c0_44 = arith.constant 0 : index
    %c0_45 = arith.constant 0 : index
    %69 = vector.load %arg14[%c0_44, %c0_45] : memref<1x64xf32, #tpu.memory_space<vmem>>, vector<1x64xf32>
    %cst_46 = arith.constant dense<0.000000e+00> : vector<8x64xf32>
    %70 = tpu.matmul %67, %68, %cst_46 {dimension_numbers = #tpu.dot_dimension_numbers<[1], [0], [0], [1], [0, 0, 1, 1], [], []>} : vector<8x128xbf16>, vector<128x64xbf16>, vector<8x64xf32> -> vector<8x64xf32>
    %71 = vector.broadcast %69 : vector<1x64xf32> to vector<8x64xf32>
    %72 = arith.addf %70, %71 : vector<8x64xf32>
    %cst_47 = arith.constant 0.000000e+00 : f32
    %73 = vector.broadcast %cst_47 : f32 to vector<8x64xf32>
    %74 = arith.cmpf ogt, %72, %73 : vector<8x64xf32>
    %cst_48 = arith.constant 0.00999999977 : f32
    %75 = vector.broadcast %cst_48 : f32 to vector<8x64xf32>
    %76 = arith.mulf %75, %72 : vector<8x64xf32>
    %77 = arith.select %74, %72, %76 : vector<8x64xi1>, vector<8x64xf32>
    %78 = arith.truncf %77 : vector<8x64xf32> to vector<8x64xbf16>
    %c0_49 = arith.constant 0 : index
    %c0_50 = arith.constant 0 : index
    %79 = vector.load %arg15[%c0_49, %c0_50] : memref<64x128xbf16, #tpu.memory_space<vmem>>, vector<64x128xbf16>
    %c0_51 = arith.constant 0 : index
    %c0_52 = arith.constant 0 : index
    %80 = vector.load %arg16[%c0_51, %c0_52] : memref<1x128xf32, #tpu.memory_space<vmem>>, vector<1x128xf32>
    %cst_53 = arith.constant dense<0.000000e+00> : vector<8x128xf32>
    %81 = tpu.matmul %78, %79, %cst_53 {dimension_numbers = #tpu.dot_dimension_numbers<[1], [0], [0], [1], [0, 0, 1, 1], [], []>} : vector<8x64xbf16>, vector<64x128xbf16>, vector<8x128xf32> -> vector<8x128xf32>
    %82 = vector.broadcast %80 : vector<1x128xf32> to vector<8x128xf32>
    %83 = arith.addf %81, %82 : vector<8x128xf32>
    %84 = arith.negf %83 : vector<8x128xf32>
    %85 = math.exp %84 : vector<8x128xf32>
    %cst_54 = arith.constant 1.000000e+00 : f32
    %86 = vector.broadcast %cst_54 : f32 to vector<8x128xf32>
    %87 = arith.addf %86, %85 : vector<8x128xf32>
    %88 = arith.divf %86, %87 : vector<8x128xf32>
    %c0_55 = arith.constant 0 : index
    %c0_56 = arith.constant 0 : index
    %89 = vector.load %arg17[%c0_55, %c0_56] : memref<8x128xf32, #tpu.memory_space<vmem>>, vector<8x128xf32>
    tpu.vector_store %arg17[%c0_55, %c0_56], %88 {strides = array<i32>} : memref<8x128xf32, #tpu.memory_space<vmem>>, vector<8x128xf32>,
    return
  }
}

</mosaic_0001>

<bundles_post_ra>
// kernel: tpu_custom_call.1
= control target key start
LH: loop header
LB: loop body
LE: loop exit
PB: predicated region body
PF: predicated region fallthrough
CT: control target
= control target key end

     0   :  { %s9515_s0 = inlined_call_operand.vmem [shape: f32[8,32], index: 0, kind: input, shape index: {}]   ;;  %s9516_s1 = inlined_call_operand.vmem [shape: bf16[32,256], index: 1, kind: input, shape index: {}]   ;;  %s9517_s2 = inlined_call_operand.vmem [shape: f32[1,256], index: 2, kind: input, shape index: {}]   ;;  %s9518_s3 = inlined_call_operand.hbm [shape: bf16[256,512], index: 3, kind: input, shape index: {}]   ;;  %s9519_s4 = inlined_call_operand.vmem [shape: f32[1,512], index: 4, kind: input, shape index: {}]   ;;  %s9520_s5 = inlined_call_operand.hbm [shape: bf16[512,1024], index: 5, kind: input, shape index: {}]   ;;  %s9521_s6 = inlined_call_operand.vmem [shape: f32[1,1024], index: 6, kind: input, shape index: {}]   ;;  %s9522_s7 = inlined_call_operand.hbm [shape: bf16[1024,512], index: 7, kind: input, shape index: {}]   ;;  %s9523_s8 = inlined_call_operand.vmem [shape: f32[1,512], index: 8, kind: input, shape index: {}]   ;;  %s9524_s9 = inlined_call_operand.hbm [shape: bf16[512,256], index: 9, kind: input, shape index: {}]   ;;  %s9525_s10 = inlined_call_operand.vmem [shape: f32[1,256], index: 10, kind: input, shape index: {}]   ;;  %s9526_s11 = inlined_call_operand.hbm [shape: bf16[256,128], index: 11, kind: input, shape index: {}]   ;;  %s9527_s12 = inlined_call_operand.vmem [shape: f32[1,128], index: 12, kind: input, shape index: {}]   ;;  %s9528_s13 = inlined_call_operand.vmem [shape: bf16[128,64], index: 13, kind: input, shape index: {}]   ;;  %s9529_s14 = inlined_call_operand.vmem [shape: f32[1,64], index: 14, kind: input, shape index: {}]   ;;  %s9530_s15 = inlined_call_operand.vmem [shape: bf16[64,128], index: 15, kind: input, shape index: {}]   ;;  %s9531_s16 = inlined_call_operand.vmem [shape: f32[1,128], index: 16, kind: input, shape index: {}]   ;;  %s9532_s17 = inlined_call_operand.hbm [shape: f32[8,128], index: 17, kind: output, shape index: {}]  }
   0x1   :  { %9534 = sst [smem:[#allocation16_spill]] %s9515_s0 }
   0x2   :  { %9535 = sst [smem:[#allocation17_spill]] %s9516_s1 }
   0x3   :  { %22 = vsyncpa [#allocation3], 0 }
   0x4   :  { %23 = vsyncpa [#allocation6], 0 }
   0x5   :  { %24 = vsyncpa [#allocation9], 0  ;;  %s51_s26 = sshll.u32 %s9520_s5, 4  ;;  %s52_s26 = int_to_ptr.hbm [resolvable:$true] %s51_s26 }
   0x6   :  { %25 = vsyncpa [#allocation4], 0  ;;  %s9080_s27 = smov [#allocation5]   ;;  %s81_s30 = sshll.u32 %s9524_s9, 4  ;;  %s82_s30 = int_to_ptr.hbm [resolvable:$true] %s81_s30 }
   0x7   :  { %s53_s28 = sshll.u32 %s9080_s27, 4  ;;  %s9081_s18 = smov 512   ;;  %s54_s28 = int_to_ptr.vmem [resolvable:$true] %s53_s28 }
   0x8   :  { %s9082_s19 = smov 32   ;;  %s9083_s1 = smov [#allocation8]  }
   0x9   :  { %59 = dma.hbm_to_vmem [thread:$0]  %s52_s26, 32768, %s54_s28, [#allocation6], %s9081_s18, %s9081_s18, %s9082_s19  }
   0xa   :  { %s83_s20 = sshll.u32 %s9083_s1, 4  ;;  %s9084_s21 = smov 128   ;;  %s84_s20 = int_to_ptr.vmem [resolvable:$true] %s83_s20 }
   0xb   :  { %s9085_s22 = smov 8   ;;  %s36_s24 = sshll.u32 %s9518_s3, 4  ;;  %s37_s24 = int_to_ptr.hbm [resolvable:$true] %s36_s24 }
   0xc   :  { %89 = dma.hbm_to_vmem [thread:$0]  %s82_s30, 8192, %s84_s20, [#allocation9], %s9084_s21, %s9084_s21, %s9085_s22  }
   0xd   :  { %s9086_s25 = smov [#allocation2]   ;;  %s66_s0 = sshll.u32 %s9522_s7, 4  ;;  %s67_s0 = int_to_ptr.hbm [resolvable:$true] %s66_s0 }
   0xe   :  { %s38_s27 = sshll.u32 %s9086_s25, 4  ;;  %s9087_s26 = smov 256   ;;  %s39_s27 = int_to_ptr.vmem [resolvable:$true] %s38_s27 }
   0xf   :  { %s9088_s28 = smov 16   ;;  %s9089_s18 = smov [#allocation7]  }
  0x10   :  { %44 = dma.hbm_to_vmem [thread:$0]  %s37_s24, 8192, %s39_s27, [#allocation3], %s9087_s26, %s9087_s26, %s9088_s28  }
  0x11   :  { %s68_s19 = sshll.u32 %s9089_s18, 4  ;;  %s96_s20 = sshll.u32 %s9526_s11, 4  ;;  %s69_s19 = int_to_ptr.vmem [resolvable:$true] %s68_s19  ;;  %s97_s20 = int_to_ptr.hbm [resolvable:$true] %s96_s20 }
  0x12   :  { %74 = dma.hbm_to_vmem [thread:$0]  %s67_s0, 32768, %s69_s19, [#allocation6], %s9087_s26, %s9087_s26, %s9088_s28  }
  0x13   :  { %s9090_s3 = smov [#allocation10]   ;;  %s9091_s22 = smov 64  }
  0x14   :  { %s98_s21 = sshll.u32 %s9090_s3, 4  ;;  %s9092_s5 = smov 4   ;;  %s99_s21 = int_to_ptr.vmem [resolvable:$true] %s98_s21 }
  0x15   :  { %104 = dma.hbm_to_vmem [thread:$0]  %s97_s20, 2048, %s99_s21, [#allocation9], %s9091_s22, %s9091_s22, %s9092_s5  }
  0x16   :  { %9072 = dma.done.wait [#allocation3], 8192  }
  0x17   :  { %9073 = vsyncadd [#allocation3], 4294959104 }
  0x18   :  { %9074 = dma.done.wait [#allocation6], 65536  }
  0x19   :  { %9075 = vsyncadd [#allocation6], 4294901760 }
  0x1a   :  { %9076 = dma.done.wait [#allocation9], 10240  }
  0x1b   :  { %9077 = vsyncadd [#allocation9], 4294957056  ;;  %s9536_s24 = sld [smem:[#allocation17_spill]]  ;;  %vm168_vm0 = vcmask 261120   ;;  %v5673_v12 = vld [vmem:[#allocation2 + $0xe0] sm:$0xf] }
  0x1c   :  { %s9537_s5 = sld [smem:[#allocation16_spill]]  ;;  %v8267_v13 = vld [vmem:[#allocation2 + $0xec] sm:$0xf0]  ;;  %v5801_v14 = vld [vmem:[#allocation2 + $0x1e0] sm:$0xf] }
  0x1d   :  { %v5674_v16 = vor.u32 %v8267_v13, %v5673_v12  ;;  %v8299_v17 = vld [vmem:[#allocation2 + $0x1ec] sm:$0xf0]  ;;  %v8265_v18 = vld [vmem:[#allocation2 + $0xe4] sm:$0xf]  ;;  %v5675_v19 = vld [vmem:[#allocation2 + $0xf0] sm:$0xf0] }
  0x1e   :  { %v5802_v20 = vor.u32 %v8299_v17, %v5801_v14  ;;  %v5678_v21 = vor.u32 %v8265_v18, %v5675_v19  ;;  %v8297_v22 = vld [vmem:[#allocation2 + $0x1e4] sm:$0xf]  ;;  %v5803_v23 = vld [vmem:[#allocation2 + $0x1f0] sm:$0xf0]  ;;  %v5657_v24 = vld [vmem:[#allocation2 + $0xc0] sm:$0xf] }
  0x1f   :  { %600 = vmatpush.bf16.msra.mxu2 %v5674_v16  ;;  %v5806_v26 = vor.u32 %v8297_v22, %v5803_v23  ;;  %v8263_v27 = vld [vmem:[#allocation2 + $0xcc] sm:$0xf0]  ;;  %v5785_v28 = vld [vmem:[#allocation2 + $0x1c0] sm:$0xf]  ;;  %v8261_v32 = vld [vmem:[#allocation2 + $0xc4] sm:$0xf] }
  0x20   :  { %v8295_v29 = vld [vmem:[#allocation2 + $0x1cc] sm:$0xf0]  ;;  %613 = vmatpush.bf16.msra.mxu3 %v5802_v20  ;;  %v5658_v30 = vor.u32 %v8263_v27, %v5657_v24  ;;  %v5659_v33 = vld [vmem:[#allocation2 + $0xd0] sm:$0xf0]  ;;  %v8293_v34 = vld [vmem:[#allocation2 + $0x1c4] sm:$0xf] }
  0x21   :  { %v5551_v0 = vld [vmem:[%s9536_s24 + $0x10] sm:$0xf]  ;;  %v8236_v1 = vld [vmem:[%s9536_s24 + $0x14] sm:$0xf0]  ;;  %v8235_v2 = vld [vmem:[%s9536_s24 + $0x14] sm:$0xf]  ;;  %v5786_v31 = vor.u32 %v8295_v29, %v5785_v28  ;;  %v5662_v35 = vor.u32 %v8261_v32, %v5659_v33 }
  0x22   :  { %v5552_v3 = vor.u32 %v8236_v1, %v5551_v0  ;;  %v5553_v4 = vld [vmem:[%s9536_s24 + $0x18] sm:$0xf0]  ;;  %v5543_v5 = vld [vmem:[%s9536_s24] sm:$0xf]  ;;  %v8234_v6 = vld [vmem:[%s9536_s24 + $0x4] sm:$0xf0] }
  0x23   :  { %v5556_v7 = vor.u32 %v8235_v2, %v5553_v4  ;;  %v8233_v8 = vld [vmem:[%s9536_s24 + $0x4] sm:$0xf]  ;;  %v5545_v9 = vld [vmem:[%s9536_s24 + $0x8] sm:$0xf0]  ;;  %v5544_v11 = vor.u32 %v8234_v6, %v5543_v5  ;;  %v5787_v36 = vld [vmem:[#allocation2 + $0x1d0] sm:$0xf0]  ;;  %601 = vmatpush.bf16.msra.mxu2 %v5658_v30 }
  0x24   :  { %v136_v10 = vld [vmem:[%s9537_s5] sm:$0xff]  ;;  %178 = vmatpush.bf16.msra.mxu0 %v5552_v3  ;;  %v5548_v15 = vor.u32 %v8233_v8, %v5545_v9  ;;  %v8259_v38 = vld [vmem:[#allocation2 + $0xac] sm:$0xf0]  ;;  %v5790_v39 = vor.u32 %v8293_v34, %v5787_v36  ;;  %v5643_v44 = vld [vmem:[#allocation2 + $0xb0] sm:$0xf0]  ;;  %614 = vmatpush.bf16.msra.mxu3 %v5786_v31 }
  0x25   :  { %191 = vmatpush.bf16.msra.mxu1 %v5556_v7  ;;  %v137_v25 = vpack.c.bf16 %v136_v10, %v136_v10  ;;  %v5641_v37 = vld [vmem:[#allocation2 + $0xa0] sm:$0xf]  ;;  %v8291_v41 = vld [vmem:[#allocation2 + $0x1ac] sm:$0xf0]  ;;  %v8257_v42 = vld [vmem:[#allocation2 + $0xa4] sm:$0xf] }
  0x26   :  { %v5769_v40 = vld [vmem:[#allocation2 + $0x1a0] sm:$0xf]  ;;  %v5642_v43 = vor.u32 %v8259_v38, %v5641_v37  ;;  %v8289_v45 = vld [vmem:[#allocation2 + $0x1a4] sm:$0xf]  ;;  %v5771_v46 = vld [vmem:[#allocation2 + $0x1b0] sm:$0xf0]  ;;  %v5646_v50 = vor.u32 %v8257_v42, %v5643_v44 }
  0x27   :  { %v5770_v47 = vor.u32 %v8291_v41, %v5769_v40  ;;  %v5625_v48 = vld [vmem:[#allocation2 + $0x80] sm:$0xf]  ;;  %v8255_v49 = vld [vmem:[#allocation2 + $0x8c] sm:$0xf0]  ;;  %v5774_v53 = vor.u32 %v8289_v45, %v5771_v46  ;;  %v8253_v54 = vld [vmem:[#allocation2 + $0x84] sm:$0xf] }
  0x28   :  { %179 = vmatpush.bf16.msra.mxu0 %v5544_v11  ;;  %v5753_v51 = vld [vmem:[#allocation2 + $0x180] sm:$0xf]  ;;  %v8287_v52 = vld [vmem:[#allocation2 + $0x18c] sm:$0xf0]  ;;  %v5627_v55 = vld [vmem:[#allocation2 + $0x90] sm:$0xf0]  ;;  %602 = vmatpush.bf16.msra.mxu2 %v5642_v43  ;;  %v5626_v56 = vor.u32 %v8255_v49, %v5625_v48 }
  0x29   :  { %192 = vmatpush.bf16.msra.mxu1 %v5548_v15  ;;  %v8285_v57 = vld [vmem:[#allocation2 + $0x184] sm:$0xf]  ;;  %v5755_v58 = vld [vmem:[#allocation2 + $0x190] sm:$0xf0]  ;;  %615 = vmatpush.bf16.msra.mxu3 %v5770_v47  ;;  %v5754_v59 = vor.u32 %v8287_v52, %v5753_v51  ;;  %v5609_v60 = vld [vmem:[#allocation2 + $0x60] sm:$0xf]  ;;  %v5630_v62 = vor.u32 %v8253_v54, %v5627_v55 }
  0x2a   :  { %v8251_v61 = vld [vmem:[#allocation2 + $0x6c] sm:$0xf0]  ;;  %v5737_v63 = vld [vmem:[#allocation2 + $0x160] sm:$0xf]  ;;  %v5758_v1 = vor.u32 %v8285_v57, %v5755_v58  ;;  %v8249_v2 = vld [vmem:[#allocation2 + $0x64] sm:$0xf] }
  0x2b   :  { %5557 = vmatmul.msk.bf16.vlgmr.msra.gmra.mxu0 %vm168_vm0, %v137_v25  ;;  %v8283_v0 = vld [vmem:[#allocation2 + $0x16c] sm:$0xf0]  ;;  %v5611_v3 = vld [vmem:[#allocation2 + $0x70] sm:$0xf0]  ;;  %v5610_v4 = vor.u32 %v8251_v61, %v5609_v60  ;;  %v8281_v5 = vld [vmem:[#allocation2 + $0x164] sm:$0xf] }
  0x2c   :  { %626 = vmatpush.bf16.msrb.mxu0 %v5678_v21  ;;  %5558 = vmatmul.msk.bf16.vlgmr.msra.gmra.mxu1 %vm168_vm0, %v137_v25  ;;  %v5739_v6 = vld [vmem:[#allocation2 + $0x170] sm:$0xf0]  ;;  %v5738_v7 = vor.u32 %v8283_v0, %v5737_v63  ;;  %v5593_v8 = vld [vmem:[#allocation2 + $0x40] sm:$0xf]  ;;  %v8247_v9 = vld [vmem:[#allocation2 + $0x4c] sm:$0xf0]  ;;  %v5614_v10 = vor.u32 %v8249_v2, %v5611_v3 }
  0x2d   :  { %639 = vmatpush.bf16.msrb.mxu1 %v5806_v26  ;;  %603 = vmatpush.bf16.msra.mxu2 %v5626_v56  ;;  %v5721_v11 = vld [vmem:[#allocation2 + $0x140] sm:$0xf]  ;;  %v8279_v12 = vld [vmem:[#allocation2 + $0x14c] sm:$0xf0]  ;;  %v5742_v13 = vor.u32 %v8281_v5, %v5739_v6  ;;  %v8245_v14 = vld [vmem:[#allocation2 + $0x44] sm:$0xf]  ;;  %v5594_v16 = vor.u32 %v8247_v9, %v5593_v8 }
  0x2e   :  { %616 = vmatpush.bf16.msra.mxu3 %v5754_v59  ;;  %v5595_v15 = vld [vmem:[#allocation2 + $0x50] sm:$0xf0]  ;;  %v8277_v17 = vld [vmem:[#allocation2 + $0x144] sm:$0xf]  ;;  %v5722_v19 = vor.u32 %v8279_v12, %v5721_v11  ;;  %v5577_v20 = vld [vmem:[#allocation2 + $0x20] sm:$0xf] }
  0x2f   :  { %v5723_v18 = vld [vmem:[#allocation2 + $0x150] sm:$0xf0]  ;;  %v8243_v21 = vld [vmem:[#allocation2 + $0x2c] sm:$0xf0]  ;;  %v5598_v22 = vor.u32 %v8245_v14, %v5595_v15  ;;  %v5705_v23 = vld [vmem:[#allocation2 + $0x120] sm:$0xf] }
  0x30   :  { %627 = vmatpush.bf16.msrb.mxu0 %v5662_v35  ;;  %v8275_v24 = vld [vmem:[#allocation2 + $0x12c] sm:$0xf0]  ;;  %v8241_v25 = vld [vmem:[#allocation2 + $0x24] sm:$0xf]  ;;  %v5726_v26 = vor.u32 %v8277_v17, %v5723_v18  ;;  %v5579_v27 = vld [vmem:[#allocation2 + $0x30] sm:$0xf0]  ;;  %v5578_v30 = vor.u32 %v8243_v21, %v5577_v20 }
  0x31   :  { %640 = vmatpush.bf16.msrb.mxu1 %v5790_v39  ;;  %604 = vmatpush.bf16.msra.mxu2 %v5610_v4  ;;  %v8273_v28 = vld [vmem:[#allocation2 + $0x124] sm:$0xf]  ;;  %v5707_v29 = vld [vmem:[#allocation2 + $0x130] sm:$0xf0]  ;;  %v5561_v31 = vld [vmem:[#allocation2] sm:$0xf]  ;;  %v5706_v34 = vor.u32 %v8275_v24, %v5705_v23  ;;  %v5582_v38 = vor.u32 %v8241_v25, %v5579_v27 }
  0x32   :  { %617 = vmatpush.bf16.msra.mxu3 %v5738_v7  ;;  %v8239_v32 = vld [vmem:[#allocation2 + $0xc] sm:$0xf0]  ;;  %v5689_v33 = vld [vmem:[#allocation2 + $0x100] sm:$0xf]  ;;  %v8237_v36 = vld [vmem:[#allocation2 + $0x4] sm:$0xf]  ;;  %v5710_v43 = vor.u32 %v8273_v28, %v5707_v29 }
  0x33   :  { %v8271_v35 = vld [vmem:[#allocation2 + $0x10c] sm:$0xf0]  ;;  %v5563_v37 = vld [vmem:[#allocation2 + $0x10] sm:$0xf0]  ;;  %v8269_v39 = vld [vmem:[#allocation2 + $0x104] sm:$0xf]  ;;  %v5562_v47 = vor.u32 %v8239_v32, %v5561_v31 }
  0x34   :  { %628 = vmatpush.bf16.msrb.mxu0 %v5646_v50  ;;  %v5691_v40 = vld [vmem:[#allocation2 + $0x110] sm:$0xf0]  ;;  %v5681_v41 = vld [vmem:[#allocation2 + $0xe8] sm:$0xf]  ;;  %v8268_v42 = vld [vmem:[#allocation2 + $0xf4] sm:$0xf0]  ;;  %v5690_v49 = vor.u32 %v8271_v35, %v5689_v33 }
  0x35   :  { %641 = vmatpush.bf16.msrb.mxu1 %v5774_v53  ;;  %605 = vmatpush.bf16.msra.mxu2 %v5594_v16  ;;  %v5809_v44 = vld [vmem:[#allocation2 + $0x1e8] sm:$0xf]  ;;  %v8300_v45 = vld [vmem:[#allocation2 + $0x1f4] sm:$0xf0]  ;;  %v8266_v46 = vld [vmem:[#allocation2 + $0xec] sm:$0xf]  ;;  %v5682_v50 = vor.u32 %v8268_v42, %v5681_v41  ;;  %v5566_v53 = vor.u32 %v8237_v36, %v5563_v37  ;;  %v5694_v57 = vor.u32 %v8269_v39, %v5691_v40 }
  0x36   :  { %618 = vmatpush.bf16.msra.mxu3 %v5722_v19  ;;  %v5683_v48 = vld [vmem:[#allocation2 + $0xf8] sm:$0xf0]  ;;  %v8298_v51 = vld [vmem:[#allocation2 + $0x1ec] sm:$0xf]  ;;  %v5810_v54 = vor.u32 %v8300_v45, %v5809_v44  ;;  %v5665_v55 = vld [vmem:[#allocation2 + $0xc8] sm:$0xf] }
  0x37   :  { %v5811_v52 = vld [vmem:[#allocation2 + $0x1f8] sm:$0xf0]  ;;  %v8264_v56 = vld [vmem:[#allocation2 + $0xd4] sm:$0xf0]  ;;  %v5686_v58 = vor.u32 %v8266_v46, %v5683_v48  ;;  %v5793_v59 = vld [vmem:[#allocation2 + $0x1c8] sm:$0xf] }
  0x38   :  { %629 = vmatpush.bf16.msrb.mxu0 %v5630_v62  ;;  %v8296_v60 = vld [vmem:[#allocation2 + $0x1d4] sm:$0xf0]  ;;  %v5814_v61 = vor.u32 %v8298_v51, %v5811_v52  ;;  %v8262_v62 = vld [vmem:[#allocation2 + $0xcc] sm:$0xf]  ;;  %v5667_v63 = vld [vmem:[#allocation2 + $0xd8] sm:$0xf0]  ;;  %v5666_v0 = vor.u32 %v8264_v56, %v5665_v55 }
  0x39   :  { %642 = vmatpush.bf16.msrb.mxu1 %v5758_v1  ;;  %606 = vmatpush.bf16.msra.mxu2 %v5578_v30  ;;  %v8294_v1 = vld [vmem:[#allocation2 + $0x1cc] sm:$0xf]  ;;  %v5795_v2 = vld [vmem:[#allocation2 + $0x1d8] sm:$0xf0]  ;;  %v5794_v3 = vor.u32 %v8296_v60, %v5793_v59  ;;  %v5670_v4 = vor.u32 %v8262_v62, %v5667_v63  ;;  %v5649_v6 = vld [vmem:[#allocation2 + $0xa8] sm:$0xf] }
  0x3a   :  { %619 = vmatpush.bf16.msra.mxu3 %v5706_v34  ;;  %v5798_v5 = vor.u32 %v8294_v1, %v5795_v2  ;;  %v8260_v7 = vld [vmem:[#allocation2 + $0xb4] sm:$0xf0]  ;;  %v5777_v8 = vld [vmem:[#allocation2 + $0x1a8] sm:$0xf]  ;;  %v8258_v11 = vld [vmem:[#allocation2 + $0xac] sm:$0xf] }
  0x3b   :  { %v5650_v9 = vor.u32 %v8260_v7, %v5649_v6  ;;  %v8290_v14 = vld [vmem:[#allocation2 + $0x1ac] sm:$0xf]  ;;  %v5779_v15 = vld [vmem:[#allocation2 + $0x1b8] sm:$0xf0]  ;;  %v5633_v18 = vld [vmem:[#allocation2 + $0x88] sm:$0xf] }
  0x3c   :  { %630 = vmatpush.bf16.msrb.mxu0 %v5614_v10  ;;  %v8292_v10 = vld [vmem:[#allocation2 + $0x1b4] sm:$0xf0]  ;;  %v5782_v17 = vor.u32 %v8290_v14, %v5779_v15  ;;  %v5761_v20 = vld [vmem:[#allocation2 + $0x188] sm:$0xf]  ;;  %v8254_v23 = vld [vmem:[#allocation2 + $0x8c] sm:$0xf] }
  0x3d   :  { %643 = vmatpush.bf16.msrb.mxu1 %v5742_v13  ;;  %607 = vmatpush.bf16.msra.mxu2 %v5562_v47  ;;  %v5778_v12 = vor.u32 %v8292_v10, %v5777_v8  ;;  %v5651_v13 = vld [vmem:[#allocation2 + $0xb8] sm:$0xf0]  ;;  %v8256_v19 = vld [vmem:[#allocation2 + $0x94] sm:$0xf0]  ;;  %v8286_v27 = vld [vmem:[#allocation2 + $0x18c] sm:$0xf] }
  0x3e   :  { %620 = vmatpush.bf16.msra.mxu3 %v5690_v49  ;;  %v5654_v16 = vor.u32 %v8258_v11, %v5651_v13  ;;  %v5634_v21 = vor.u32 %v8256_v19, %v5633_v18  ;;  %v5635_v24 = vld [vmem:[#allocation2 + $0x98] sm:$0xf0]  ;;  %v5617_v30 = vld [vmem:[#allocation2 + $0x68] sm:$0xf]  ;;  %v8252_v31 = vld [vmem:[#allocation2 + $0x74] sm:$0xf0] }
  0x3f   :  { %v5763_v28 = vld [vmem:[#allocation2 + $0x198] sm:$0xf0]  ;;  %v5745_v32 = vld [vmem:[#allocation2 + $0x168] sm:$0xf]  ;;  %v5618_v33 = vor.u32 %v8252_v31, %v5617_v30  ;;  %v8284_v34 = vld [vmem:[#allocation2 + $0x174] sm:$0xf0] }
  0x40   :  { %631 = vmatpush.bf16.msrb.mxu0 %v5598_v22  ;;  %v8288_v22 = vld [vmem:[#allocation2 + $0x194] sm:$0xf0]  ;;  %v5766_v29 = vor.u32 %v8286_v27, %v5763_v28  ;;  %v8250_v35 = vld [vmem:[#allocation2 + $0x6c] sm:$0xf]  ;;  %v5619_v36 = vld [vmem:[#allocation2 + $0x78] sm:$0xf0]  ;;  %v5746_v37 = vor.u32 %v8284_v34, %v5745_v32 }
  0x41   :  { %644 = vmatpush.bf16.msrb.mxu1 %v5726_v26  ;;  %652 = vmatpush.bf16.msrb.mxu2 %v5682_v50  ;;  %v5762_v25 = vor.u32 %v8288_v22, %v5761_v20  ;;  %v5638_v26 = vor.u32 %v8254_v23, %v5635_v24  ;;  %v8282_v39 = vld [vmem:[#allocation2 + $0x16c] sm:$0xf]  ;;  %v5747_v40 = vld [vmem:[#allocation2 + $0x178] sm:$0xf0]  ;;  %v5601_v41 = vld [vmem:[#allocation2 + $0x48] sm:$0xf] }
  0x42   :  { %665 = vmatpush.bf16.msrb.mxu3 %v5810_v54  ;;  %v5750_v42 = vor.u32 %v8282_v39, %v5747_v40  ;;  %v5729_v44 = vld [vmem:[#allocation2 + $0x148] sm:$0xf]  ;;  %v8280_v45 = vld [vmem:[#allocation2 + $0x154] sm:$0xf0]  ;;  %v8246_v48 = vld [vmem:[#allocation2 + $0x4c] sm:$0xf] }
  0x43   :  { %v5730_v47 = vor.u32 %v8280_v45, %v5729_v44  ;;  %v5603_v49 = vld [vmem:[#allocation2 + $0x58] sm:$0xf0]  ;;  %v8278_v50 = vld [vmem:[#allocation2 + $0x14c] sm:$0xf]  ;;  %v8244_v54 = vld [vmem:[#allocation2 + $0x34] sm:$0xf0] }
  0x44   :  { %632 = vmatpush.bf16.msrb.mxu0 %v5582_v38  ;;  %v5622_v38 = vor.u32 %v8250_v35, %v5619_v36  ;;  %v5606_v51 = vor.u32 %v8246_v48, %v5603_v49  ;;  %v5731_v52 = vld [vmem:[#allocation2 + $0x158] sm:$0xf0]  ;;  %v5713_v56 = vld [vmem:[#allocation2 + $0x128] sm:$0xf]  ;;  %v8240_v1 = vld [vmem:[#allocation2 + $0x14] sm:$0xf0] }
  0x45   :  { %645 = vmatpush.bf16.msrb.mxu1 %v5710_v43  ;;  %653 = vmatpush.bf16.msrb.mxu2 %v5666_v0  ;;  %v8248_v43 = vld [vmem:[#allocation2 + $0x54] sm:$0xf0]  ;;  %v5734_v55 = vor.u32 %v8278_v50, %v5731_v52  ;;  %v5587_v60 = vld [vmem:[#allocation2 + $0x38] sm:$0xf0]  ;;  %v5569_v0 = vld [vmem:[#allocation2 + $0x8] sm:$0xf] }
  0x46   :  { %666 = vmatpush.bf16.msrb.mxu3 %v5794_v3  ;;  %v5602_v46 = vor.u32 %v8248_v43, %v5601_v41  ;;  %v5715_v62 = vld [vmem:[#allocation2 + $0x138] sm:$0xf0]  ;;  %v8238_v6 = vld [vmem:[#allocation2 + $0xc] sm:$0xf]  ;;  %v5570_v10 = vor.u32 %v8240_v1, %v5569_v0  ;;  %v142_v14 = vld [vmem:[%s9517_s2] sm:$0x3] }
  0x47   :  { %v5571_v7 = vld [vmem:[#allocation2 + $0x18] sm:$0xf0]  ;;  %v8270_v8 = vld [vmem:[#allocation2 + $0x10c] sm:$0xf]  ;;  %v144_v15 = vperm.slane %v142_v14, 0 }
  0x48   :  { %633 = vmatpush.bf16.msrb.mxu0 %v5566_v53  ;;  %v5585_v53 = vld [vmem:[#allocation2 + $0x28] sm:$0xf]  ;;  %v6297_v20 = vld [vmem:[#allocation5 + $0x3c0] sm:$0xf] }
  0x49   :  { %646 = vmatpush.bf16.msrb.mxu1 %v5694_v57  ;;  %654 = vmatpush.bf16.msrb.mxu2 %v5650_v9  ;;  %v8276_v57 = vld [vmem:[#allocation2 + $0x134] sm:$0xf0]  ;;  %v5586_v59 = vor.u32 %v8244_v54, %v5585_v53  ;;  %v5699_v9 = vld [vmem:[#allocation2 + $0x118] sm:$0xf0]  ;;  %v6041_v22 = vld [vmem:[#allocation5 + $0x1c0] sm:$0xf] }
  0x4a   :  { %667 = vmatpush.bf16.msrb.mxu3 %v5778_v12  ;;  %v5714_v63 = vor.u32 %v8276_v57, %v5713_v56  ;;  %v5574_v12 = vor.u32 %v8238_v6, %v5571_v7  ;;  %v5702_v13 = vor.u32 %v8270_v8, %v5699_v9  ;;  %v8361_v24 = vld [vmem:[#allocation5 + $0x1dc] sm:$0xf0] }
  0x4b   :  { %v6553_v28 = vld [vmem:[#allocation5 + $0x5c0] sm:$0xf] }
  0x4c   :  { %678 = vmatpush.bf16.msra.mxu0 %v5686_v58  ;;  %v8242_v58 = vld [vmem:[#allocation2 + $0x2c] sm:$0xf]  ;;  %v8489_v30 = vld [vmem:[#allocation5 + $0x5dc] sm:$0xf0] }
  0x4d   :  { %691 = vmatpush.bf16.msra.mxu1 %v5814_v61  ;;  %655 = vmatpush.bf16.msrb.mxu2 %v5634_v21  ;;  %v8274_v61 = vld [vmem:[#allocation2 + $0x12c] sm:$0xf]  ;;  %v5590_v2 = vor.u32 %v8242_v58, %v5587_v60  ;;  %v8425_v21 = vld [vmem:[#allocation5 + $0x3dc] sm:$0xf0]  ;;  %v6554_v43 = vor.u32 %v8489_v30, %v6553_v28 }
  0x4e   :  { %668 = vmatpush.bf16.msrb.mxu3 %v5762_v25  ;;  %v5718_v3 = vor.u32 %v8274_v61, %v5715_v62  ;;  %v6809_v25 = vld [vmem:[#allocation5 + $0x7c0] sm:$0xf]  ;;  %v6298_v34 = vor.u32 %v8425_v21, %v6297_v20 }
  0x4f   :  { %v6265_v35 = vld [vmem:[#allocation5 + $0x380] sm:$0xf] }
  0x50   :  { %679 = vmatpush.bf16.msra.mxu0 %v5670_v4  ;;  %v5697_v4 = vld [vmem:[#allocation2 + $0x108] sm:$0xf]  ;;  %v8417_v36 = vld [vmem:[#allocation5 + $0x39c] sm:$0xf0] }
  0x51   :  { %692 = vmatpush.bf16.msra.mxu1 %v5798_v5  ;;  %656 = vmatpush.bf16.msrb.mxu2 %v5618_v33  ;;  %v8272_v5 = vld [vmem:[#allocation2 + $0x114] sm:$0xf0]  ;;  %v6009_v39 = vld [vmem:[#allocation5 + $0x180] sm:$0xf]  ;;  %v6266_v49 = vor.u32 %v8417_v36, %v6265_v35 }
  0x52   :  { %669 = vmatpush.bf16.msrb.mxu3 %v5746_v37  ;;  %v5698_v11 = vor.u32 %v8272_v5, %v5697_v4  ;;  %v6042_v37 = vor.u32 %v8361_v24, %v6041_v22  ;;  %v8353_v40 = vld [vmem:[#allocation5 + $0x19c] sm:$0xf0] }
  0x53   :  { %v8545_v45 = vld [vmem:[#allocation5 + $0x79c] sm:$0xf0]  ;;  %v6010_v52 = vor.u32 %v8353_v40, %v6009_v39 }
  0x54   :  { %680 = vmatpush.bf16.msra.mxu0 %v5654_v16  ;;  %v145_v16 = vperm.slane %v142_v14, 1  ;;  %v6233_v50 = vld [vmem:[#allocation5 + $0x340] sm:$0xf] }
  0x55   :  { %693 = vmatpush.bf16.msra.mxu1 %v5782_v17  ;;  %657 = vmatpush.bf16.msrb.mxu2 %v5602_v46  ;;  %v6521_v46 = vld [vmem:[#allocation5 + $0x580] sm:$0xf] }
  0x56   :  { %670 = vmatpush.bf16.msrb.mxu3 %v5730_v47  ;;  %v8481_v47 = vld [vmem:[#allocation5 + $0x59c] sm:$0xf0] }
  0x57   :  { %v5977_v53 = vld [vmem:[#allocation5 + $0x140] sm:$0xf]  ;;  %v6522_v57 = vor.u32 %v8481_v47, %v6521_v46 }
  0x58   :  { %681 = vmatpush.bf16.msra.mxu0 %v5638_v26  ;;  %v8553_v26 = vld [vmem:[#allocation5 + $0x7dc] sm:$0xf0] }
  0x59   :  { %694 = vmatpush.bf16.msra.mxu1 %v5766_v29  ;;  %658 = vmatpush.bf16.msrb.mxu2 %v5586_v59  ;;  %v6810_v41 = vor.u32 %v8553_v26, %v6809_v25  ;;  %v8345_v54 = vld [vmem:[#allocation5 + $0x15c] sm:$0xf0] }
  0x5a   :  { %671 = vmatpush.bf16.msrb.mxu3 %v5714_v63  ;;  %v6745_v56 = vld [vmem:[#allocation5 + $0x740] sm:$0xf]  ;;  %v5978_v0 = vor.u32 %v8345_v54, %v5977_v53  ;;  %v6299_v54 = vld [vmem:[#allocation5 + $0x3e0] sm:$0xf0] }
  0x5b   :  { %v8537_v58 = vld [vmem:[#allocation5 + $0x75c] sm:$0xf0] }
  0x5c   :  { %682 = vmatpush.bf16.msra.mxu0 %v5622_v38  ;;  %v6489_v59 = vld [vmem:[#allocation5 + $0x540] sm:$0xf] }
  0x5d   :  { %695 = vmatpush.bf16.msra.mxu1 %v5750_v42  ;;  %659 = vmatpush.bf16.msrb.mxu2 %v5570_v10  ;;  %v6777_v42 = vld [vmem:[#allocation5 + $0x780] sm:$0xf] }
  0x5e   :  { %672 = vmatpush.bf16.msrb.mxu3 %v5698_v11  ;;  %v8473_v60 = vld [vmem:[#allocation5 + $0x55c] sm:$0xf0] }
  0x5f   :  { %v6201_v62 = vld [vmem:[#allocation5 + $0x300] sm:$0xf]  ;;  %v6490_v5 = vor.u32 %v8473_v60, %v6489_v59 }
  0x60   :  { %683 = vmatpush.bf16.msra.mxu0 %v5606_v51  ;;  %v8409_v51 = vld [vmem:[#allocation5 + $0x35c] sm:$0xf0] }
  0x61   :  { %696 = vmatpush.bf16.msra.mxu1 %v5734_v55  ;;  %v6778_v55 = vor.u32 %v8545_v45, %v6777_v42  ;;  %v6234_v61 = vor.u32 %v8409_v51, %v6233_v50  ;;  %v8401_v63 = vld [vmem:[#allocation5 + $0x31c] sm:$0xf0] }
  0x62   :  { %v5945_v1 = vld [vmem:[#allocation5 + $0x100] sm:$0xf]  ;;  %v6202_v9 = vor.u32 %v8401_v63, %v6201_v62  ;;  %v6811_v62 = vld [vmem:[#allocation5 + $0x7e0] sm:$0xf0] }
  0x63   :  { %v6713_v4 = vld [vmem:[#allocation5 + $0x700] sm:$0xf] }
  0x64   :  { %684 = vmatpush.bf16.msra.mxu0 %v5590_v2  ;;  %v8337_v2 = vld [vmem:[#allocation5 + $0x11c] sm:$0xf0] }
  0x65   :  { %697 = vmatpush.bf16.msra.mxu1 %v5718_v3  ;;  %v6746_v3 = vor.u32 %v8537_v58, %v6745_v56  ;;  %v8529_v6 = vld [vmem:[#allocation5 + $0x71c] sm:$0xf0]  ;;  %v6043_v56 = vld [vmem:[#allocation5 + $0x1e0] sm:$0xf0] }
  0x66   :  { %v6457_v7 = vld [vmem:[#allocation5 + $0x500] sm:$0xf] }
  0x67   :  { %v8465_v8 = vld [vmem:[#allocation5 + $0x51c] sm:$0xf0] }
  0x68   :  { %685 = vmatpush.bf16.msra.mxu0 %v5574_v12  ;;  %v6169_v10 = vld [vmem:[#allocation5 + $0x2c0] sm:$0xf]  ;;  %v5946_v12 = vor.u32 %v8337_v2, %v5945_v1  ;;  %v6267_v2 = vld [vmem:[#allocation5 + $0x3a0] sm:$0xf0] }
  0x69   :  { %698 = vmatpush.bf16.msra.mxu1 %v5702_v13  ;;  %v8393_v11 = vld [vmem:[#allocation5 + $0x2dc] sm:$0xf0] }
  0x6a   :  { %v5913_v13 = vld [vmem:[#allocation5 + $0xc0] sm:$0xf]  ;;  %v6170_v21 = vor.u32 %v8393_v11, %v6169_v10  ;;  %v6235_v10 = vld [vmem:[#allocation5 + $0x360] sm:$0xf0] }
  0x6b   :  { %v8329_v14 = vld [vmem:[#allocation5 + $0xdc] sm:$0xf0]  ;;  %v8341_v11 = vld [vmem:[#allocation5 + $0x144] sm:$0xf] }
  0x6c   :  { %v8457_v20 = vld [vmem:[#allocation5 + $0x4dc] sm:$0xf0]  ;;  %v5914_v24 = vor.u32 %v8329_v14, %v5913_v13  ;;  %v8397_v14 = vld [vmem:[#allocation5 + $0x304] sm:$0xf] }
  0x6d   :  { %v6137_v22 = vld [vmem:[#allocation5 + $0x280] sm:$0xf] }
  0x6e   :  { %v5881_v25 = vld [vmem:[#allocation5 + $0x80] sm:$0xf] }
  0x6f   :  { %v8321_v26 = vld [vmem:[#allocation5 + $0x9c] sm:$0xf0] }
  0x70   :  { %v6649_v28 = vld [vmem:[#allocation5 + $0x680] sm:$0xf] }
  0x71   :  { %v8513_v30 = vld [vmem:[#allocation5 + $0x69c] sm:$0xf0] }
  0x72   :  { %v6105_v35 = vld [vmem:[#allocation5 + $0x240] sm:$0xf] }
  0x73   :  { %v8377_v36 = vld [vmem:[#allocation5 + $0x25c] sm:$0xf0] }
  0x74   :  { %v5849_v39 = vld [vmem:[#allocation5 + $0x40] sm:$0xf]  ;;  %v6106_v46 = vor.u32 %v8377_v36, %v6105_v35  ;;  %v5915_v35 = vld [vmem:[#allocation5 + $0xe0] sm:$0xf0] }
  0x75   :  { %v8313_v40 = vld [vmem:[#allocation5 + $0x5c] sm:$0xf0]  ;;  %v8485_v36 = vld [vmem:[#allocation5 + $0x5c4] sm:$0xf] }
  0x76   :  { %v6617_v42 = vld [vmem:[#allocation5 + $0x640] sm:$0xf] }
  0x77   :  { %v8441_v45 = vld [vmem:[#allocation5 + $0x45c] sm:$0xf0] }
  0x78   :  { %v8369_v47 = vld [vmem:[#allocation5 + $0x21c] sm:$0xf0] }
  0x79   :  { %v5817_v50 = vld [vmem:[#allocation5] sm:$0xf] }
  0x7a   :  { %v8305_v51 = vld [vmem:[#allocation5 + $0x1c] sm:$0xf0] }
  0x7b   :  { %v8497_v58 = vld [vmem:[#allocation5 + $0x61c] sm:$0xf0]  ;;  %v5818_v60 = vor.u32 %v8305_v51, %v5817_v50  ;;  %v8365_v51 = vld [vmem:[#allocation5 + $0x204] sm:$0xf] }
  0xa8   :  { %v181_v17 = vpop.f32.mrf.mxu0 }
  0xa9   :  { %v182_v18 = vadd.f32 %v181_v17, %v144_v15  ;;  %v194_v19 = vpop.f32.mrf.mxu1  ;;  %v6714_v15 = vor.u32 %v8529_v6, %v6713_v4  ;;  %v6458_v17 = vor.u32 %v8465_v8, %v6457_v7  ;;  %v6011_v4 = vld [vmem:[#allocation5 + $0x1a0] sm:$0xf0] }
  0xaa   :  { %v195_v23 = vadd.f32 %v194_v19, %v145_v16  ;;  %v6681_v16 = vld [vmem:[#allocation5 + $0x6c0] sm:$0xf]  ;;  %v8405_v8 = vld [vmem:[#allocation5 + $0x344] sm:$0xf] }
  0xab   :  { %vm198_vm1 = vcmp.gt.f32.partialorder %v182_v18, 0.0  ;;  %v200_v27 = vmul.f32 0.01, %v182_v18  ;;  %v6425_v19 = vld [vmem:[#allocation5 + $0x4c0] sm:$0xf]  ;;  %v6238_v13 = vor.u32 %v8405_v8, %v6235_v10 }
  0xac   :  { %vm199_vm2 = vcmp.gt.f32.partialorder %v195_v23, 0.0  ;;  %v201_v29 = vmul.f32 0.01, %v195_v23  ;;  %v8509_v8 = vld [vmem:[#allocation5 + $0x684] sm:$0xf] }
  0xad   :  { %v202_v31 = vsel %vm198_vm1, %v182_v18, %v200_v27  ;;  %v8521_v18 = vld [vmem:[#allocation5 + $0x6dc] sm:$0xf0] }
  0xae   :  { %v9231_v32 = vpack.c.bf16 %v202_v31, %v202_v31  ;;  %v203_v33 = vsel %vm199_vm2, %v195_v23, %v201_v29  ;;  %v8385_v23 = vld [vmem:[#allocation5 + $0x29c] sm:$0xf0]  ;;  %v6682_v27 = vor.u32 %v8521_v18, %v6681_v16  ;;  %v6426_v29 = vor.u32 %v8457_v20, %v6425_v19  ;;  %v6203_v16 = vld [vmem:[#allocation5 + $0x320] sm:$0xf0] }
  0xaf   :  { %v9233_v38 = vpack.c.bf16 %v203_v33, %v203_v33  ;;  %v6393_v31 = vld [vmem:[#allocation5 + $0x480] sm:$0xf]  ;;  %v5947_v18 = vld [vmem:[#allocation5 + $0x120] sm:$0xf0]  ;;  %v6206_v19 = vor.u32 %v8397_v14, %v6203_v16 }
  0xb0   :  { %v183_v44 = vpop.f32.mrf.mxu0  ;;  %608 = vmatmul.bf16.vlgmr.msra.gmra.mxu2 %v9231_v32  ;;  %634 = vmatmul.bf16.vlgmr.msrb.gmra.mxu0 %v9231_v32  ;;  %v8449_v33 = vld [vmem:[#allocation5 + $0x49c] sm:$0xf0]  ;;  %v8501_v14 = vld [vmem:[#allocation5 + $0x644] sm:$0xf] }
  0xb1   :  { %v196_v48 = vpop.f32.mrf.mxu1  ;;  %621 = vmatmul.bf16.vlgmr.msra.gmra.mxu3 %v9233_v38  ;;  %647 = vmatmul.bf16.vlgmr.msrb.gmra.mxu1 %v9233_v38  ;;  %v6361_v44 = vld [vmem:[#allocation5 + $0x440] sm:$0xf] }
  0xb2   :  { %2287 = vmatpush.bf16.msra.mxu3 %v6298_v34  ;;  %2274 = vmatpush.bf16.msra.mxu2 %v6042_v37  ;;  %v6138_v34 = vor.u32 %v8385_v23, %v6137_v22  ;;  %v5882_v37 = vor.u32 %v8321_v26, %v5881_v25  ;;  %v5850_v48 = vor.u32 %v8313_v40, %v5849_v39  ;;  %v6171_v22 = vld [vmem:[#allocation5 + $0x2e0] sm:$0xf0] }
  0xb3   :  { %2313 = vmatpush.bf16.msrb.mxu1 %v6810_v41  ;;  %2300 = vmatpush.bf16.msrb.mxu0 %v6554_v43  ;;  %v6650_v41 = vor.u32 %v8513_v30, %v6649_v28  ;;  %v8505_v43 = vld [vmem:[#allocation5 + $0x65c] sm:$0xf0]  ;;  %v6362_v53 = vor.u32 %v8441_v45, %v6361_v44  ;;  %v6139_v25 = vld [vmem:[#allocation5 + $0x2a0] sm:$0xf0] }
  0xb4   :  { %v8541_v26 = vld [vmem:[#allocation5 + $0x784] sm:$0xf]  ;;  %v8433_v30 = vld [vmem:[#allocation5 + $0x41c] sm:$0xf0] }
  0xb5   :  { %v6779_v28 = vld [vmem:[#allocation5 + $0x7a0] sm:$0xf0] }
  0xb6   :  { %2288 = vmatpush.bf16.msra.mxu3 %v6266_v49  ;;  %2275 = vmatpush.bf16.msra.mxu2 %v6010_v52  ;;  %v8421_v49 = vld [vmem:[#allocation5 + $0x3c4] sm:$0xf]  ;;  %v6618_v52 = vor.u32 %v8505_v43, %v6617_v42 }
  0xb7   :  { %2314 = vmatpush.bf16.msrb.mxu1 %v6778_v55  ;;  %2301 = vmatpush.bf16.msrb.mxu0 %v6522_v57  ;;  %v8357_v55 = vld [vmem:[#allocation5 + $0x1c4] sm:$0xf]  ;;  %v6585_v57 = vld [vmem:[#allocation5 + $0x600] sm:$0xf]  ;;  %v6302_v63 = vor.u32 %v8421_v49, %v6299_v54 }
  0xb8   :  { %v6046_v1 = vor.u32 %v8357_v55, %v6043_v56  ;;  %v6555_v39 = vld [vmem:[#allocation5 + $0x5e0] sm:$0xf0] }
  0xb9   :  { %v6558_v40 = vor.u32 %v8485_v36, %v6555_v39  ;;  %v6107_v42 = vld [vmem:[#allocation5 + $0x260] sm:$0xf0]  ;;  %v8426_v39 = vld [vmem:[#allocation5 + $0x3e4] sm:$0xf0] }
  0xba   :  { %2289 = vmatpush.bf16.msra.mxu3 %v6234_v61  ;;  %2276 = vmatpush.bf16.msra.mxu2 %v5978_v0  ;;  %v8549_v61 = vld [vmem:[#allocation5 + $0x7c4] sm:$0xf] }
  0xbb   :  { %2315 = vmatpush.bf16.msrb.mxu1 %v6746_v3  ;;  %2302 = vmatpush.bf16.msrb.mxu0 %v6490_v5  ;;  %v8413_v0 = vld [vmem:[#allocation5 + $0x384] sm:$0xf]  ;;  %v6586_v5 = vor.u32 %v8497_v58, %v6585_v57  ;;  %v6814_v6 = vor.u32 %v8549_v61, %v6811_v62 }
  0xbc   :  { %v8349_v3 = vld [vmem:[#allocation5 + $0x184] sm:$0xf]  ;;  %v6270_v7 = vor.u32 %v8413_v0, %v6267_v2 }
  0xbd   :  { %v6747_v44 = vld [vmem:[#allocation5 + $0x760] sm:$0xf0] }
  0xbe   :  { %2290 = vmatpush.bf16.msra.mxu3 %v6202_v9  ;;  %2277 = vmatpush.bf16.msra.mxu2 %v5946_v12  ;;  %v6014_v9 = vor.u32 %v8349_v3, %v6011_v4  ;;  %v5979_v12 = vld [vmem:[#allocation5 + $0x160] sm:$0xf0] }
  0xbf   :  { %2316 = vmatpush.bf16.msrb.mxu1 %v6714_v15  ;;  %2303 = vmatpush.bf16.msrb.mxu0 %v6458_v17  ;;  %v5982_v15 = vor.u32 %v8341_v11, %v5979_v12  ;;  %v8333_v17 = vld [vmem:[#allocation5 + $0x104] sm:$0xf] }
  0xc0   :  { %660 = vmatmul.bf16.vlgmr.msrb.gmra.mxu2 %v9231_v32  ;;  %686 = vmatmul.bf16.vlgmr.msra.gmra.mxu0 %v9231_v32  ;;  %v6394_v32 = vor.u32 %v8449_v33, %v6393_v31  ;;  %v5950_v20 = vor.u32 %v8333_v17, %v5947_v18  ;;  %v6782_v31 = vor.u32 %v8541_v26, %v6779_v28  ;;  %v6523_v49 = vld [vmem:[#allocation5 + $0x5a0] sm:$0xf0] }
  0xc1   :  { %673 = vmatmul.bf16.vlgmr.msrb.gmra.mxu3 %v9233_v38  ;;  %699 = vmatmul.bf16.vlgmr.msra.gmra.mxu1 %v9233_v38  ;;  %v6073_v38 = vld [vmem:[#allocation5 + $0x200] sm:$0xf]  ;;  %v6715_v55 = vld [vmem:[#allocation5 + $0x720] sm:$0xf0] }
  0xc2   :  { %2291 = vmatpush.bf16.msra.mxu3 %v6170_v21  ;;  %2278 = vmatpush.bf16.msra.mxu2 %v5914_v24  ;;  %v6074_v59 = vor.u32 %v8369_v47, %v6073_v38  ;;  %v8389_v21 = vld [vmem:[#allocation5 + $0x2c4] sm:$0xf] }
  0xc3   :  { %2317 = vmatpush.bf16.msrb.mxu1 %v6682_v27  ;;  %2304 = vmatpush.bf16.msrb.mxu0 %v6426_v29  ;;  %v6174_v23 = vor.u32 %v8389_v21, %v6171_v22  ;;  %v8381_v24 = vld [vmem:[#allocation5 + $0x284] sm:$0xf]  ;;  %v6329_v29 = vld [vmem:[#allocation5 + $0x400] sm:$0xf] }
  0xc4   :  { %v6142_v27 = vor.u32 %v8381_v24, %v6139_v25  ;;  %v6330_v33 = vor.u32 %v8433_v30, %v6329_v29  ;;  %v5883_v38 = vld [vmem:[#allocation5 + $0xa0] sm:$0xf0]  ;;  %v9246_v25 = vld [vmem:[%s9519_s4] sm:$0xf] }
  0xc5   :  { %v8477_v47 = vld [vmem:[#allocation5 + $0x584] sm:$0xf]  ;;  %v272_v36 = vperm.slane %v9246_v25, 0 }
  0xc6   :  { %2292 = vmatpush.bf16.msra.mxu3 %v6138_v34  ;;  %2279 = vmatpush.bf16.msra.mxu2 %v5882_v37  ;;  %v8325_v34 = vld [vmem:[#allocation5 + $0xc4] sm:$0xf]  ;;  %v6526_v50 = vor.u32 %v8477_v47, %v6523_v49  ;;  %v8418_v47 = vld [vmem:[#allocation5 + $0x3a4] sm:$0xf0] }
  0xc7   :  { %2318 = vmatpush.bf16.msrb.mxu1 %v6650_v41  ;;  %2305 = vmatpush.bf16.msrb.mxu0 %v6394_v32  ;;  %v5918_v37 = vor.u32 %v8325_v34, %v5915_v35  ;;  %v8373_v41 = vld [vmem:[#allocation5 + $0x244] sm:$0xf] }
  0xc8   :  { %v8533_v32 = vld [vmem:[#allocation5 + $0x744] sm:$0xf]  ;;  %v6110_v43 = vor.u32 %v8373_v41, %v6107_v42 }
  0xc9   :  { %v6750_v45 = vor.u32 %v8533_v32, %v6747_v44  ;;  %v8309_v57 = vld [vmem:[#allocation5 + $0x44] sm:$0xf] }
  0xca   :  { %2293 = vmatpush.bf16.msra.mxu3 %v6106_v46  ;;  %2280 = vmatpush.bf16.msra.mxu2 %v5850_v48  ;;  %v8317_v46 = vld [vmem:[#allocation5 + $0x84] sm:$0xf] }
  0xcb   :  { %2319 = vmatpush.bf16.msrb.mxu1 %v6618_v52  ;;  %2306 = vmatpush.bf16.msrb.mxu0 %v6362_v53  ;;  %v5886_v48 = vor.u32 %v8317_v46, %v5883_v38  ;;  %v6075_v52 = vld [vmem:[#allocation5 + $0x220] sm:$0xf0]  ;;  %v6273_v38 = vld [vmem:[#allocation5 + $0x388] sm:$0xf] }
  0xcc   :  { %v8525_v53 = vld [vmem:[#allocation5 + $0x704] sm:$0xf]  ;;  %v6078_v54 = vor.u32 %v8365_v51, %v6075_v52  ;;  %v8362_v51 = vld [vmem:[#allocation5 + $0x1e4] sm:$0xf0] }
  0xcd   :  { %v6718_v56 = vor.u32 %v8525_v53, %v6715_v55  ;;  %v5851_v58 = vld [vmem:[#allocation5 + $0x60] sm:$0xf0]  ;;  %v6274_v53 = vor.u32 %v8418_v47, %v6273_v38  ;;  %v8410_v55 = vld [vmem:[#allocation5 + $0x364] sm:$0xf0] }
  0xce   :  { %2294 = vmatpush.bf16.msra.mxu3 %v6074_v59  ;;  %2281 = vmatpush.bf16.msra.mxu2 %v5818_v60  ;;  %v8469_v59 = vld [vmem:[#allocation5 + $0x544] sm:$0xf]  ;;  %v5854_v60 = vor.u32 %v8309_v57, %v5851_v58  ;;  %v275_v57 = vperm.slane %v9246_v25, 3  ;;  %v8538_v38 = vld [vmem:[#allocation5 + $0x764] sm:$0xf0] }
  0xcf   :  { %2320 = vmatpush.bf16.msrb.mxu1 %v6586_v5  ;;  %2307 = vmatpush.bf16.msrb.mxu0 %v6330_v33  ;;  %v6491_v61 = vld [vmem:[#allocation5 + $0x560] sm:$0xf0] }
  0xd0   :  { %v6494_v62 = vor.u32 %v8469_v59, %v6491_v61  ;;  %v6683_v0 = vld [vmem:[#allocation5 + $0x6e0] sm:$0xf0]  ;;  %v6017_v61 = vld [vmem:[#allocation5 + $0x188] sm:$0xf] }
  0xd1   :  { %v8301_v2 = vld [vmem:[#allocation5 + $0x4] sm:$0xf] }
  0xd2   :  { %2339 = vmatpush.bf16.msrb.mxu3 %v6302_v63  ;;  %2326 = vmatpush.bf16.msrb.mxu2 %v6046_v1  ;;  %v8517_v63 = vld [vmem:[#allocation5 + $0x6c4] sm:$0xf] }
  0xd3   :  { %2365 = vmatpush.bf16.msra.mxu1 %v6814_v6  ;;  %2352 = vmatpush.bf16.msra.mxu0 %v6558_v40  ;;  %v6686_v1 = vor.u32 %v8517_v63, %v6683_v0  ;;  %v5819_v3 = vld [vmem:[#allocation5 + $0x20] sm:$0xf0] }
  0xd4   :  { %v8461_v4 = vld [vmem:[#allocation5 + $0x504] sm:$0xf]  ;;  %v5822_v5 = vor.u32 %v8301_v2, %v5819_v3  ;;  %v6209_v2 = vld [vmem:[#allocation5 + $0x308] sm:$0xf] }
  0xd5   :  { %v6459_v6 = vld [vmem:[#allocation5 + $0x520] sm:$0xf0]  ;;  %v8402_v3 = vld [vmem:[#allocation5 + $0x324] sm:$0xf0] }
  0xd6   :  { %2340 = vmatpush.bf16.msrb.mxu3 %v6270_v7  ;;  %2327 = vmatpush.bf16.msrb.mxu2 %v6014_v9  ;;  %v6462_v7 = vor.u32 %v8461_v4, %v6459_v6  ;;  %v6651_v9 = vld [vmem:[#allocation5 + $0x6a0] sm:$0xf0] }
  0xd7   :  { %2366 = vmatpush.bf16.msra.mxu1 %v6782_v31  ;;  %2353 = vmatpush.bf16.msra.mxu0 %v6526_v50  ;;  %v6654_v10 = vor.u32 %v8509_v8, %v6651_v9  ;;  %v8453_v11 = vld [vmem:[#allocation5 + $0x4c4] sm:$0xf]  ;;  %v6049_v50 = vld [vmem:[#allocation5 + $0x1c8] sm:$0xf] }
  0xd8   :  { %v6427_v12 = vld [vmem:[#allocation5 + $0x4e0] sm:$0xf0]  ;;  %v6050_v58 = vor.u32 %v8362_v51, %v6049_v50  ;;  %v8346_v8 = vld [vmem:[#allocation5 + $0x164] sm:$0xf0] }
  0xd9   :  { %v8445_v17 = vld [vmem:[#allocation5 + $0x484] sm:$0xf]  ;;  %v5889_v50 = vld [vmem:[#allocation5 + $0x88] sm:$0xf] }
  0xda   :  { %2341 = vmatpush.bf16.msrb.mxu3 %v6238_v13  ;;  %2328 = vmatpush.bf16.msrb.mxu2 %v5982_v15  ;;  %v6430_v13 = vor.u32 %v8453_v11, %v6427_v12  ;;  %v6619_v15 = vld [vmem:[#allocation5 + $0x660] sm:$0xf0]  ;;  %v6210_v11 = vor.u32 %v8402_v3, %v6209_v2  ;;  %v6177_v12 = vld [vmem:[#allocation5 + $0x2c8] sm:$0xf]  ;;  %v8422_v2 = vld [vmem:[#allocation5 + $0x3cc] sm:$0xf] }
  0xdb   :  { %2367 = vmatpush.bf16.msra.mxu1 %v6750_v45  ;;  %2354 = vmatpush.bf16.msra.mxu0 %v6494_v62  ;;  %v6622_v16 = vor.u32 %v8501_v14, %v6619_v15  ;;  %v6395_v18 = vld [vmem:[#allocation5 + $0x4a0] sm:$0xf0]  ;;  %v8354_v62 = vld [vmem:[#allocation5 + $0x1a4] sm:$0xf0]  ;;  %v6307_v3 = vld [vmem:[#allocation5 + $0x3e8] sm:$0xf0] }
  0xdc   :  { %v6587_v21 = vld [vmem:[#allocation5 + $0x620] sm:$0xf0]  ;;  %v6018_v6 = vor.u32 %v8354_v62, %v6017_v61  ;;  %v6817_v14 = vld [vmem:[#allocation5 + $0x7c8] sm:$0xf] }
  0xdd   :  { %v6363_v24 = vld [vmem:[#allocation5 + $0x460] sm:$0xf0]  ;;  %v8554_v15 = vld [vmem:[#allocation5 + $0x7e4] sm:$0xf0] }
  0xde   :  { %2342 = vmatpush.bf16.msrb.mxu3 %v6206_v19  ;;  %2329 = vmatpush.bf16.msrb.mxu2 %v5950_v20  ;;  %v6398_v19 = vor.u32 %v8445_v17, %v6395_v18  ;;  %v8493_v20 = vld [vmem:[#allocation5 + $0x604] sm:$0xf]  ;;  %v8370_v61 = vld [vmem:[#allocation5 + $0x224] sm:$0xf0] }
  0xdf   :  { %2368 = vmatpush.bf16.msra.mxu1 %v6718_v56  ;;  %2355 = vmatpush.bf16.msra.mxu0 %v6462_v7  ;;  %v6590_v22 = vor.u32 %v8493_v20, %v6587_v21  ;;  %v8429_v28 = vld [vmem:[#allocation5 + $0x404] sm:$0xf]  ;;  %v5985_v7 = vld [vmem:[#allocation5 + $0x148] sm:$0xf] }
  0xe0   :  { %v6331_v29 = vld [vmem:[#allocation5 + $0x420] sm:$0xf0]  ;;  %v5986_v17 = vor.u32 %v8346_v8, %v5985_v7  ;;  %v8338_v20 = vld [vmem:[#allocation5 + $0x124] sm:$0xf0] }
  0xe1   :  { %v6334_v30 = vor.u32 %v8429_v28, %v6331_v29  ;;  %v8386_v29 = vld [vmem:[#allocation5 + $0x2a4] sm:$0xf0] }
  0xe2   :  { %2343 = vmatpush.bf16.msrb.mxu3 %v6174_v23  ;;  %2330 = vmatpush.bf16.msrb.mxu2 %v5918_v37  ;;  %v8437_v23 = vld [vmem:[#allocation5 + $0x444] sm:$0xf]  ;;  %v6305_v37 = vld [vmem:[#allocation5 + $0x3c8] sm:$0xf] }
  0xe3   :  { %2369 = vmatpush.bf16.msra.mxu1 %v6686_v1  ;;  %2356 = vmatpush.bf16.msra.mxu0 %v6430_v13  ;;  %v6366_v26 = vor.u32 %v8437_v23, %v6363_v24  ;;  %v6306_v44 = vor.u32 %v8426_v39, %v6305_v37  ;;  %v8394_v13 = vld [vmem:[#allocation5 + $0x2e4] sm:$0xf0] }
  0xe4   :  { %v6178_v24 = vor.u32 %v8394_v13, %v6177_v12  ;;  %v8330_v37 = vld [vmem:[#allocation5 + $0xe4] sm:$0xf0] }
  0xe5   :  { %v6561_v39 = vld [vmem:[#allocation5 + $0x5c8] sm:$0xf] }
  0xe6   :  { %2344 = vmatpush.bf16.msrb.mxu3 %v6142_v27  ;;  %2331 = vmatpush.bf16.msrb.mxu2 %v5886_v48  ;;  %v273_v27 = vperm.slane %v9246_v25, 1  ;;  %v6721_v62 = vld [vmem:[#allocation5 + $0x708] sm:$0xf] }
  0xe7   :  { %2370 = vmatpush.bf16.msra.mxu1 %v6654_v10  ;;  %2357 = vmatpush.bf16.msra.mxu0 %v6398_v19  ;;  %v274_v10 = vperm.slane %v9246_v25, 2  ;;  %v5953_v19 = vld [vmem:[#allocation5 + $0x108] sm:$0xf] }
  0xe8   :  { %v8474_v7 = vld [vmem:[#allocation5 + $0x564] sm:$0xf0] }
  0xe9   :  { %v8522_v12 = vld [vmem:[#allocation5 + $0x6e4] sm:$0xf0] }
  0xea   :  { %2345 = vmatpush.bf16.msrb.mxu3 %v6110_v43  ;;  %2332 = vmatpush.bf16.msrb.mxu2 %v5854_v60 }
  0xeb   :  { %2371 = vmatpush.bf16.msra.mxu1 %v6622_v16  ;;  %2358 = vmatpush.bf16.msra.mxu0 %v6366_v26  ;;  %v6818_v26 = vor.u32 %v8554_v15, %v6817_v14  ;;  %v8414_v15 = vld [vmem:[#allocation5 + $0x38c] sm:$0xf] }
  0xee   :  { %2346 = vmatpush.bf16.msrb.mxu3 %v6078_v54  ;;  %2333 = vmatpush.bf16.msrb.mxu2 %v5822_v5  ;;  %v6241_v54 = vld [vmem:[#allocation5 + $0x348] sm:$0xf] }
  0xef   :  { %2372 = vmatpush.bf16.msra.mxu1 %v6590_v22  ;;  %2359 = vmatpush.bf16.msra.mxu0 %v6334_v30  ;;  %v6242_v0 = vor.u32 %v8410_v55, %v6241_v54  ;;  %v6785_v30 = vld [vmem:[#allocation5 + $0x788] sm:$0xf] }
  0xf0   :  { %v6529_v54 = vld [vmem:[#allocation5 + $0x588] sm:$0xf] }
  0xf1   :  { %v8482_v55 = vld [vmem:[#allocation5 + $0x5a4] sm:$0xf0] }
 0x12d   :  { %v635_v31 = vpop.f32.mrf.mxu0 }
 0x12e   :  { %v636_v33 = vadd.f32 %v635_v31, %v273_v27  ;;  %v648_v34 = vpop.f32.mrf.mxu1  ;;  %v6145_v27 = vld [vmem:[#allocation5 + $0x288] sm:$0xf] }
 0x12f   :  { %v8546_v31 = vld [vmem:[#allocation5 + $0x7a4] sm:$0xf0] }
 0x130   :  { %v649_v35 = vadd.f32 %v648_v34, %v636_v33 }
 0x132   :  { %vm705_vm3 = vcmp.gt.f32.partialorder %v649_v35, 0.0  ;;  %v709_v40 = vmul.f32 0.01, %v649_v35 }
 0x133   :  { %v609_v41 = vpop.f32.mrf.mxu2 }
 0x134   :  { %v713_v42 = vsel %vm705_vm3, %v649_v35, %v709_v40  ;;  %v610_v32 = vadd.f32 %v609_v41, %v272_v36  ;;  %v622_v43 = vpop.f32.mrf.mxu3  ;;  %v5954_v35 = vor.u32 %v8338_v20, %v5953_v19  ;;  %v5921_v36 = vld [vmem:[#allocation5 + $0xc8] sm:$0xf] }
 0x135   :  { %v9250_v45 = vpack.c.bf16 %v713_v42, %v713_v42  ;;  %v637_v46 = vpop.f32.mrf.mxu0  ;;  %v8490_v40 = vld [vmem:[#allocation5 + $0x5e4] sm:$0xf0]  ;;  %v6146_v42 = vor.u32 %v8386_v29, %v6145_v27 }
 0x136   :  { %v623_v48 = vadd.f32 %v622_v43, %v610_v32  ;;  %v650_v49 = vpop.f32.mrf.mxu1  ;;  %v6786_v32 = vor.u32 %v8546_v31, %v6785_v30  ;;  %v6113_v43 = vld [vmem:[#allocation5 + $0x248] sm:$0xf]  ;;  %v8406_v30 = vld [vmem:[#allocation5 + $0x34c] sm:$0xf] }
 0x137   :  { %2295 = vmatmul.bf16.vlgmr.msra.gmra.mxu3 %v9250_v45  ;;  %v6753_v46 = vld [vmem:[#allocation5 + $0x748] sm:$0xf]  ;;  %v6562_v49 = vor.u32 %v8490_v40, %v6561_v39  ;;  %v6243_v31 = vld [vmem:[#allocation5 + $0x368] sm:$0xf0] }
 0x138   :  { %vm704_vm4 = vcmp.gt.f32.partialorder %v623_v48, 0.0  ;;  %v708_v52 = vmul.f32 0.01, %v623_v48  ;;  %2391 = vmatpush.bf16.msra.mxu3 %v6306_v44  ;;  %v8378_v44 = vld [vmem:[#allocation5 + $0x264] sm:$0xf0]  ;;  %v6246_v40 = vor.u32 %v8406_v30, %v6243_v31 }
 0x139   :  { %v6465_v19 = vld [vmem:[#allocation5 + $0x508] sm:$0xf]  ;;  %v6019_v39 = vld [vmem:[#allocation5 + $0x1a8] sm:$0xf0] }
 0x13a   :  { %v712_v56 = vsel %vm704_vm4, %v623_v48, %v708_v52  ;;  %v5922_v48 = vor.u32 %v8330_v37, %v5921_v36  ;;  %v8466_v20 = vld [vmem:[#allocation5 + $0x524] sm:$0xf0]  ;;  %v8350_v37 = vld [vmem:[#allocation5 + $0x18c] sm:$0xf] }
 0x13b   :  { %v9254_v59 = vpack.c.bf16 %v712_v56, %v712_v56  ;;  %v611_v60 = vpop.f32.mrf.mxu2  ;;  %v8514_v27 = vld [vmem:[#allocation5 + $0x6a4] sm:$0xf0]  ;;  %v6466_v29 = vor.u32 %v8466_v20, %v6465_v19  ;;  %v8374_v19 = vld [vmem:[#allocation5 + $0x24c] sm:$0xf] }
 0x13c   :  { %v624_v63 = vpop.f32.mrf.mxu3  ;;  %2392 = vmatpush.bf16.msra.mxu3 %v6274_v53  ;;  %v8322_v53 = vld [vmem:[#allocation5 + $0xa4] sm:$0xf0]  ;;  %v6531_v30 = vld [vmem:[#allocation5 + $0x5a8] sm:$0xf0] }
 0x13d   :  { %v687_v1 = vpop.f32.mrf.mxu0  ;;  %2282 = vmatmul.bf16.vlgmr.msra.gmra.mxu2 %v9254_v59  ;;  %v6081_v60 = vld [vmem:[#allocation5 + $0x208] sm:$0xf] }
 0x13e   :  { %v688_v4 = vadd.f32 %v687_v1, %v275_v57  ;;  %v700_v5 = vpop.f32.mrf.mxu1  ;;  %2378 = vmatpush.bf16.msra.mxu2 %v6050_v58  ;;  %v6114_v57 = vor.u32 %v8378_v44, %v6113_v43  ;;  %v6754_v58 = vor.u32 %v8538_v38, %v6753_v46  ;;  %v8530_v63 = vld [vmem:[#allocation5 + $0x724] sm:$0xf0]  ;;  %v6530_v1 = vor.u32 %v8482_v55, %v6529_v54  ;;  %v8398_v43 = vld [vmem:[#allocation5 + $0x30c] sm:$0xf] }
 0x13f   :  { %v6082_v8 = vor.u32 %v8370_v61, %v6081_v60  ;;  %v6211_v44 = vld [vmem:[#allocation5 + $0x328] sm:$0xf0]  ;;  %v6022_v46 = vor.u32 %v8350_v37, %v6019_v39  ;;  %v6401_v38 = vld [vmem:[#allocation5 + $0x488] sm:$0xf] }
 0x140   :  { %v701_v9 = vadd.f32 %v700_v5, %v688_v4  ;;  %2393 = vmatpush.bf16.msra.mxu3 %v6242_v0  ;;  %v5890_v0 = vor.u32 %v8322_v53, %v5889_v50  ;;  %v5857_v4 = vld [vmem:[#allocation5 + $0x48] sm:$0xf]  ;;  %v5987_v50 = vld [vmem:[#allocation5 + $0x168] sm:$0xf0] }
 0x141   :  { %v8314_v5 = vld [vmem:[#allocation5 + $0x64] sm:$0xf0]  ;;  %v8390_v55 = vld [vmem:[#allocation5 + $0x2cc] sm:$0xf] }
 0x142   :  { %vm707_vm5 = vcmp.gt.f32.partialorder %v701_v9, 0.0  ;;  %v711_v16 = vmul.f32 0.01, %v701_v9  ;;  %2379 = vmatpush.bf16.msra.mxu2 %v6018_v6  ;;  %v6497_v6 = vld [vmem:[#allocation5 + $0x548] sm:$0xf]  ;;  %v5858_v13 = vor.u32 %v8314_v5, %v5857_v4 }
 0x143   :  { %v661_v18 = vpop.f32.mrf.mxu2  ;;  %v6498_v14 = vor.u32 %v8474_v7, %v6497_v6  ;;  %v6593_v53 = vld [vmem:[#allocation5 + $0x608] sm:$0xf]  ;;  %v6819_v60 = vld [vmem:[#allocation5 + $0x7e8] sm:$0xf0] }
 0x144   :  { %v715_v21 = vsel %vm707_vm5, %v701_v9, %v711_v16  ;;  %v662_v22 = vadd.f32 %v661_v18, %v274_v10  ;;  %v674_v23 = vpop.f32.mrf.mxu3  ;;  %2394 = vmatpush.bf16.msra.mxu3 %v6210_v11  ;;  %v6722_v9 = vor.u32 %v8530_v63, %v6721_v62  ;;  %v6310_v10 = vor.u32 %v8422_v2, %v6307_v3  ;;  %v6689_v11 = vld [vmem:[#allocation5 + $0x6c8] sm:$0xf]  ;;  %v6275_v16 = vld [vmem:[#allocation5 + $0x3a8] sm:$0xf0] }
 0x145   :  { %v9258_v25 = vpack.c.bf16 %v715_v21, %v715_v21  ;;  %v689_v28 = vpop.f32.mrf.mxu0  ;;  %v8306_v18 = vld [vmem:[#allocation5 + $0x24] sm:$0xf0]  ;;  %v6690_v21 = vor.u32 %v8522_v12, %v6689_v11  ;;  %v5955_v2 = vld [vmem:[#allocation5 + $0x128] sm:$0xf0] }
 0x146   :  { %v675_v33 = vadd.f32 %v674_v23, %v662_v22  ;;  %v702_v34 = vpop.f32.mrf.mxu1  ;;  %2380 = vmatpush.bf16.msra.mxu2 %v5986_v17  ;;  %v5825_v17 = vld [vmem:[#allocation5 + $0x8] sm:$0xf]  ;;  %v8358_v22 = vld [vmem:[#allocation5 + $0x1cc] sm:$0xf] }
 0x147   :  { %2321 = vmatmul.bf16.vlgmr.msrb.gmra.mxu1 %v9258_v25  ;;  %2347 = vmatmul.bf16.vlgmr.msrb.gmra.mxu3 %v9250_v45  ;;  %v6051_v23 = vld [vmem:[#allocation5 + $0x1e8] sm:$0xf0]  ;;  %v5826_v28 = vor.u32 %v8306_v18, %v5825_v17  ;;  %v6433_v34 = vld [vmem:[#allocation5 + $0x4c8] sm:$0xf] }
 0x148   :  { %vm706_vm6 = vcmp.gt.f32.partialorder %v675_v33, 0.0  ;;  %v710_v41 = vmul.f32 0.01, %v675_v33  ;;  %2395 = vmatpush.bf16.msra.mxu3 %v6178_v24  ;;  %2417 = vmatpush.bf16.msrb.mxu1 %v6818_v26  ;;  %v6278_v24 = vor.u32 %v8414_v15, %v6275_v16  ;;  %v6657_v26 = vld [vmem:[#allocation5 + $0x688] sm:$0xf] }
 0x149   :  { %v6658_v36 = vor.u32 %v8514_v27, %v6657_v26  ;;  %v8498_v54 = vld [vmem:[#allocation5 + $0x624] sm:$0xf0]  ;;  %v8382_v5 = vld [vmem:[#allocation5 + $0x28c] sm:$0xf] }
 0x14a   :  { %v714_v47 = vsel %vm706_vm6, %v675_v33, %v710_v41  ;;  %2381 = vmatpush.bf16.msra.mxu2 %v5954_v35  ;;  %v6054_v33 = vor.u32 %v8358_v22, %v6051_v23  ;;  %v8458_v35 = vld [vmem:[#allocation5 + $0x4e4] sm:$0xf0]  ;;  %v6147_v7 = vld [vmem:[#allocation5 + $0x2a8] sm:$0xf0] }
 0x14b   :  { %v9262_v51 = vpack.c.bf16 %v714_v47, %v714_v47  ;;  %v663_v52 = vpop.f32.mrf.mxu2  ;;  %v6625_v41 = vld [vmem:[#allocation5 + $0x648] sm:$0xf]  ;;  %v8486_v15 = vld [vmem:[#allocation5 + $0x5cc] sm:$0xf]  ;;  %v6150_v17 = vor.u32 %v8382_v5, %v6147_v7  ;;  %v6249_v5 = vld [vmem:[#allocation5 + $0x350] sm:$0xf] }
 0x14c   :  { %v676_v56 = vpop.f32.mrf.mxu3  ;;  %2396 = vmatpush.bf16.msra.mxu3 %v6146_v42  ;;  %2418 = vmatpush.bf16.msrb.mxu1 %v6786_v32  ;;  %v8506_v42 = vld [vmem:[#allocation5 + $0x664] sm:$0xf0]  ;;  %v6434_v32 = vor.u32 %v8458_v35, %v6433_v34  ;;  %v6214_v52 = vor.u32 %v8398_v43, %v6211_v44  ;;  %v6563_v16 = vld [vmem:[#allocation5 + $0x5e8] sm:$0xf0] }
 0x14d   :  { %2308 = vmatmul.bf16.vlgmr.msrb.gmra.mxu0 %v9262_v51  ;;  %2334 = vmatmul.bf16.vlgmr.msrb.gmra.mxu2 %v9254_v59  ;;  %v8450_v47 = vld [vmem:[#allocation5 + $0x4a4] sm:$0xf0]  ;;  %v8534_v22 = vld [vmem:[#allocation5 + $0x74c] sm:$0xf]  ;;  %v6566_v26 = vor.u32 %v8486_v15, %v6563_v16 }
 0x14e   :  { %2382 = vmatpush.bf16.msra.mxu2 %v5922_v48  ;;  %2404 = vmatpush.bf16.msrb.mxu0 %v6562_v49  ;;  %v6626_v48 = vor.u32 %v8506_v42, %v6625_v41  ;;  %v8342_v49 = vld [vmem:[#allocation5 + $0x14c] sm:$0xf]  ;;  %v6402_v56 = vor.u32 %v8450_v47, %v6401_v38  ;;  %v6369_v62 = vld [vmem:[#allocation5 + $0x448] sm:$0xf]  ;;  %v6313_v41 = vld [vmem:[#allocation5 + $0x3d0] sm:$0xf] }
 0x14f   :  { %v5990_v61 = vor.u32 %v8342_v49, %v5987_v50  ;;  %v8442_v63 = vld [vmem:[#allocation5 + $0x464] sm:$0xf0]  ;;  %v6755_v23 = vld [vmem:[#allocation5 + $0x768] sm:$0xf0]  ;;  %v8427_v42 = vld [vmem:[#allocation5 + $0x3ec] sm:$0xf0] }
 0x150   :  { %2397 = vmatpush.bf16.msra.mxu3 %v6114_v57  ;;  %2419 = vmatpush.bf16.msrb.mxu1 %v6754_v58  ;;  %v6179_v57 = vld [vmem:[#allocation5 + $0x2e8] sm:$0xf0]  ;;  %v6370_v6 = vor.u32 %v8442_v63, %v6369_v62  ;;  %v6337_v11 = vld [vmem:[#allocation5 + $0x408] sm:$0xf]  ;;  %v6057_v62 = vld [vmem:[#allocation5 + $0x1d0] sm:$0xf] }
 0x151   :  { %v8550_v58 = vld [vmem:[#allocation5 + $0x7cc] sm:$0xf]  ;;  %v6182_v3 = vor.u32 %v8390_v55, %v6179_v57  ;;  %v8434_v12 = vld [vmem:[#allocation5 + $0x424] sm:$0xf0]  ;;  %v8419_v55 = vld [vmem:[#allocation5 + $0x3ac] sm:$0xf0] }
 0x152   :  { %2383 = vmatpush.bf16.msra.mxu2 %v5890_v0  ;;  %2405 = vmatpush.bf16.msrb.mxu0 %v6530_v1  ;;  %v6594_v0 = vor.u32 %v8498_v54, %v6593_v53  ;;  %v8334_v1 = vld [vmem:[#allocation5 + $0x10c] sm:$0xf]  ;;  %v6822_v4 = vor.u32 %v8550_v58, %v6819_v60  ;;  %v6338_v20 = vor.u32 %v8434_v12, %v6337_v11  ;;  %v6281_v54 = vld [vmem:[#allocation5 + $0x390] sm:$0xf] }
 0x153   :  { %v8318_v27 = vld [vmem:[#allocation5 + $0x8c] sm:$0xf]  ;;  %v8363_v63 = vld [vmem:[#allocation5 + $0x1ec] sm:$0xf0] }
 0x154   :  { %2398 = vmatpush.bf16.msra.mxu3 %v6082_v8  ;;  %2420 = vmatpush.bf16.msrb.mxu1 %v6722_v9  ;;  %v8542_v8 = vld [vmem:[#allocation5 + $0x78c] sm:$0xf]  ;;  %v6058_v7 = vor.u32 %v8363_v63, %v6057_v62  ;;  %v6025_v11 = vld [vmem:[#allocation5 + $0x190] sm:$0xf] }
 0x155   :  { %v6787_v9 = vld [vmem:[#allocation5 + $0x7a8] sm:$0xf0]  ;;  %v8355_v12 = vld [vmem:[#allocation5 + $0x1ac] sm:$0xf0] }
 0x156   :  { %2384 = vmatpush.bf16.msra.mxu2 %v5858_v13  ;;  %2406 = vmatpush.bf16.msrb.mxu0 %v6498_v14  ;;  %v8326_v13 = vld [vmem:[#allocation5 + $0xcc] sm:$0xf]  ;;  %v6790_v18 = vor.u32 %v8542_v8, %v6787_v9 }
 0x157   :  { %2373 = vmatmul.bf16.vlgmr.msra.gmra.mxu1 %v9258_v25  ;;  %2399 = vmatmul.bf16.vlgmr.msra.gmra.mxu3 %v9250_v45  ;;  %v5923_v14 = vld [vmem:[#allocation5 + $0xe8] sm:$0xf0] }
 0x158   :  { %2443 = vmatpush.bf16.msrb.mxu3 %v6310_v10  ;;  %2421 = vmatpush.bf16.msrb.mxu1 %v6690_v21  ;;  %v5958_v10 = vor.u32 %v8334_v1, %v5955_v2  ;;  %v6115_v21 = vld [vmem:[#allocation5 + $0x268] sm:$0xf0] }
 0x159   :  { %v6118_v31 = vor.u32 %v8374_v19, %v6115_v21  ;;  %v8366_v34 = vld [vmem:[#allocation5 + $0x20c] sm:$0xf]  ;;  %v6026_v19 = vor.u32 %v8355_v12, %v6025_v11  ;;  %v8531_v11 = vld [vmem:[#allocation5 + $0x72c] sm:$0xf0] }
 0x15a   :  { %2385 = vmatpush.bf16.msra.mxu2 %v5826_v28  ;;  %2407 = vmatpush.bf16.msrb.mxu0 %v6466_v29  ;;  %v5891_v28 = vld [vmem:[#allocation5 + $0xa8] sm:$0xf0] }
 0x15b   :  { %v8478_v29 = vld [vmem:[#allocation5 + $0x58c] sm:$0xf]  ;;  %v5894_v39 = vor.u32 %v8318_v27, %v5891_v28 }
 0x15c   :  { %2444 = vmatpush.bf16.msrb.mxu3 %v6278_v24  ;;  %2422 = vmatpush.bf16.msrb.mxu1 %v6658_v36  ;;  %v5926_v24 = vor.u32 %v8326_v13, %v5923_v14  ;;  %v6083_v35 = vld [vmem:[#allocation5 + $0x228] sm:$0xf0] }
 0x15d   :  { %2360 = vmatmul.bf16.vlgmr.msra.gmra.mxu0 %v9262_v51  ;;  %2386 = vmatmul.bf16.vlgmr.msra.gmra.mxu2 %v9254_v59  ;;  %v8526_v36 = vld [vmem:[#allocation5 + $0x70c] sm:$0xf]  ;;  %v6086_v38 = vor.u32 %v8366_v34, %v6083_v35  ;;  %v8555_v34 = vld [vmem:[#allocation5 + $0x7ec] sm:$0xf0] }
 0x15e   :  { %2430 = vmatpush.bf16.msrb.mxu2 %v6054_v33  ;;  %2408 = vmatpush.bf16.msrb.mxu0 %v6434_v32  ;;  %v6758_v33 = vor.u32 %v8534_v22, %v6755_v23  ;;  %v6723_v37 = vld [vmem:[#allocation5 + $0x728] sm:$0xf0]  ;;  %v5993_v23 = vld [vmem:[#allocation5 + $0x150] sm:$0xf] }
 0x15f   :  { %v8310_v32 = vld [vmem:[#allocation5 + $0x4c] sm:$0xf]  ;;  %v6726_v47 = vor.u32 %v8526_v36, %v6723_v37 }
 0x160   :  { %2445 = vmatpush.bf16.msrb.mxu3 %v6246_v40  ;;  %2423 = vmatpush.bf16.msrb.mxu1 %v6626_v48  ;;  %v6534_v40 = vor.u32 %v8478_v29, %v6531_v30  ;;  %v5859_v43 = vld [vmem:[#allocation5 + $0x68] sm:$0xf0]  ;;  %v6314_v48 = vor.u32 %v8427_v42, %v6313_v41  ;;  %v6185_v29 = vld [vmem:[#allocation5 + $0x2d0] sm:$0xf] }
 0x161   :  { %v8470_v44 = vld [vmem:[#allocation5 + $0x54c] sm:$0xf]  ;;  %v8339_v41 = vld [vmem:[#allocation5 + $0x12c] sm:$0xf0] }
 0x162   :  { %2431 = vmatpush.bf16.msrb.mxu2 %v6022_v46  ;;  %2409 = vmatpush.bf16.msrb.mxu0 %v6402_v56  ;;  %v6499_v46 = vld [vmem:[#allocation5 + $0x568] sm:$0xf0] }
 0x163   :  { %v8518_v49 = vld [vmem:[#allocation5 + $0x6cc] sm:$0xf]  ;;  %v6502_v53 = vor.u32 %v8470_v44, %v6499_v46  ;;  %v8387_v46 = vld [vmem:[#allocation5 + $0x2ac] sm:$0xf0] }
 0x164   :  { %2446 = vmatpush.bf16.msrb.mxu3 %v6214_v52  ;;  %2424 = vmatpush.bf16.msrb.mxu1 %v6594_v0  ;;  %v6691_v50 = vld [vmem:[#allocation5 + $0x6e8] sm:$0xf0]  ;;  %v5862_v52 = vor.u32 %v8310_v32, %v5859_v43  ;;  %v6282_v0 = vor.u32 %v8419_v55, %v6281_v54  ;;  %v6153_v43 = vld [vmem:[#allocation5 + $0x290] sm:$0xf] }
 0x165   :  { %v8302_v56 = vld [vmem:[#allocation5 + $0xc] sm:$0xf]  ;;  %v6569_v54 = vld [vmem:[#allocation5 + $0x5d0] sm:$0xf] }
 0x166   :  { %2432 = vmatpush.bf16.msrb.mxu2 %v5990_v61  ;;  %2410 = vmatpush.bf16.msrb.mxu0 %v6370_v6  ;;  %v5827_v57 = vld [vmem:[#allocation5 + $0x28] sm:$0xf0]  ;;  %v6694_v61 = vor.u32 %v8518_v49, %v6691_v50  ;;  %v8411_v6 = vld [vmem:[#allocation5 + $0x36c] sm:$0xf0] }
 0x167   :  { %2425 = vmatmul.bf16.vlgmr.msrb.gmra.mxu1 %v9258_v25  ;;  %v8462_v58 = vld [vmem:[#allocation5 + $0x50c] sm:$0xf]  ;;  %v6250_v13 = vor.u32 %v8411_v6, %v6249_v5  ;;  %v8491_v55 = vld [vmem:[#allocation5 + $0x5ec] sm:$0xf0] }
 0x168   :  { %2447 = vmatpush.bf16.msrb.mxu3 %v6182_v3  ;;  %2469 = vmatpush.bf16.msra.mxu1 %v6822_v4  ;;  %v6467_v60 = vld [vmem:[#allocation5 + $0x528] sm:$0xf0]  ;;  %v5830_v3 = vor.u32 %v8302_v56, %v5827_v57  ;;  %v6154_v56 = vor.u32 %v8387_v46, %v6153_v43  ;;  %v6570_v63 = vor.u32 %v8491_v55, %v6569_v54  ;;  %v8483_v5 = vld [vmem:[#allocation5 + $0x5ac] sm:$0xf0]  ;;  %v8407_v43 = vld [vmem:[#allocation5 + $0x354] sm:$0xf] }
 0x169   :  { %v8510_v1 = vld [vmem:[#allocation5 + $0x68c] sm:$0xf]  ;;  %v6470_v4 = vor.u32 %v8462_v58, %v6467_v60  ;;  %v6121_v60 = vld [vmem:[#allocation5 + $0x250] sm:$0xf]  ;;  %v6251_v46 = vld [vmem:[#allocation5 + $0x370] sm:$0xf0] }
 0x16a   :  { %2433 = vmatpush.bf16.msrb.mxu2 %v5958_v10  ;;  %2411 = vmatpush.bf16.msrb.mxu0 %v6338_v20  ;;  %v6659_v2 = vld [vmem:[#allocation5 + $0x6a8] sm:$0xf0]  ;;  %v6633_v54 = vld [vmem:[#allocation5 + $0x650] sm:$0xf] }
 0x16b   :  { %v8454_v8 = vld [vmem:[#allocation5 + $0x4cc] sm:$0xf]  ;;  %v6662_v10 = vor.u32 %v8510_v1, %v6659_v2  ;;  %v8539_v1 = vld [vmem:[#allocation5 + $0x76c] sm:$0xf0] }
 0x16c   :  { %2448 = vmatpush.bf16.msrb.mxu3 %v6150_v17  ;;  %2470 = vmatpush.bf16.msra.mxu1 %v6790_v18  ;;  %v6435_v9 = vld [vmem:[#allocation5 + $0x4e8] sm:$0xf0]  ;;  %v6217_v17 = vld [vmem:[#allocation5 + $0x310] sm:$0xf] }
 0x16d   :  { %2412 = vmatmul.bf16.vlgmr.msrb.gmra.mxu0 %v9262_v51  ;;  %v8502_v14 = vld [vmem:[#allocation5 + $0x64c] sm:$0xf]  ;;  %v6438_v16 = vor.u32 %v8454_v8, %v6435_v9  ;;  %v8403_v18 = vld [vmem:[#allocation5 + $0x32c] sm:$0xf0] }
 0x16e   :  { %2434 = vmatpush.bf16.msrb.mxu2 %v5926_v24  ;;  %2456 = vmatpush.bf16.msra.mxu0 %v6566_v26  ;;  %v6627_v15 = vld [vmem:[#allocation5 + $0x668] sm:$0xf0]  ;;  %v8347_v24 = vld [vmem:[#allocation5 + $0x16c] sm:$0xf0]  ;;  %v6218_v26 = vor.u32 %v8403_v18, %v6217_v17 }
 0x16f   :  { %v8446_v20 = vld [vmem:[#allocation5 + $0x48c] sm:$0xf]  ;;  %v6630_v22 = vor.u32 %v8502_v14, %v6627_v15  ;;  %v5994_v35 = vor.u32 %v8347_v24, %v5993_v23  ;;  %v5897_v2 = vld [vmem:[#allocation5 + $0x90] sm:$0xf]  ;;  %v8423_v14 = vld [vmem:[#allocation5 + $0x3d4] sm:$0xf] }
 0x170   :  { %2449 = vmatpush.bf16.msrb.mxu3 %v6118_v31  ;;  %2471 = vmatpush.bf16.msra.mxu1 %v6758_v33  ;;  %v6403_v21 = vld [vmem:[#allocation5 + $0x4a8] sm:$0xf0]  ;;  %v8395_v31 = vld [vmem:[#allocation5 + $0x2ec] sm:$0xf0]  ;;  %v6315_v15 = vld [vmem:[#allocation5 + $0x3f0] sm:$0xf0] }
 0x171   :  { %v8494_v27 = vld [vmem:[#allocation5 + $0x60c] sm:$0xf]  ;;  %v6406_v30 = vor.u32 %v8446_v20, %v6403_v21  ;;  %v6825_v33 = vld [vmem:[#allocation5 + $0x7d0] sm:$0xf]  ;;  %v6186_v42 = vor.u32 %v8395_v31, %v6185_v29  ;;  %v6283_v29 = vld [vmem:[#allocation5 + $0x3b0] sm:$0xf0] }
 0x172   :  { %2435 = vmatpush.bf16.msrb.mxu2 %v5894_v39  ;;  %2457 = vmatpush.bf16.msra.mxu0 %v6534_v40  ;;  %v6595_v28 = vld [vmem:[#allocation5 + $0x628] sm:$0xf0]  ;;  %v5961_v40 = vld [vmem:[#allocation5 + $0x110] sm:$0xf]  ;;  %v6826_v32 = vor.u32 %v8555_v34, %v6825_v33 }
 0x173   :  { %v8438_v36 = vld [vmem:[#allocation5 + $0x44c] sm:$0xf]  ;;  %v6598_v39 = vor.u32 %v8494_v27, %v6595_v28  ;;  %v8371_v9 = vld [vmem:[#allocation5 + $0x22c] sm:$0xf0]  ;;  %v8415_v28 = vld [vmem:[#allocation5 + $0x394] sm:$0xf] }
 0x174   :  { %2450 = vmatpush.bf16.msrb.mxu3 %v6086_v38  ;;  %2472 = vmatpush.bf16.msra.mxu1 %v6726_v47  ;;  %v6371_v37 = vld [vmem:[#allocation5 + $0x468] sm:$0xf0]  ;;  %v6793_v38 = vld [vmem:[#allocation5 + $0x790] sm:$0xf] }
 0x175   :  { %v6374_v44 = vor.u32 %v8438_v36, %v6371_v37  ;;  %v8547_v47 = vld [vmem:[#allocation5 + $0x7ac] sm:$0xf0]  ;;  %v8430_v49 = vld [vmem:[#allocation5 + $0x40c] sm:$0xf]  ;;  %v6059_v36 = vld [vmem:[#allocation5 + $0x1f0] sm:$0xf0] }
 0x176   :  { %2436 = vmatpush.bf16.msrb.mxu2 %v5862_v52  ;;  %2458 = vmatpush.bf16.msra.mxu0 %v6502_v53  ;;  %v6339_v50 = vld [vmem:[#allocation5 + $0x428] sm:$0xf0]  ;;  %v5929_v52 = vld [vmem:[#allocation5 + $0xd0] sm:$0xf]  ;;  %v6794_v57 = vor.u32 %v8547_v47, %v6793_v38 }
 0x177   :  { %2451 = vmatmul.bf16.vlgmr.msrb.gmra.mxu3 %v9250_v45  ;;  %v8331_v53 = vld [vmem:[#allocation5 + $0xec] sm:$0xf0]  ;;  %v6342_v58 = vor.u32 %v8430_v49, %v6339_v50  ;;  %v6027_v49 = vld [vmem:[#allocation5 + $0x1b0] sm:$0xf0] }
 0x178   :  { %2495 = vmatpush.bf16.msra.mxu3 %v6314_v48  ;;  %2473 = vmatpush.bf16.msra.mxu1 %v6694_v61  ;;  %v5962_v48 = vor.u32 %v8339_v41, %v5961_v40  ;;  %v8379_v61 = vld [vmem:[#allocation5 + $0x26c] sm:$0xf0]  ;;  %v5930_v62 = vor.u32 %v8331_v53, %v5929_v52  ;;  %v6254_v52 = vor.u32 %v8407_v43, %v6251_v46  ;;  %v6539_v43 = vld [vmem:[#allocation5 + $0x5b0] sm:$0xf0] }
 0x179   :  { %v6122_v6 = vor.u32 %v8379_v61, %v6121_v60  ;;  %v8315_v17 = vld [vmem:[#allocation5 + $0x6c] sm:$0xf0]  ;;  %v8367_v46 = vld [vmem:[#allocation5 + $0x214] sm:$0xf] }
 0x17a   :  { %2437 = vmatpush.bf16.msrb.mxu2 %v5830_v3  ;;  %2459 = vmatpush.bf16.msra.mxu0 %v6470_v4  ;;  %v8323_v3 = vld [vmem:[#allocation5 + $0xac] sm:$0xf0] }
 0x17b   :  { %v6537_v4 = vld [vmem:[#allocation5 + $0x590] sm:$0xf]  ;;  %v5898_v12 = vor.u32 %v8323_v3, %v5897_v2 }
 0x17c   :  { %2496 = vmatpush.bf16.msra.mxu3 %v6282_v0  ;;  %2474 = vmatpush.bf16.msra.mxu1 %v6662_v10  ;;  %v6761_v0 = vld [vmem:[#allocation5 + $0x750] sm:$0xf] }
 0x17d   :  { %2438 = vmatmul.bf16.vlgmr.msrb.gmra.mxu2 %v9254_v59  ;;  %v6762_v8 = vor.u32 %v8539_v1, %v6761_v0  ;;  %v6729_v10 = vld [vmem:[#allocation5 + $0x710] sm:$0xf] }
 0x17e   :  { %2482 = vmatpush.bf16.msra.mxu2 %v6058_v7  ;;  %2460 = vmatpush.bf16.msra.mxu0 %v6438_v16  ;;  %v6089_v7 = vld [vmem:[#allocation5 + $0x210] sm:$0xf]  ;;  %v6730_v21 = vor.u32 %v8531_v11, %v6729_v10 }
 0x17f   :  { %v5865_v16 = vld [vmem:[#allocation5 + $0x50] sm:$0xf]  ;;  %v6090_v20 = vor.u32 %v8371_v9, %v6089_v7  ;;  %v6827_v9 = vld [vmem:[#allocation5 + $0x7f0] sm:$0xf0] }
 0x180   :  { %2497 = vmatpush.bf16.msra.mxu3 %v6250_v13  ;;  %2475 = vmatpush.bf16.msra.mxu1 %v6630_v22  ;;  %v6538_v13 = vor.u32 %v8483_v5, %v6537_v4  ;;  %v6505_v18 = vld [vmem:[#allocation5 + $0x550] sm:$0xf]  ;;  %v6318_v22 = vor.u32 %v8423_v14, %v6315_v15  ;;  %v8391_v5 = vld [vmem:[#allocation5 + $0x2d4] sm:$0xf] }
 0x181   :  { %v6697_v23 = vld [vmem:[#allocation5 + $0x6d0] sm:$0xf] }
 0x182   :  { %2483 = vmatpush.bf16.msra.mxu2 %v6026_v19  ;;  %2461 = vmatpush.bf16.msra.mxu0 %v6406_v30  ;;  %v8475_v19 = vld [vmem:[#allocation5 + $0x56c] sm:$0xf0] }
 0x183   :  { %v8523_v24 = vld [vmem:[#allocation5 + $0x6ec] sm:$0xf0]  ;;  %v6506_v27 = vor.u32 %v8475_v19, %v6505_v18  ;;  %v6155_v18 = vld [vmem:[#allocation5 + $0x2b0] sm:$0xf0] }
 0x184   :  { %2498 = vmatpush.bf16.msra.mxu3 %v6218_v26  ;;  %2476 = vmatpush.bf16.msra.mxu1 %v6598_v39  ;;  %v5866_v26 = vor.u32 %v8315_v17, %v5865_v16  ;;  %v5833_v30 = vld [vmem:[#allocation5 + $0x10] sm:$0xf]  ;;  %v6698_v37 = vor.u32 %v8523_v24, %v6697_v23  ;;  %v6286_v39 = vor.u32 %v8415_v28, %v6283_v29  ;;  %v8383_v17 = vld [vmem:[#allocation5 + $0x294] sm:$0xf] }
 0x185   :  { %v8307_v31 = vld [vmem:[#allocation5 + $0x2c] sm:$0xf0]  ;;  %v8487_v28 = vld [vmem:[#allocation5 + $0x5d4] sm:$0xf] }
 0x186   :  { %2484 = vmatpush.bf16.msra.mxu2 %v5994_v35  ;;  %2462 = vmatpush.bf16.msra.mxu0 %v6374_v44  ;;  %v6473_v33 = vld [vmem:[#allocation5 + $0x510] sm:$0xf]  ;;  %v8359_v35 = vld [vmem:[#allocation5 + $0x1d4] sm:$0xf]  ;;  %v5834_v40 = vor.u32 %v8307_v31, %v5833_v30  ;;  %v6158_v30 = vor.u32 %v8383_v17, %v6155_v18  ;;  %v6257_v17 = vld [vmem:[#allocation5 + $0x358] sm:$0xf] }
 0x187   :  { %2477 = vmatmul.bf16.vlgmr.msra.gmra.mxu1 %v9258_v25  ;;  %v8467_v34 = vld [vmem:[#allocation5 + $0x52c] sm:$0xf0]  ;;  %v6062_v44 = vor.u32 %v8359_v35, %v6059_v36  ;;  %v6571_v29 = vld [vmem:[#allocation5 + $0x5f0] sm:$0xf0] }
 0x188   :  { %2499 = vmatpush.bf16.msra.mxu3 %v6186_v42  ;;  %2521 = vmatpush.bf16.msrb.mxu1 %v6826_v32  ;;  %v6474_v41 = vor.u32 %v8467_v34, %v6473_v33  ;;  %v6665_v42 = vld [vmem:[#allocation5 + $0x690] sm:$0xf]  ;;  %v8375_v35 = vld [vmem:[#allocation5 + $0x254] sm:$0xf] }
 0x189   :  { %v8515_v32 = vld [vmem:[#allocation5 + $0x6ac] sm:$0xf0]  ;;  %v6123_v36 = vld [vmem:[#allocation5 + $0x270] sm:$0xf0] }
 0x18a   :  { %2485 = vmatpush.bf16.msra.mxu2 %v5962_v48  ;;  %2463 = vmatpush.bf16.msra.mxu0 %v6342_v58  ;;  %v6441_v38 = vld [vmem:[#allocation5 + $0x4d0] sm:$0xf]  ;;  %v8351_v48 = vld [vmem:[#allocation5 + $0x194] sm:$0xf]  ;;  %v6666_v50 = vor.u32 %v8515_v32, %v6665_v42 }
 0x18b   :  { %v8459_v47 = vld [vmem:[#allocation5 + $0x4ec] sm:$0xf0]  ;;  %v6219_v58 = vld [vmem:[#allocation5 + $0x330] sm:$0xf0] }
 0x18c   :  { %2500 = vmatpush.bf16.msra.mxu3 %v6154_v56  ;;  %2522 = vmatpush.bf16.msrb.mxu1 %v6794_v57  ;;  %v6442_v53 = vor.u32 %v8459_v47, %v6441_v38  ;;  %v8507_v55 = vld [vmem:[#allocation5 + $0x66c] sm:$0xf0]  ;;  %v8399_v56 = vld [vmem:[#allocation5 + $0x314] sm:$0xf]  ;;  %v6030_v57 = vor.u32 %v8351_v48, %v6027_v49 }
 0x18d   :  { %2464 = vmatmul.bf16.vlgmr.msra.gmra.mxu0 %v9262_v51  ;;  %v6409_v60 = vld [vmem:[#allocation5 + $0x490] sm:$0xf]  ;;  %v6634_v0 = vor.u32 %v8507_v55, %v6633_v54  ;;  %v6222_v2 = vor.u32 %v8399_v56, %v6219_v58  ;;  %v5899_v42 = vld [vmem:[#allocation5 + $0xb0] sm:$0xf0]  ;;  %v8428_v54 = vld [vmem:[#allocation5 + $0x3f4] sm:$0xf0] }
 0x18e   :  { %2486 = vmatpush.bf16.msra.mxu2 %v5930_v62  ;;  %2508 = vmatpush.bf16.msrb.mxu0 %v6570_v63  ;;  %v8451_v61 = vld [vmem:[#allocation5 + $0x4ac] sm:$0xf0]  ;;  %v8343_v62 = vld [vmem:[#allocation5 + $0x154] sm:$0xf] }
 0x18f   :  { %v5995_v63 = vld [vmem:[#allocation5 + $0x170] sm:$0xf0]  ;;  %v6601_v1 = vld [vmem:[#allocation5 + $0x610] sm:$0xf]  ;;  %v6410_v3 = vor.u32 %v8451_v61, %v6409_v60 }
 0x190   :  { %2501 = vmatpush.bf16.msra.mxu3 %v6122_v6  ;;  %2523 = vmatpush.bf16.msrb.mxu1 %v6762_v8  ;;  %v8499_v4 = vld [vmem:[#allocation5 + $0x62c] sm:$0xf0]  ;;  %v6187_v6 = vld [vmem:[#allocation5 + $0x2f0] sm:$0xf0]  ;;  %v5998_v7 = vor.u32 %v8343_v62, %v5995_v63 }
 0x191   :  { %v8551_v8 = vld [vmem:[#allocation5 + $0x7d4] sm:$0xf]  ;;  %v6377_v10 = vld [vmem:[#allocation5 + $0x450] sm:$0xf]  ;;  %v6602_v14 = vor.u32 %v8499_v4, %v6601_v1  ;;  %v6190_v15 = vor.u32 %v8391_v5, %v6187_v6  ;;  %v8420_v4 = vld [vmem:[#allocation5 + $0x3b4] sm:$0xf0] }
 0x192   :  { %2487 = vmatpush.bf16.msra.mxu2 %v5898_v12  ;;  %2509 = vmatpush.bf16.msrb.mxu0 %v6538_v13  ;;  %v8443_v11 = vld [vmem:[#allocation5 + $0x46c] sm:$0xf0]  ;;  %v8335_v12 = vld [vmem:[#allocation5 + $0x114] sm:$0xf]  ;;  %v6830_v16 = vor.u32 %v8551_v8, %v6827_v9  ;;  %v6065_v9 = vld [vmem:[#allocation5 + $0x1d8] sm:$0xf] }
 0x193   :  { %v5963_v13 = vld [vmem:[#allocation5 + $0x130] sm:$0xf0]  ;;  %v6378_v19 = vor.u32 %v8443_v11, %v6377_v10  ;;  %v6345_v23 = vld [vmem:[#allocation5 + $0x410] sm:$0xf]  ;;  %v8364_v10 = vld [vmem:[#allocation5 + $0x1f4] sm:$0xf0] }
 0x194   :  { %2502 = vmatpush.bf16.msra.mxu3 %v6090_v20  ;;  %2524 = vmatpush.bf16.msrb.mxu1 %v6730_v21  ;;  %v5966_v20 = vor.u32 %v8335_v12, %v5963_v13  ;;  %v8543_v21 = vld [vmem:[#allocation5 + $0x794] sm:$0xf]  ;;  %v8435_v24 = vld [vmem:[#allocation5 + $0x42c] sm:$0xf0]  ;;  %v6066_v18 = vor.u32 %v8364_v10, %v6065_v9 }
 0x195   :  { %v6346_v33 = vor.u32 %v8435_v24, %v6345_v23  ;;  %v8479_v32 = vld [vmem:[#allocation5 + $0x594] sm:$0xf]  ;;  %v8356_v23 = vld [vmem:[#allocation5 + $0x1b4] sm:$0xf0] }
 0x196   :  { %2488 = vmatpush.bf16.msra.mxu2 %v5866_v26  ;;  %2510 = vmatpush.bf16.msrb.mxu0 %v6506_v27  ;;  %v8327_v26 = vld [vmem:[#allocation5 + $0xd4] sm:$0xf] }
 0x197   :  { %2503 = vmatmul.bf16.vlgmr.msra.gmra.mxu3 %v9250_v45  ;;  %v5931_v27 = vld [vmem:[#allocation5 + $0xf0] sm:$0xf0] }
 0x198   :  { %2547 = vmatpush.bf16.msrb.mxu3 %v6318_v22  ;;  %2525 = vmatpush.bf16.msrb.mxu1 %v6698_v37  ;;  %v6795_v22 = vld [vmem:[#allocation5 + $0x7b0] sm:$0xf0]  ;;  %v5934_v34 = vor.u32 %v8327_v26, %v5931_v27 }
 0x199   :  { %v6798_v31 = vor.u32 %v8543_v21, %v6795_v22  ;;  %v8535_v37 = vld [vmem:[#allocation5 + $0x754] sm:$0xf]  ;;  %v6033_v22 = vld [vmem:[#allocation5 + $0x198] sm:$0xf] }
 0x19a   :  { %2489 = vmatpush.bf16.msra.mxu2 %v5834_v40  ;;  %2511 = vmatpush.bf16.msrb.mxu0 %v6474_v41  ;;  %v6763_v40 = vld [vmem:[#allocation5 + $0x770] sm:$0xf0] }
 0x19b   :  { %v8319_v41 = vld [vmem:[#allocation5 + $0x94] sm:$0xf]  ;;  %v6766_v38 = vor.u32 %v8535_v37, %v6763_v40  ;;  %v8348_v37 = vld [vmem:[#allocation5 + $0x174] sm:$0xf0] }
 0x19c   :  { %2548 = vmatpush.bf16.msrb.mxu3 %v6286_v39  ;;  %2526 = vmatpush.bf16.msrb.mxu1 %v6666_v50  ;;  %v6574_v39 = vor.u32 %v8487_v28, %v6571_v29  ;;  %v5902_v47 = vor.u32 %v8319_v41, %v5899_v42  ;;  %v6091_v48 = vld [vmem:[#allocation5 + $0x230] sm:$0xf0] }
 0x19d   :  { %2490 = vmatmul.bf16.vlgmr.msra.gmra.mxu2 %v9254_v59  ;;  %v8527_v49 = vld [vmem:[#allocation5 + $0x714] sm:$0xf]  ;;  %v6094_v60 = vor.u32 %v8367_v46, %v6091_v48 }
 0x19e   :  { %2534 = vmatpush.bf16.msrb.mxu2 %v6062_v44  ;;  %2512 = vmatpush.bf16.msrb.mxu0 %v6442_v53  ;;  %v6126_v44 = vor.u32 %v8375_v35, %v6123_v36  ;;  %v6731_v50 = vld [vmem:[#allocation5 + $0x730] sm:$0xf0]  ;;  %v6321_v53 = vld [vmem:[#allocation5 + $0x3d8] sm:$0xf] }
 0x19f   :  { %v8311_v55 = vld [vmem:[#allocation5 + $0x54] sm:$0xf]  ;;  %v6734_v61 = vor.u32 %v8527_v49, %v6731_v50  ;;  %v6322_v62 = vor.u32 %v8428_v54, %v6321_v53  ;;  %v6001_v36 = vld [vmem:[#allocation5 + $0x158] sm:$0xf] }
 0x1a0   :  { %2549 = vmatpush.bf16.msrb.mxu3 %v6254_v52  ;;  %2527 = vmatpush.bf16.msrb.mxu1 %v6634_v0  ;;  %v6542_v52 = vor.u32 %v8479_v32, %v6539_v43  ;;  %v5867_v56 = vld [vmem:[#allocation5 + $0x70] sm:$0xf0]  ;;  %v6193_v43 = vld [vmem:[#allocation5 + $0x2d8] sm:$0xf]  ;;  %v6002_v46 = vor.u32 %v8348_v37, %v6001_v36  ;;  %v8424_v36 = vld [vmem:[#allocation5 + $0x3dc] sm:$0xf] }
 0x1a1   :  { %v6507_v58 = vld [vmem:[#allocation5 + $0x570] sm:$0xf0]  ;;  %v5870_v1 = vor.u32 %v8311_v55, %v5867_v56  ;;  %v5969_v50 = vld [vmem:[#allocation5 + $0x118] sm:$0xf]  ;;  %v6323_v37 = vld [vmem:[#allocation5 + $0x3f8] sm:$0xf0] }
 0x1a2   :  { %2535 = vmatpush.bf16.msrb.mxu2 %v6030_v57  ;;  %2513 = vmatpush.bf16.msrb.mxu0 %v6410_v3  ;;  %v8471_v57 = vld [vmem:[#allocation5 + $0x554] sm:$0xf]  ;;  %v6289_v3 = vld [vmem:[#allocation5 + $0x398] sm:$0xf] }
 0x1a3   :  { %v8519_v63 = vld [vmem:[#allocation5 + $0x6d4] sm:$0xf]  ;;  %v6290_v12 = vor.u32 %v8420_v4, %v6289_v3  ;;  %v5937_v3 = vld [vmem:[#allocation5 + $0xd8] sm:$0xf] }
 0x1a4   :  { %2550 = vmatpush.bf16.msrb.mxu3 %v6222_v2  ;;  %2528 = vmatpush.bf16.msrb.mxu1 %v6602_v14  ;;  %v6699_v0 = vld [vmem:[#allocation5 + $0x6f0] sm:$0xf0]  ;;  %v6510_v2 = vor.u32 %v8471_v57, %v6507_v58  ;;  %v6161_v57 = vld [vmem:[#allocation5 + $0x298] sm:$0xf] }
 0x1a5   :  { %v8303_v5 = vld [vmem:[#allocation5 + $0x14] sm:$0xf]  ;;  %v6702_v11 = vor.u32 %v8519_v63, %v6699_v0  ;;  %v8388_v58 = vld [vmem:[#allocation5 + $0x2b4] sm:$0xf0] }
 0x1a6   :  { %2536 = vmatpush.bf16.msrb.mxu2 %v5998_v7  ;;  %2514 = vmatpush.bf16.msrb.mxu0 %v6378_v19  ;;  %v5835_v6 = vld [vmem:[#allocation5 + $0x30] sm:$0xf0]  ;;  %v8412_v19 = vld [vmem:[#allocation5 + $0x374] sm:$0xf0] }
 0x1a7   :  { %2529 = vmatmul.bf16.vlgmr.msrb.gmra.mxu1 %v9258_v25  ;;  %v8463_v7 = vld [vmem:[#allocation5 + $0x514] sm:$0xf]  ;;  %v5838_v13 = vor.u32 %v8303_v5, %v5835_v6  ;;  %v6258_v26 = vor.u32 %v8412_v19, %v6257_v17  ;;  %v6801_v63 = vld [vmem:[#allocation5 + $0x798] sm:$0xf] }
 0x1a8   :  { %2551 = vmatpush.bf16.msrb.mxu3 %v6190_v15  ;;  %2573 = vmatpush.bf16.msra.mxu1 %v6830_v16  ;;  %v6475_v8 = vld [vmem:[#allocation5 + $0x530] sm:$0xf0]  ;;  %v8548_v0 = vld [vmem:[#allocation5 + $0x7b4] sm:$0xf0] }
 0x1a9   :  { %v6478_v14 = vor.u32 %v8463_v7, %v6475_v8  ;;  %v8511_v15 = vld [vmem:[#allocation5 + $0x694] sm:$0xf]  ;;  %v8332_v4 = vld [vmem:[#allocation5 + $0xf4] sm:$0xf0]  ;;  %v6162_v8 = vor.u32 %v8388_v58, %v6161_v57  ;;  %v6802_v9 = vor.u32 %v8548_v0, %v6801_v63 }
 0x1aa   :  { %2537 = vmatpush.bf16.msrb.mxu2 %v5966_v20  ;;  %2515 = vmatpush.bf16.msrb.mxu0 %v6346_v33  ;;  %v6667_v16 = vld [vmem:[#allocation5 + $0x6b0] sm:$0xf0]  ;;  %v8404_v33 = vld [vmem:[#allocation5 + $0x334] sm:$0xf0] }
 0x1ab   :  { %v8455_v20 = vld [vmem:[#allocation5 + $0x4d4] sm:$0xf]  ;;  %v6670_v24 = vor.u32 %v8511_v15, %v6667_v16  ;;  %v6577_v6 = vld [vmem:[#allocation5 + $0x5d8] sm:$0xf] }
 0x1ac   :  { %2552 = vmatpush.bf16.msrb.mxu3 %v6158_v30  ;;  %2574 = vmatpush.bf16.msra.mxu1 %v6798_v31  ;;  %v6443_v21 = vld [vmem:[#allocation5 + $0x4f0] sm:$0xf0]  ;;  %v6225_v30 = vld [vmem:[#allocation5 + $0x318] sm:$0xf]  ;;  %v6034_v31 = vor.u32 %v8356_v23, %v6033_v22 }
 0x1ad   :  { %2516 = vmatmul.bf16.vlgmr.msrb.gmra.mxu0 %v9262_v51  ;;  %v6446_v27 = vor.u32 %v8455_v20, %v6443_v21  ;;  %v8503_v28 = vld [vmem:[#allocation5 + $0x654] sm:$0xf]  ;;  %v6226_v41 = vor.u32 %v8404_v33, %v6225_v30  ;;  %v8492_v7 = vld [vmem:[#allocation5 + $0x5f4] sm:$0xf0] }
 0x1ae   :  { %2538 = vmatpush.bf16.msrb.mxu2 %v5934_v34  ;;  %2560 = vmatpush.bf16.msra.mxu0 %v6574_v39  ;;  %v6635_v29 = vld [vmem:[#allocation5 + $0x670] sm:$0xf0]  ;;  %v6578_v16 = vor.u32 %v8492_v7, %v6577_v6  ;;  %v8540_v17 = vld [vmem:[#allocation5 + $0x774] sm:$0xf0]  ;;  %v8408_v7 = vld [vmem:[#allocation5 + $0x35c] sm:$0xf] }
 0x1af   :  { %v8447_v34 = vld [vmem:[#allocation5 + $0x494] sm:$0xf]  ;;  %v6638_v39 = vor.u32 %v8503_v28, %v6635_v29  ;;  %v8324_v19 = vld [vmem:[#allocation5 + $0xb4] sm:$0xf0] }
 0x1b0   :  { %2553 = vmatpush.bf16.msrb.mxu3 %v6126_v44  ;;  %2575 = vmatpush.bf16.msra.mxu1 %v6766_v38  ;;  %v6411_v35 = vld [vmem:[#allocation5 + $0x4b0] sm:$0xf0]  ;;  %v8396_v44 = vld [vmem:[#allocation5 + $0x2f4] sm:$0xf0] }
 0x1b1   :  { %v8495_v40 = vld [vmem:[#allocation5 + $0x614] sm:$0xf]  ;;  %v6414_v42 = vor.u32 %v8447_v34, %v6411_v35  ;;  %v6833_v38 = vld [vmem:[#allocation5 + $0x7d8] sm:$0xf]  ;;  %v6194_v55 = vor.u32 %v8396_v44, %v6193_v43  ;;  %v6326_v44 = vor.u32 %v8424_v36, %v6323_v37 }
 0x1b2   :  { %2539 = vmatpush.bf16.msrb.mxu2 %v5902_v47  ;;  %2561 = vmatpush.bf16.msra.mxu0 %v6542_v52  ;;  %v6603_v32 = vld [vmem:[#allocation5 + $0x630] sm:$0xf0]  ;;  %v8556_v47 = vld [vmem:[#allocation5 + $0x7f4] sm:$0xf0] }
 0x1b3   :  { %v8439_v48 = vld [vmem:[#allocation5 + $0x454] sm:$0xf]  ;;  %v8340_v52 = vld [vmem:[#allocation5 + $0x134] sm:$0xf0]  ;;  %v6606_v53 = vor.u32 %v8495_v40, %v6603_v32  ;;  %v6834_v56 = vor.u32 %v8556_v47, %v6833_v38 }
 0x1b4   :  { %2554 = vmatpush.bf16.msrb.mxu3 %v6094_v60  ;;  %2576 = vmatpush.bf16.msra.mxu1 %v6734_v61  ;;  %v6379_v49 = vld [vmem:[#allocation5 + $0x470] sm:$0xf0]  ;;  %v9285_v60 = vld [vmem:[%s9521_s6] sm:$0xff]  ;;  %v6545_v21 = vld [vmem:[#allocation5 + $0x598] sm:$0xf] }
 0x1b5   :  { %v6382_v61 = vor.u32 %v8439_v48, %v6379_v49  ;;  %v978_v5 = vperm.slane %v9285_v60, 0  ;;  %v8484_v22 = vld [vmem:[#allocation5 + $0x5b4] sm:$0xf0] }
 0x1b6   :  { %2540 = vmatpush.bf16.msrb.mxu2 %v5870_v1  ;;  %2562 = vmatpush.bf16.msra.mxu0 %v6510_v2  ;;  %v8431_v1 = vld [vmem:[#allocation5 + $0x414] sm:$0xf]  ;;  %v8372_v29 = vld [vmem:[#allocation5 + $0x234] sm:$0xf0]  ;;  %v6546_v35 = vor.u32 %v8484_v22, %v6545_v21  ;;  %v8400_v21 = vld [vmem:[#allocation5 + $0x31c] sm:$0xf] }
 0x1b7   :  { %2555 = vmatmul.bf16.vlgmr.msrb.gmra.mxu3 %v9250_v45  ;;  %v6347_v2 = vld [vmem:[#allocation5 + $0x430] sm:$0xf0]  ;;  %v6737_v30 = vld [vmem:[#allocation5 + $0x718] sm:$0xf] }
 0x1b8   :  { %2599 = vmatpush.bf16.msra.mxu3 %v6322_v62  ;;  %2577 = vmatpush.bf16.msra.mxu1 %v6702_v11  ;;  %v5970_v62 = vor.u32 %v8340_v52, %v5969_v50  ;;  %v6350_v10 = vor.u32 %v8431_v1, %v6347_v2  ;;  %v5938_v11 = vor.u32 %v8332_v4, %v5937_v3  ;;  %v8316_v40 = vld [vmem:[#allocation5 + $0x74] sm:$0xf0]  ;;  %v8416_v50 = vld [vmem:[#allocation5 + $0x39c] sm:$0xf] }
 0x1b9   :  { %v8524_v38 = vld [vmem:[#allocation5 + $0x6f4] sm:$0xf0]  ;;  %v6291_v52 = vld [vmem:[#allocation5 + $0x3b8] sm:$0xf0] }
 0x1ba   :  { %2541 = vmatpush.bf16.msrb.mxu2 %v5838_v13  ;;  %2563 = vmatpush.bf16.msra.mxu0 %v6478_v14  ;;  %v2296_v54 = vpop.f32.mrf.mxu3  ;;  %v8380_v13 = vld [vmem:[#allocation5 + $0x274] sm:$0xf0]  ;;  %v6294_v1 = vor.u32 %v8416_v50, %v6291_v52  ;;  %v8384_v52 = vld [vmem:[#allocation5 + $0x29c] sm:$0xf] }
 0x1bb   :  { %v6769_v14 = vld [vmem:[#allocation5 + $0x758] sm:$0xf] }
 0x1bc   :  { %2600 = vmatpush.bf16.msra.mxu3 %v6290_v12  ;;  %2578 = vmatpush.bf16.msra.mxu1 %v6670_v24  ;;  %v6129_v12 = vld [vmem:[#allocation5 + $0x258] sm:$0xf] }
 0x1bd   :  { %2542 = vmatmul.bf16.vlgmr.msrb.gmra.mxu2 %v9254_v59  ;;  %v6130_v24 = vor.u32 %v8380_v13, %v6129_v12  ;;  %v8516_v6 = vld [vmem:[#allocation5 + $0x6b4] sm:$0xf0]  ;;  %v8352_v13 = vld [vmem:[#allocation5 + $0x19c] sm:$0xf] }
 0x1be   :  { %2586 = vmatpush.bf16.msra.mxu2 %v6066_v18  ;;  %2564 = vmatpush.bf16.msra.mxu0 %v6446_v27  ;;  %v5905_v18 = vld [vmem:[#allocation5 + $0x98] sm:$0xf]  ;;  %v6770_v27 = vor.u32 %v8540_v17, %v6769_v14  ;;  %v6035_v14 = vld [vmem:[#allocation5 + $0x1b8] sm:$0xf0] }
 0x1bf   :  { %v5906_v28 = vor.u32 %v8324_v19, %v5905_v18  ;;  %v8460_v12 = vld [vmem:[#allocation5 + $0x4f4] sm:$0xf0]  ;;  %v6038_v22 = vor.u32 %v8352_v13, %v6035_v14  ;;  %v8536_v13 = vld [vmem:[#allocation5 + $0x75c] sm:$0xf] }
 0x1c0   :  { %2601 = vmatpush.bf16.msra.mxu3 %v6258_v26  ;;  %2579 = vmatpush.bf16.msra.mxu1 %v6638_v39  ;;  %v2283_v15 = vpop.f32.mrf.mxu2  ;;  %v6097_v26 = vld [vmem:[#allocation5 + $0x218] sm:$0xf] }
 0x1c1   :  { %v2284_v20 = vadd.f32 %v2283_v15, %v978_v5  ;;  %v5873_v39 = vld [vmem:[#allocation5 + $0x58] sm:$0xf]  ;;  %v6098_v32 = vor.u32 %v8372_v29, %v6097_v26  ;;  %v8344_v29 = vld [vmem:[#allocation5 + $0x15c] sm:$0xf] }
 0x1c2   :  { %2587 = vmatpush.bf16.msra.mxu2 %v6034_v31  ;;  %2565 = vmatpush.bf16.msra.mxu0 %v6414_v42  ;;  %v2298_v23 = vpop.f32.mrf.mxu3  ;;  %v8532_v31 = vld [vmem:[#allocation5 + $0x734] sm:$0xf0]  ;;  %v5874_v48 = vor.u32 %v8316_v40, %v5873_v39  ;;  %v8392_v39 = vld [vmem:[#allocation5 + $0x2dc] sm:$0xf] }
 0x1c3   :  { %v2297_v33 = vadd.f32 %v2296_v54, %v2284_v20  ;;  %v8476_v42 = vld [vmem:[#allocation5 + $0x574] sm:$0xf0]  ;;  %v6738_v43 = vor.u32 %v8532_v31, %v6737_v30  ;;  %v6227_v23 = vld [vmem:[#allocation5 + $0x338] sm:$0xf0] }
 0x1c4   :  { %2602 = vmatpush.bf16.msra.mxu3 %v6226_v41  ;;  %2580 = vmatpush.bf16.msra.mxu1 %v6606_v53  ;;  %v2322_v34 = vpop.f32.mrf.mxu1  ;;  %v6513_v41 = vld [vmem:[#allocation5 + $0x558] sm:$0xf]  ;;  %v6003_v30 = vld [vmem:[#allocation5 + $0x178] sm:$0xf0] }
 0x1c5   :  { %v6514_v49 = vor.u32 %v8476_v42, %v6513_v41  ;;  %v5841_v53 = vld [vmem:[#allocation5 + $0x18] sm:$0xf]  ;;  %v6195_v40 = vld [vmem:[#allocation5 + $0x2f8] sm:$0xf0]  ;;  %v6006_v41 = vor.u32 %v8344_v29, %v6003_v30 }
 0x1c6   :  { %2588 = vmatpush.bf16.msra.mxu2 %v6002_v46  ;;  %2566 = vmatpush.bf16.msra.mxu0 %v6382_v61  ;;  %v6705_v46 = vld [vmem:[#allocation5 + $0x6d8] sm:$0xf]  ;;  %v8360_v61 = vld [vmem:[#allocation5 + $0x1dc] sm:$0xf] }
 0x1c7   :  { %2581 = vmatmul.bf16.vlgmr.msra.gmra.mxu1 %v9258_v25  ;;  %v8308_v54 = vld [vmem:[#allocation5 + $0x34] sm:$0xf0]  ;;  %v6706_v0 = vor.u32 %v8524_v38, %v6705_v46  ;;  %v8552_v42 = vld [vmem:[#allocation5 + $0x7dc] sm:$0xf] }
 0x1c8   :  { %2603 = vmatpush.bf16.msra.mxu3 %v6194_v55  ;;  %2625 = vmatpush.bf16.msrb.mxu1 %v6834_v56  ;;  %v2285_v47 = vpop.f32.mrf.mxu2  ;;  %v6481_v55 = vld [vmem:[#allocation5 + $0x518] sm:$0xf]  ;;  %v5842_v3 = vor.u32 %v8308_v54, %v5841_v53  ;;  %v8336_v46 = vld [vmem:[#allocation5 + $0x11c] sm:$0xf] }
 0x1c9   :  { %v8468_v56 = vld [vmem:[#allocation5 + $0x534] sm:$0xf0]  ;;  %v5971_v38 = vld [vmem:[#allocation5 + $0x138] sm:$0xf0] }
 0x1ca   :  { %2589 = vmatpush.bf16.msra.mxu2 %v5970_v62  ;;  %2567 = vmatpush.bf16.msra.mxu0 %v6350_v10  ;;  %v2309_v57 = vpop.f32.mrf.mxu0  ;;  %v9290_v58 = vpop.f32.mrf.mxu3  ;;  %v6067_v62 = vld [vmem:[#allocation5 + $0x1f8] sm:$0xf0]  ;;  %v6482_v4 = vor.u32 %v8468_v56, %v6481_v55  ;;  %v6673_v5 = vld [vmem:[#allocation5 + $0x698] sm:$0xf]  ;;  %v5974_v55 = vor.u32 %v8336_v46, %v5971_v38 }
 0x1cb   :  { %v2310_v63 = vadd.f32 %v2309_v57, %v2297_v33  ;;  %v6259_v10 = vld [vmem:[#allocation5 + $0x378] sm:$0xf0]  ;;  %v6674_v15 = vor.u32 %v8516_v6, %v6673_v5  ;;  %v6641_v19 = vld [vmem:[#allocation5 + $0x658] sm:$0xf] }
 0x1cc   :  { %2604 = vmatpush.bf16.msra.mxu3 %v6162_v8  ;;  %2626 = vmatpush.bf16.msrb.mxu1 %v6802_v9  ;;  %v2324_v2 = vpop.f32.mrf.mxu1  ;;  %v6070_v9 = vor.u32 %v8360_v61, %v6067_v62  ;;  %v6262_v17 = vor.u32 %v8408_v7, %v6259_v10  ;;  %v8508_v20 = vld [vmem:[#allocation5 + $0x674] sm:$0xf0]  ;;  %v6163_v53 = vld [vmem:[#allocation5 + $0x2b8] sm:$0xf0] }
 0x1cd   :  { %2568 = vmatmul.bf16.vlgmr.msra.gmra.mxu0 %v9262_v51  ;;  %v9292_v8 = vadd.f32 %v2322_v34, %v2310_v63  ;;  %v8452_v26 = vld [vmem:[#allocation5 + $0x4b4] sm:$0xf0]  ;;  %v6642_v31 = vor.u32 %v8508_v20, %v6641_v19  ;;  %v8544_v56 = vld [vmem:[#allocation5 + $0x79c] sm:$0xf]  ;;  %v6166_v6 = vor.u32 %v8384_v52, %v6163_v53 }
 0x1ce   :  { %2590 = vmatpush.bf16.msra.mxu2 %v5938_v11  ;;  %2612 = vmatpush.bf16.msrb.mxu0 %v6578_v16  ;;  %v6449_v11 = vld [vmem:[#allocation5 + $0x4d8] sm:$0xf]  ;;  %v6803_v57 = vld [vmem:[#allocation5 + $0x7b8] sm:$0xf0] }
 0x1cf   :  { %v6450_v18 = vor.u32 %v8460_v12, %v6449_v11  ;;  %v6609_v33 = vld [vmem:[#allocation5 + $0x618] sm:$0xf]  ;;  %v5939_v2 = vld [vmem:[#allocation5 + $0xf8] sm:$0xf0]  ;;  %v6806_v7 = vor.u32 %v8544_v56, %v6803_v57  ;;  %v6953_v56 = vld [vmem:[#allocation7 + $0xe0] sm:$0xf] }
 0x1d0   :  { %2605 = vmatpush.bf16.msra.mxu3 %v6130_v24  ;;  %2627 = vmatpush.bf16.msrb.mxu1 %v6770_v27  ;;  %v9295_v16 = vpop.f32.mrf.mxu2  ;;  %v6417_v24 = vld [vmem:[#allocation5 + $0x498] sm:$0xf]  ;;  %v8376_v11 = vld [vmem:[#allocation5 + $0x25c] sm:$0xf]  ;;  %v8587_v57 = vld [vmem:[#allocation7 + $0xec] sm:$0xf0] }
 0x1d1   :  { %v6418_v36 = vor.u32 %v8452_v26, %v6417_v24  ;;  %v8500_v37 = vld [vmem:[#allocation5 + $0x634] sm:$0xf0]  ;;  %v6131_v12 = vld [vmem:[#allocation5 + $0x278] sm:$0xf0]  ;;  %vm2690_vm8 = vcmp.gt.f32.partialorder %v9292_v8, 0.0 }
 0x1d2   :  { %2591 = vmatpush.bf16.msra.mxu2 %v5906_v28  ;;  %2613 = vmatpush.bf16.msrb.mxu0 %v6546_v35  ;;  %v2311_v27 = vpop.f32.mrf.mxu0  ;;  %v2350_v28 = vpop.f32.mrf.mxu3  ;;  %v6230_v35 = vor.u32 %v8400_v21, %v6227_v23  ;;  %v6610_v47 = vor.u32 %v8500_v37, %v6609_v33  ;;  %v6353_v61 = vld [vmem:[#allocation5 + $0x418] sm:$0xf]  ;;  %v8480_v19 = vld [vmem:[#allocation5 + $0x59c] sm:$0xf]  ;;  %v6134_v21 = vor.u32 %v8376_v11, %v6131_v12 }
 0x1d3   :  { %v6547_v20 = vld [vmem:[#allocation5 + $0x5b8] sm:$0xf0] }
 0x1d4   :  { %2606 = vmatpush.bf16.msra.mxu3 %v6098_v32  ;;  %2628 = vmatpush.bf16.msrb.mxu1 %v6738_v43  ;;  %v9298_v34 = vpop.f32.mrf.mxu1  ;;  %v6835_v32 = vld [vmem:[#allocation5 + $0x7f8] sm:$0xf0]  ;;  %v6385_v43 = vld [vmem:[#allocation5 + $0x458] sm:$0xf]  ;;  %v6550_v33 = vor.u32 %v8480_v19, %v6547_v20 }
 0x1d5   :  { %v6838_v50 = vor.u32 %v8552_v42, %v6835_v32  ;;  %v6099_v27 = vld [vmem:[#allocation5 + $0x238] sm:$0xf0] }
 0x1d6   :  { %2592 = vmatpush.bf16.msra.mxu2 %v5874_v48  ;;  %2614 = vmatpush.bf16.msrb.mxu0 %v6514_v49  ;;  %v6198_v49 = vor.u32 %v8392_v39, %v6195_v40  ;;  %v8528_v28 = vld [vmem:[#allocation5 + $0x71c] sm:$0xf] }
 0x1d7   :  { %2607 = vmatmul.bf16.vlgmr.msra.gmra.mxu3 %v9250_v45  ;;  %v6739_v29 = vld [vmem:[#allocation5 + $0x738] sm:$0xf0] }
 0x1d8   :  { %2651 = vmatpush.bf16.msrb.mxu3 %v6326_v44  ;;  %2629 = vmatpush.bf16.msrb.mxu1 %v6706_v0  ;;  %v8444_v44 = vld [vmem:[#allocation5 + $0x474] sm:$0xf0]  ;;  %v2337_v48 = vpop.f32.mrf.mxu2  ;;  %v8312_v37 = vld [vmem:[#allocation5 + $0x5c] sm:$0xf] }
 0x1d9   :  { %v6386_v54 = vor.u32 %v8444_v44, %v6385_v43  ;;  %v8436_v0 = vld [vmem:[#allocation5 + $0x434] sm:$0xf0]  ;;  %v5875_v39 = vld [vmem:[#allocation5 + $0x78] sm:$0xf0]  ;;  %v6742_v43 = vor.u32 %v8528_v28, %v6739_v29 }
 0x1da   :  { %2593 = vmatpush.bf16.msra.mxu2 %v5842_v3  ;;  %2615 = vmatpush.bf16.msrb.mxu0 %v6482_v4  ;;  %v9300_v62 = vpop.f32.mrf.mxu0  ;;  %v9302_v63 = vpop.f32.mrf.mxu3  ;;  %v8488_v3 = vld [vmem:[#allocation5 + $0x5dc] sm:$0xf] }
 0x1db   :  { %v6579_v4 = vld [vmem:[#allocation5 + $0x5f8] sm:$0xf0] }
 0x1dc   :  { %2652 = vmatpush.bf16.msrb.mxu3 %v6294_v1  ;;  %2630 = vmatpush.bf16.msrb.mxu1 %v6674_v15  ;;  %v8328_v1 = vld [vmem:[#allocation5 + $0xdc] sm:$0xf]  ;;  %v2376_v5 = vpop.f32.mrf.mxu1  ;;  %v6582_v14 = vor.u32 %v8488_v3, %v6579_v4 }
 0x1dd   :  { %2594 = vmatmul.bf16.vlgmr.msra.gmra.mxu2 %v9254_v59  ;;  %v5942_v10 = vor.u32 %v8328_v1, %v5939_v2  ;;  %v6771_v15 = vld [vmem:[#allocation5 + $0x778] sm:$0xf0] }
 0x1de   :  { %2638 = vmatpush.bf16.msrb.mxu2 %v6070_v9  ;;  %2616 = vmatpush.bf16.msrb.mxu0 %v6450_v18  ;;  %v6354_v9 = vor.u32 %v8436_v0, %v6353_v61  ;;  %v5907_v18 = vld [vmem:[#allocation5 + $0xb8] sm:$0xf0]  ;;  %v6774_v24 = vor.u32 %v8536_v13, %v6771_v15  ;;  %v979_v13 = vperm.slane %v9285_v60, 1  ;;  %v6937_v15 = vld [vmem:[#allocation7 + $0xc0] sm:$0xf] }
 0x1df   :  { %v8472_v40 = vld [vmem:[#allocation5 + $0x55c] sm:$0xf] }
 0x1e0   :  { %2653 = vmatpush.bf16.msrb.mxu3 %v6262_v17  ;;  %2631 = vmatpush.bf16.msrb.mxu1 %v6642_v31  ;;  %v8320_v17 = vld [vmem:[#allocation5 + $0x9c] sm:$0xf]  ;;  %v9305_v23 = vpop.f32.mrf.mxu2  ;;  %v2336_v29 = vadd.f32 %v9295_v16, %v979_v13  ;;  %v6985_v13 = vld [vmem:[#allocation7 + $0x120] sm:$0xf] }
 0x1e1   :  { %v5910_v26 = vor.u32 %v8320_v17, %v5907_v18  ;;  %v8520_v46 = vld [vmem:[#allocation5 + $0x6dc] sm:$0xf]  ;;  %v8583_v17 = vld [vmem:[#allocation7 + $0xcc] sm:$0xf0] }
 0x1e2   :  { %2639 = vmatpush.bf16.msrb.mxu2 %v6038_v22  ;;  %2617 = vmatpush.bf16.msrb.mxu0 %v6418_v36  ;;  %v8368_v22 = vld [vmem:[#allocation5 + $0x21c] sm:$0xf]  ;;  %v2363_v30 = vpop.f32.mrf.mxu0  ;;  %v2402_v31 = vpop.f32.mrf.mxu3  ;;  %v8619_v36 = vld [vmem:[#allocation7 + $0x1ec] sm:$0xf0] }
 0x1e3   :  { %v6102_v32 = vor.u32 %v8368_v22, %v6099_v27  ;;  %v6707_v38 = vld [vmem:[#allocation5 + $0x6f8] sm:$0xf0]  ;;  %v7033_v22 = vld [vmem:[#allocation7 + $0x180] sm:$0xf]  ;;  %v8579_v31 = vld [vmem:[#allocation7 + $0xac] sm:$0xf0] }
 0x1e4   :  { %2654 = vmatpush.bf16.msrb.mxu3 %v6230_v35  ;;  %2632 = vmatpush.bf16.msrb.mxu1 %v6610_v47  ;;  %v7081_v35 = vld [vmem:[#allocation7 + $0x1e0] sm:$0xf]  ;;  %v9308_v42 = vpop.f32.mrf.mxu1  ;;  %v5878_v47 = vor.u32 %v8312_v37, %v5875_v39  ;;  %v8304_v52 = vld [vmem:[#allocation5 + $0x1c] sm:$0xf]  ;;  %v6710_v0 = vor.u32 %v8520_v46, %v6707_v38  ;;  %v8683_v46 = vld [vmem:[#allocation7 + $0x3ec] sm:$0xf0]  ;;  %v2349_v38 = vadd.f32 %v9290_v58, %v2336_v29 }
 0x1e5   :  { %v7082_v44 = vor.u32 %v8619_v36, %v7081_v35  ;;  %v5843_v53 = vld [vmem:[#allocation5 + $0x38] sm:$0xf0]  ;;  %v6921_v30 = vld [vmem:[#allocation7 + $0xa0] sm:$0xf]  ;;  %v8679_v58 = vld [vmem:[#allocation7 + $0x3cc] sm:$0xf0] }
 0x1e6   :  { %2640 = vmatpush.bf16.msrb.mxu2 %v6006_v41  ;;  %2618 = vmatpush.bf16.msrb.mxu0 %v6386_v54  ;;  %v6515_v41 = vld [vmem:[#allocation5 + $0x578] sm:$0xf0]  ;;  %v5846_v2 = vor.u32 %v8304_v52, %v5843_v53 }
 0x1e7   :  { %2633 = vmatmul.bf16.vlgmr.msrb.gmra.mxu1 %v9258_v25  ;;  %v6518_v48 = vor.u32 %v8472_v40, %v6515_v41  ;;  %v8464_v54 = vld [vmem:[#allocation5 + $0x51c] sm:$0xf]  ;;  %v7017_v40 = vld [vmem:[#allocation7 + $0x160] sm:$0xf]  ;;  %v8603_v41 = vld [vmem:[#allocation7 + $0x16c] sm:$0xf0] }
 0x1e8   :  { %2655 = vmatpush.bf16.msrb.mxu3 %v6198_v49  ;;  %2677 = vmatpush.bf16.msra.mxu1 %v6838_v50  ;;  %v7065_v49 = vld [vmem:[#allocation7 + $0x1c0] sm:$0xf]  ;;  %v8615_v50 = vld [vmem:[#allocation7 + $0x1cc] sm:$0xf0]  ;;  %v2389_v61 = vpop.f32.mrf.mxu2  ;;  %v8512_v4 = vld [vmem:[#allocation5 + $0x69c] sm:$0xf]  ;;  %v7018_v52 = vor.u32 %v8603_v41, %v7017_v40 }
 0x1e9   :  { %v7066_v1 = vor.u32 %v8615_v50, %v7065_v49  ;;  %v6675_v5 = vld [vmem:[#allocation5 + $0x6b8] sm:$0xf0]  ;;  %v2362_v50 = vadd.f32 %v9300_v62, %v2349_v38  ;;  %v8651_v62 = vld [vmem:[#allocation7 + $0x2ec] sm:$0xf0]  ;;  %v2698_v38 = vmul.f32 0.01, %v9292_v8 }
 0x1ea   :  { %2641 = vmatpush.bf16.msrb.mxu2 %v5974_v55  ;;  %2619 = vmatpush.bf16.msrb.mxu0 %v6354_v9  ;;  %v6483_v55 = vld [vmem:[#allocation5 + $0x538] sm:$0xf0]  ;;  %v6954_v9 = vor.u32 %v8587_v57, %v6953_v56  ;;  %v6678_v18 = vor.u32 %v8512_v4, %v6675_v5  ;;  %v8571_v4 = vld [vmem:[#allocation7 + $0x6c] sm:$0xf0]  ;;  %v7209_v5 = vld [vmem:[#allocation7 + $0x2e0] sm:$0xf] }
 0x1eb   :  { %v6486_v3 = vor.u32 %v8464_v54, %v6483_v55  ;;  %v8456_v11 = vld [vmem:[#allocation5 + $0x4dc] sm:$0xf]  ;;  %v7001_v54 = vld [vmem:[#allocation7 + $0x140] sm:$0xf]  ;;  %v8599_v55 = vld [vmem:[#allocation7 + $0x14c] sm:$0xf0] }
 0x1ec   :  { %2656 = vmatpush.bf16.msrb.mxu3 %v6166_v6  ;;  %2678 = vmatpush.bf16.msra.mxu1 %v6806_v7  ;;  %v7049_v6 = vld [vmem:[#allocation7 + $0x1a0] sm:$0xf]  ;;  %v9311_v7 = vpop.f32.mrf.mxu0  ;;  %v6451_v12 = vld [vmem:[#allocation5 + $0x4f8] sm:$0xf0]  ;;  %v8643_v41 = vld [vmem:[#allocation7 + $0x2ac] sm:$0xf0] }
 0x1ed   :  { %2620 = vmatmul.bf16.vlgmr.msrb.gmra.mxu0 %v9262_v51  ;;  %v6454_v20 = vor.u32 %v8456_v11, %v6451_v12  ;;  %v8448_v27 = vld [vmem:[#allocation5 + $0x49c] sm:$0xf] }
 0x1ee   :  { %2642 = vmatpush.bf16.msrb.mxu2 %v5942_v10  ;;  %2664 = vmatpush.bf16.msra.mxu0 %v6582_v14  ;;  %v8611_v10 = vld [vmem:[#allocation7 + $0x1ac] sm:$0xf0]  ;;  %v2428_v14 = vpop.f32.mrf.mxu1  ;;  %v6419_v28 = vld [vmem:[#allocation5 + $0x4b8] sm:$0xf0] }
 0x1ef   :  { %v7050_v19 = vor.u32 %v8611_v10, %v7049_v6  ;;  %v8496_v35 = vld [vmem:[#allocation5 + $0x61c] sm:$0xf]  ;;  %v6422_v37 = vor.u32 %v8448_v27, %v6419_v28  ;;  %v2375_v6 = vadd.f32 %v9298_v34, %v2362_v50  ;;  %v8595_v14 = vld [vmem:[#allocation7 + $0x12c] sm:$0xf0]  ;;  %v6969_v27 = vld [vmem:[#allocation7 + $0x100] sm:$0xf] }
 0x1f0   :  { %2657 = vmatpush.bf16.msrb.mxu3 %v6134_v21  ;;  %2679 = vmatpush.bf16.msra.mxu1 %v6774_v24  ;;  %v8504_v21 = vld [vmem:[#allocation5 + $0x65c] sm:$0xf]  ;;  %v6938_v24 = vor.u32 %v8583_v17, %v6937_v15  ;;  %v7305_v15 = vld [vmem:[#allocation7 + $0x3a0] sm:$0xf]  ;;  %v7210_v17 = vor.u32 %v8651_v62, %v7209_v5  ;;  %v8647_v34 = vld [vmem:[#allocation7 + $0x2cc] sm:$0xf0] }
 0x1f1   :  { %v6611_v39 = vld [vmem:[#allocation5 + $0x638] sm:$0xf0]  ;;  %vm2691_vm7 = vcmp.gt.f32.partialorder %v2375_v6, 0.0  ;;  %v8667_v50 = vld [vmem:[#allocation7 + $0x36c] sm:$0xf0] }
 0x1f2   :  { %2643 = vmatpush.bf16.msrb.mxu2 %v5910_v26  ;;  %2665 = vmatpush.bf16.msra.mxu0 %v6550_v33  ;;  %v8607_v26 = vld [vmem:[#allocation7 + $0x18c] sm:$0xf0]  ;;  %v8440_v16 = vld [vmem:[#allocation5 + $0x45c] sm:$0xf]  ;;  %v6614_v49 = vor.u32 %v8496_v35, %v6611_v39  ;;  %v7177_v39 = vld [vmem:[#allocation7 + $0x2a0] sm:$0xf] }
 0x1f3   :  { %v7034_v36 = vor.u32 %v8607_v26, %v7033_v22  ;;  %v2699_v22 = vmul.f32 0.01, %v2375_v6  ;;  %v6986_v26 = vor.u32 %v8595_v14, %v6985_v13  ;;  %v7257_v13 = vld [vmem:[#allocation7 + $0x340] sm:$0xf]  ;;  %v8663_v14 = vld [vmem:[#allocation7 + $0x34c] sm:$0xf0] }
 0x1f4   :  { %2658 = vmatpush.bf16.msrb.mxu3 %v6102_v32  ;;  %2680 = vmatpush.bf16.msra.mxu1 %v6742_v43  ;;  %v2415_v32 = vpop.f32.mrf.mxu0  ;;  %v6922_v43 = vor.u32 %v8579_v31, %v6921_v30  ;;  %v8591_v30 = vld [vmem:[#allocation7 + $0x10c] sm:$0xf0]  ;;  %v7289_v31 = vld [vmem:[#allocation7 + $0x380] sm:$0xf] }
 0x1f5   :  { %v7593_v32 = vld [vmem:[#allocation7 + $0x5e0] sm:$0xf] }
 0x1f6   :  { %2644 = vmatpush.bf16.msrb.mxu2 %v5878_v47  ;;  %2666 = vmatpush.bf16.msra.mxu0 %v6518_v48  ;;  %v6387_v47 = vld [vmem:[#allocation5 + $0x478] sm:$0xf0]  ;;  %v6905_v48 = vld [vmem:[#allocation7 + $0x80] sm:$0xf] }
 0x1f7   :  { %2659 = vmatmul.bf16.vlgmr.msrb.gmra.mxu3 %v9250_v45  ;;  %v6643_v45 = vld [vmem:[#allocation5 + $0x678] sm:$0xf0]  ;;  %v6390_v57 = vor.u32 %v8440_v16, %v6387_v47  ;;  %v6970_v16 = vor.u32 %v8591_v30, %v6969_v27 }
 0x1f8   :  { %4281 = vmatpush.bf16.msra.mxu3 %v7082_v44  ;;  %2681 = vmatpush.bf16.msra.mxu1 %v6710_v0  ;;  %v6646_v33 = vor.u32 %v8504_v21, %v6643_v45  ;;  %v7337_v44 = vld [vmem:[#allocation7 + $0x3e0] sm:$0xf] }
 0x1f9   :  { %v7338_v53 = vor.u32 %v8683_v46, %v7337_v44  ;;  %v7321_v0 = vld [vmem:[#allocation7 + $0x3c0] sm:$0xf]  ;;  %v2707_v44 = vsel %vm2691_vm7, %v2375_v6, %v2699_v22  ;;  %v980_v46 = vperm.slane %v9285_v60, 2  ;;  %v7258_v22 = vor.u32 %v8663_v14, %v7257_v13 }
 0x1fa   :  { %2645 = vmatpush.bf16.msrb.mxu2 %v5846_v2  ;;  %2667 = vmatpush.bf16.msra.mxu0 %v6486_v3  ;;  %v9318_v56 = vpop.f32.mrf.mxu3  ;;  %v6355_v2 = vld [vmem:[#allocation5 + $0x438] sm:$0xf0]  ;;  %v6889_v3 = vld [vmem:[#allocation7 + $0x60] sm:$0xf]  ;;  %v7322_v10 = vor.u32 %v8679_v58, %v7321_v0  ;;  %v8639_v0 = vld [vmem:[#allocation7 + $0x28c] sm:$0xf0] }
 0x1fb   :  { %v6890_v12 = vor.u32 %v8571_v4, %v6889_v3  ;;  %v7193_v45 = vld [vmem:[#allocation7 + $0x2c0] sm:$0xf]  ;;  %v8715_v58 = vld [vmem:[#allocation7 + $0x4ec] sm:$0xf0]  ;;  %vm5485_vm7 = vcmask 523264  }
 0x1fc   :  { %4282 = vmatpush.bf16.msra.mxu3 %v7066_v1  ;;  %2682 = vmatpush.bf16.msra.mxu1 %v6678_v18  ;;  %v8432_v1 = vld [vmem:[#allocation5 + $0x41c] sm:$0xf]  ;;  %v8675_v18 = vld [vmem:[#allocation7 + $0x3ac] sm:$0xf0]  ;;  %v7194_v35 = vor.u32 %v8647_v34, %v7193_v45  ;;  %v7577_v3 = vld [vmem:[#allocation7 + $0x5c0] sm:$0xf] }
 0x1fd   :  { %2646 = vmatmul.bf16.vlgmr.msrb.gmra.mxu2 %v9254_v59  ;;  %v8575_v59 = vld [vmem:[#allocation7 + $0x8c] sm:$0xf0]  ;;  %v6358_v11 = vor.u32 %v8432_v1, %v6355_v2  ;;  %v7306_v28 = vor.u32 %v8675_v18, %v7305_v15  ;;  %v9330_v1 = vpack.c.bf16 %v2707_v44, %v2707_v44  ;;  %v2388_v2 = vadd.f32 %v9305_v23, %v980_v46  ;;  %v7145_v23 = vld [vmem:[#allocation7 + $0x260] sm:$0xf] }
 0x1fe   :  { %4268 = vmatpush.bf16.msra.mxu2 %v6954_v9  ;;  %2668 = vmatpush.bf16.msra.mxu0 %v6454_v20  ;;  %v6906_v61 = vor.u32 %v8575_v59, %v6905_v48  ;;  %v7002_v9 = vor.u32 %v8599_v55, %v7001_v54  ;;  %v8567_v20 = vld [vmem:[#allocation7 + $0x4c] sm:$0xf0]  ;;  %v7161_v55 = vld [vmem:[#allocation7 + $0x280] sm:$0xf] }
 0x1ff   :  { %v8559_v54 = vld [vmem:[#allocation7 + $0xc] sm:$0xf0]  ;;  %v7561_v45 = vld [vmem:[#allocation7 + $0x5a0] sm:$0xf] }
 0x200   :  { %4283 = vmatpush.bf16.msra.mxu3 %v7050_v19  ;;  %2683 = vmatpush.bf16.msra.mxu1 %v6646_v33  ;;  %v6873_v19 = vld [vmem:[#allocation7 + $0x40] sm:$0xf]  ;;  %v2439_v21 = vpop.f32.mrf.mxu2  ;;  %v8671_v33 = vld [vmem:[#allocation7 + $0x38c] sm:$0xf0] }
 0x201   :  { %v7290_v48 = vor.u32 %v8671_v33, %v7289_v31  ;;  %v8743_v4 = vld [vmem:[#allocation7 + $0x5cc] sm:$0xf0]  ;;  %v7113_v46 = vld [vmem:[#allocation7 + $0x220] sm:$0xf] }
 0x202   :  { %4269 = vmatpush.bf16.msra.mxu2 %v6938_v24  ;;  %2669 = vmatpush.bf16.msra.mxu0 %v6422_v37  ;;  %v981_v24 = vperm.slane %v9285_v60, 3  ;;  %v2454_v29 = vpop.f32.mrf.mxu3  ;;  %v8563_v37 = vld [vmem:[#allocation7 + $0x2c] sm:$0xf0]  ;;  %v7497_v14 = vld [vmem:[#allocation7 + $0x520] sm:$0xf] }
 0x203   :  { %v8635_v18 = vld [vmem:[#allocation7 + $0x26c] sm:$0xf0] }
 0x204   :  { %4284 = vmatpush.bf16.msra.mxu3 %v7034_v36  ;;  %2684 = vmatpush.bf16.msra.mxu1 %v6614_v49  ;;  %v6857_v36 = vld [vmem:[#allocation7 + $0x20] sm:$0xf]  ;;  %v9323_v40 = vpop.f32.mrf.mxu1  ;;  %v2440_v47 = vadd.f32 %v2439_v21, %v981_v24  ;;  %v2401_v21 = vadd.f32 %v9302_v63, %v2388_v2  ;;  %v8739_v34 = vld [vmem:[#allocation7 + $0x5ac] sm:$0xf0] }
 0x205   :  { %v6858_v59 = vor.u32 %v8563_v37, %v6857_v36  ;;  %v7273_v49 = vld [vmem:[#allocation7 + $0x360] sm:$0xf]  ;;  %v8659_v29 = vld [vmem:[#allocation7 + $0x32c] sm:$0xf0] }
 0x206   :  { %4270 = vmatpush.bf16.msra.mxu2 %v6922_v43  ;;  %2670 = vmatpush.bf16.msra.mxu0 %v6390_v57  ;;  %v8747_v43 = vld [vmem:[#allocation7 + $0x5ec] sm:$0xf0]  ;;  %v7274_v5 = vor.u32 %v8667_v50, %v7273_v49  ;;  %v2453_v62 = vadd.f32 %v9318_v56, %v2440_v47  ;;  %v2414_v24 = vadd.f32 %v9311_v7, %v2401_v21  ;;  %v7433_v63 = vld [vmem:[#allocation7 + $0x4a0] sm:$0xf] }
 0x207   :  { %2685 = vmatmul.bf16.vlgmr.msra.gmra.mxu1 %v9258_v25  ;;  %v6874_v25 = vor.u32 %v8567_v20, %v6873_v19  ;;  %v7594_v57 = vor.u32 %v8747_v43, %v7593_v32  ;;  %v7449_v19 = vld [vmem:[#allocation7 + $0x4c0] sm:$0xf]  ;;  %v8711_v56 = vld [vmem:[#allocation7 + $0x4cc] sm:$0xf0]  ;;  %v7578_v20 = vor.u32 %v8743_v4, %v7577_v3 }
 0x208   :  { %4285 = vmatpush.bf16.msra.mxu3 %v7018_v52  ;;  %4307 = vmatpush.bf16.msrb.mxu1 %v7338_v53  ;;  %v7178_v52 = vor.u32 %v8643_v41, %v7177_v39  ;;  %v6841_v53 = vld [vmem:[#allocation7] sm:$0xf]  ;;  %v7450_v27 = vor.u32 %v8711_v56, %v7449_v19  ;;  %v8631_v31 = vld [vmem:[#allocation7 + $0x24c] sm:$0xf0]  ;;  %v2427_v32 = vadd.f32 %v9308_v42, %v2414_v24 }
 0x209   :  { %v8707_v33 = vld [vmem:[#allocation7 + $0x4ac] sm:$0xf0]  ;;  %v7545_v36 = vld [vmem:[#allocation7 + $0x580] sm:$0xf] }
 0x20a   :  { %4271 = vmatpush.bf16.msra.mxu2 %v6906_v61  ;;  %2671 = vmatpush.bf16.msra.mxu0 %v6358_v11  ;;  %v2441_v61 = vpop.f32.mrf.mxu2  ;;  %v2465_v6 = vpop.f32.mrf.mxu0  ;;  %v7162_v11 = vor.u32 %v8639_v0, %v7161_v55  ;;  %v8735_v37 = vld [vmem:[#allocation7 + $0x58c] sm:$0xf0]  ;;  %v7225_v41 = vld [vmem:[#allocation7 + $0x300] sm:$0xf]  ;;  %v7434_v44 = vor.u32 %v8707_v33, %v7433_v63  ;;  %vm2692_vm10 = vcmp.gt.f32.partialorder %v2427_v32, 0.0 }
 0x20b   :  { %v2466_v15 = vadd.f32 %v2465_v6, %v2453_v62  ;;  %v7417_v47 = vld [vmem:[#allocation7 + $0x480] sm:$0xf]  ;;  %v8731_v50 = vld [vmem:[#allocation7 + $0x56c] sm:$0xf0]  ;;  %v8617_v63 = vld [vmem:[#allocation7 + $0x1e4] sm:$0xf] }
 0x20c   :  { %4286 = vmatpush.bf16.msra.mxu3 %v7002_v9  ;;  %4308 = vmatpush.bf16.msrb.mxu1 %v7322_v10  ;;  %v6842_v9 = vor.u32 %v8559_v54, %v6841_v53  ;;  %v2706_v10 = vsel %vm2690_vm8, %v9292_v8, %v2698_v38  ;;  %v7529_v49 = vld [vmem:[#allocation7 + $0x560] sm:$0xf]  ;;  %v2700_v53 = vmul.f32 0.01, %v2427_v32  ;;  %v8623_v61 = vld [vmem:[#allocation7 + $0x20c] sm:$0xf0] }
 0x20d   :  { %2672 = vmatmul.bf16.vlgmr.msra.gmra.mxu0 %v9262_v51  ;;  %v7465_v51 = vld [vmem:[#allocation7 + $0x4e0] sm:$0xf]  ;;  %v9339_v8 = vpack.c.bf16 %v2706_v10, %v2706_v10  ;;  %v2479_v30 = vadd.f32 %v9323_v40, %v2466_v15  ;;  %v8655_v40 = vld [vmem:[#allocation7 + $0x30c] sm:$0xf0]  ;;  %v7530_v2 = vor.u32 %v8731_v50, %v7529_v49  ;;  %v7083_v33 = vld [vmem:[#allocation7 + $0x1f0] sm:$0xf0] }
 0x20e   :  { %4272 = vmatpush.bf16.msra.mxu2 %v6890_v12  ;;  %4294 = vmatpush.bf16.msrb.mxu0 %v7210_v17  ;;  %v7466_v12 = vor.u32 %v8715_v58, %v7465_v51  ;;  %v2480_v17 = vpop.f32.mrf.mxu1  ;;  %v7401_v51 = vld [vmem:[#allocation7 + $0x460] sm:$0xf]  ;;  %v8699_v58 = vld [vmem:[#allocation7 + $0x46c] sm:$0xf0]  ;;  %v2708_v15 = vsel %vm2692_vm10, %v2427_v32, %v2700_v53  ;;  %v8581_v50 = vld [vmem:[#allocation7 + $0xc4] sm:$0xf] }
 0x20f   :  { %v2701_v38 = vmul.f32 0.01, %v2479_v30  ;;  %vm2693_vm9 = vcmp.gt.f32.partialorder %v2479_v30, 0.0  ;;  %v7513_v3 = vld [vmem:[#allocation7 + $0x540] sm:$0xf]  ;;  %v7402_v10 = vor.u32 %v8699_v58, %v7401_v51 }
 0x210   :  { %4287 = vmatpush.bf16.msra.mxu3 %v6986_v26  ;;  %4309 = vmatpush.bf16.msrb.mxu1 %v7306_v28  ;;  %v7146_v26 = vor.u32 %v8635_v18, %v7145_v23  ;;  %v7241_v28 = vld [vmem:[#allocation7 + $0x320] sm:$0xf]  ;;  %v8727_v4 = vld [vmem:[#allocation7 + $0x54c] sm:$0xf0]  ;;  %v8609_v51 = vld [vmem:[#allocation7 + $0x1a4] sm:$0xf] }
 0x211   :  { %v7242_v7 = vor.u32 %v8659_v29, %v7241_v28  ;;  %v2709_v0 = vsel %vm2693_vm9, %v2479_v30, %v2701_v38  ;;  %v8779_v62 = vld [vmem:[#allocation7 + $0x6ec] sm:$0xf0]  ;;  %v7514_v13 = vor.u32 %v8727_v4, %v7513_v3  ;;  %v7705_v19 = vld [vmem:[#allocation7 + $0x6c0] sm:$0xf]  ;;  %v7067_v38 = vld [vmem:[#allocation7 + $0x1d0] sm:$0xf0] }
 0x212   :  { %4273 = vmatpush.bf16.msra.mxu2 %v6874_v25  ;;  %4295 = vmatpush.bf16.msrb.mxu0 %v7194_v35  ;;  %v7129_v25 = vld [vmem:[#allocation7 + $0x240] sm:$0xf]  ;;  %v7562_v35 = vor.u32 %v8739_v34, %v7561_v45  ;;  %v2467_v39 = vpop.f32.mrf.mxu0  ;;  %v9347_v6 = vpack.c.bf16 %v2709_v0, %v2709_v0  ;;  %v8723_v18 = vld [vmem:[#allocation7 + $0x52c] sm:$0xf0]  ;;  %v9351_v34 = vpack.c.bf16 %v2708_v15, %v2708_v15  ;;  %v7051_v58 = vld [vmem:[#allocation7 + $0x1b0] sm:$0xf0] }
 0x213   :  { %v7130_v43 = vor.u32 %v8631_v31, %v7129_v25  ;;  %v8775_v56 = vld [vmem:[#allocation7 + $0x6cc] sm:$0xf0]  ;;  %v7689_v25 = vld [vmem:[#allocation7 + $0x6a0] sm:$0xf]  ;;  %v8577_v3 = vld [vmem:[#allocation7 + $0xa4] sm:$0xf] }
 0x214   :  { %4288 = vmatpush.bf16.msra.mxu3 %v6970_v16  ;;  %4310 = vmatpush.bf16.msrb.mxu1 %v7290_v48  ;;  %v8627_v16 = vld [vmem:[#allocation7 + $0x22c] sm:$0xf0]  ;;  %v7706_v28 = vor.u32 %v8775_v56, %v7705_v19  ;;  %v6923_v4 = vld [vmem:[#allocation7 + $0xb0] sm:$0xf0]  ;;  %v7849_v56 = vld [vmem:[#allocation7 + $0x7e0] sm:$0xf] }
 0x215   :  { %v8703_v48 = vld [vmem:[#allocation7 + $0x48c] sm:$0xf0]  ;;  %v7114_v54 = vor.u32 %v8627_v16, %v7113_v46  ;;  %v8613_v16 = vld [vmem:[#allocation7 + $0x1c4] sm:$0xf] }
 0x216   :  { %4274 = vmatpush.bf16.msra.mxu2 %v6858_v59  ;;  %4296 = vmatpush.bf16.msrb.mxu0 %v7178_v52  ;;  %v7546_v59 = vor.u32 %v8735_v37, %v7545_v36  ;;  %v7226_v52 = vor.u32 %v8655_v40, %v7225_v41  ;;  %v7418_v55 = vor.u32 %v8703_v48, %v7417_v47  ;;  %v8691_v24 = vld [vmem:[#allocation7 + $0x42c] sm:$0xf0]  ;;  %v7353_v36 = vld [vmem:[#allocation7 + $0x400] sm:$0xf] }
 0x217   :  { %4289 = vmatmul.bf16.vlgmr.msra.gmra.mxu3 %v9330_v1  ;;  %v8719_v29 = vld [vmem:[#allocation7 + $0x50c] sm:$0xf0]  ;;  %v7673_v40 = vld [vmem:[#allocation7 + $0x680] sm:$0xf] }
 0x218   :  { %4333 = vmatpush.bf16.msrb.mxu3 %v7594_v57  ;;  %4311 = vmatpush.bf16.msrb.mxu1 %v7274_v5  ;;  %v7097_v57 = vld [vmem:[#allocation7 + $0x200] sm:$0xf]  ;;  %v8771_v30 = vld [vmem:[#allocation7 + $0x6ac] sm:$0xf0] }
 0x219   :  { %v7721_v5 = vld [vmem:[#allocation7 + $0x6e0] sm:$0xf]  ;;  %v8687_v37 = vld [vmem:[#allocation7 + $0x40c] sm:$0xf0]  ;;  %v7690_v41 = vor.u32 %v8771_v30, %v7689_v25 }
 0x21a   :  { %4275 = vmatpush.bf16.msra.mxu2 %v6842_v9  ;;  %4297 = vmatpush.bf16.msrb.mxu0 %v7162_v11  ;;  %v9345_v42 = vpop.f32.mrf.mxu3  ;;  %v7098_v9 = vor.u32 %v8623_v61, %v7097_v57  ;;  %v7385_v11 = vld [vmem:[#allocation7 + $0x440] sm:$0xf]  ;;  %v7722_v23 = vor.u32 %v8779_v62, %v7721_v5  ;;  %v8767_v46 = vld [vmem:[#allocation7 + $0x68c] sm:$0xf0]  ;;  %v7354_v48 = vor.u32 %v8687_v37, %v7353_v36 }
 0x21b   :  { %v7657_v57 = vld [vmem:[#allocation7 + $0x660] sm:$0xf]  ;;  %v8763_v61 = vld [vmem:[#allocation7 + $0x66c] sm:$0xf0] }
 0x21c   :  { %4334 = vmatpush.bf16.msrb.mxu3 %v7578_v20  ;;  %4312 = vmatpush.bf16.msrb.mxu1 %v7258_v22  ;;  %v982_v20 = vperm.slane %v9285_v60, 4  ;;  %v7369_v22 = vld [vmem:[#allocation7 + $0x420] sm:$0xf]  ;;  %v7658_v5 = vor.u32 %v8763_v61, %v7657_v57  ;;  %v8807_v30 = vld [vmem:[#allocation7 + $0x7cc] sm:$0xf0] }
 0x21d   :  { %4276 = vmatmul.bf16.vlgmr.msra.gmra.mxu2 %v9339_v8  ;;  %v7641_v62 = vld [vmem:[#allocation7 + $0x640] sm:$0xf]  ;;  %v8799_v61 = vld [vmem:[#allocation7 + $0x78c] sm:$0xf0] }
 0x21e   :  { %4320 = vmatpush.bf16.msrb.mxu2 %v7466_v12  ;;  %4298 = vmatpush.bf16.msrb.mxu0 %v7146_v26  ;;  %v8695_v12 = vld [vmem:[#allocation7 + $0x44c] sm:$0xf0]  ;;  %v7498_v26 = vor.u32 %v8723_v18, %v7497_v14  ;;  %v8573_v18 = vld [vmem:[#allocation7 + $0x84] sm:$0xf]  ;;  %v7833_v25 = vld [vmem:[#allocation7 + $0x7c0] sm:$0xf] }
 0x21f   :  { %v7386_v45 = vor.u32 %v8695_v12, %v7385_v11  ;;  %v8759_v11 = vld [vmem:[#allocation7 + $0x64c] sm:$0xf0]  ;;  %v8605_v12 = vld [vmem:[#allocation7 + $0x184] sm:$0xf]  ;;  %v7834_v36 = vor.u32 %v8807_v30, %v7833_v25  ;;  %v7801_v57 = vld [vmem:[#allocation7 + $0x780] sm:$0xf] }
 0x220   :  { %4335 = vmatpush.bf16.msrb.mxu3 %v7562_v35  ;;  %4313 = vmatpush.bf16.msrb.mxu1 %v7242_v7  ;;  %v2491_v17 = vpop.f32.mrf.mxu2  ;;  %v7370_v35 = vor.u32 %v8691_v24, %v7369_v22  ;;  %v8585_v7 = vld [vmem:[#allocation7 + $0xe4] sm:$0xf]  ;;  %v7642_v19 = vor.u32 %v8759_v11, %v7641_v62  ;;  %v7625_v22 = vld [vmem:[#allocation7 + $0x620] sm:$0xf]  ;;  %v8755_v24 = vld [vmem:[#allocation7 + $0x62c] sm:$0xf0] }
 0x221   :  { %v2492_v60 = vadd.f32 %v2491_v17, %v982_v20  ;;  %v6926_v17 = vor.u32 %v8577_v3, %v6923_v4  ;;  %v8811_v20 = vld [vmem:[#allocation7 + $0x7ec] sm:$0xf0]  ;;  %v7802_v3 = vor.u32 %v8799_v61, %v7801_v57  ;;  %v8589_v62 = vld [vmem:[#allocation7 + $0x104] sm:$0xf]  ;;  %v7769_v30 = vld [vmem:[#allocation7 + $0x740] sm:$0xf] }
 0x222   :  { %4321 = vmatpush.bf16.msrb.mxu2 %v7450_v27  ;;  %4299 = vmatpush.bf16.msrb.mxu0 %v7130_v43  ;;  %v2506_v21 = vpop.f32.mrf.mxu3  ;;  %v7481_v27 = vld [vmem:[#allocation7 + $0x500] sm:$0xf]  ;;  %v6955_v43 = vld [vmem:[#allocation7 + $0xf0] sm:$0xf0]  ;;  %v8641_v11 = vld [vmem:[#allocation7 + $0x2a4] sm:$0xf] }
 0x223   :  { %v7482_v39 = vor.u32 %v8719_v29, %v7481_v27  ;;  %v2505_v47 = vadd.f32 %v9345_v42, %v2492_v60  ;;  %v6958_v49 = vor.u32 %v8585_v7, %v6955_v43  ;;  %v6907_v21 = vld [vmem:[#allocation7 + $0x90] sm:$0xf0]  ;;  %v8601_v27 = vld [vmem:[#allocation7 + $0x164] sm:$0xf]  ;;  %v8783_v57 = vld [vmem:[#allocation7 + $0x70c] sm:$0xf0] }
 0x224   :  { %4336 = vmatpush.bf16.msrb.mxu3 %v7546_v59  ;;  %4314 = vmatpush.bf16.msrb.mxu1 %v7226_v52  ;;  %v2530_v31 = vpop.f32.mrf.mxu1  ;;  %v7674_v52 = vor.u32 %v8767_v46, %v7673_v40  ;;  %v8569_v29 = vld [vmem:[#allocation7 + $0x64] sm:$0xf]  ;;  %v7003_v60 = vld [vmem:[#allocation7 + $0x150] sm:$0xf0]  ;;  %v8803_v40 = vld [vmem:[#allocation7 + $0x7ac] sm:$0xf0] }
 0x225   :  { %v8649_v43 = vld [vmem:[#allocation7 + $0x2e4] sm:$0xf] }
 0x226   :  { %4322 = vmatpush.bf16.msrb.mxu2 %v7434_v44  ;;  %4300 = vmatpush.bf16.msrb.mxu0 %v7114_v54  ;;  %v7086_v44 = vor.u32 %v8617_v63, %v7083_v33  ;;  %v6939_v54 = vld [vmem:[#allocation7 + $0xd0] sm:$0xf0]  ;;  %v8597_v33 = vld [vmem:[#allocation7 + $0x144] sm:$0xf] }
 0x227   :  { %4315 = vmatmul.bf16.vlgmr.msrb.gmra.mxu1 %v9347_v6  ;;  %v6942_v42 = vor.u32 %v8581_v50, %v6939_v54  ;;  %v6891_v63 = vld [vmem:[#allocation7 + $0x70] sm:$0xf0] }
 0x228   :  { %4337 = vmatpush.bf16.msrb.mxu3 %v7530_v2  ;;  %v2493_v32 = vpop.f32.mrf.mxu2  ;;  %v7195_v54 = vld [vmem:[#allocation7 + $0x2d0] sm:$0xf0] }
 0x229   :  { %v7817_v32 = vld [vmem:[#allocation7 + $0x7a0] sm:$0xf] }
 0x22a   :  { %4323 = vmatpush.bf16.msrb.mxu2 %v7418_v55  ;;  %4301 = vmatpush.bf16.msrb.mxu0 %v7098_v9  ;;  %v2517_v59 = vpop.f32.mrf.mxu0  ;;  %v7070_v55 = vor.u32 %v8613_v16, %v7067_v38  ;;  %v7818_v46 = vor.u32 %v8803_v40, %v7817_v32  ;;  %v6894_v16 = vor.u32 %v8569_v29, %v6891_v63  ;;  %v7753_v40 = vld [vmem:[#allocation7 + $0x720] sm:$0xf] }
 0x22b   :  { %v2518_v53 = vadd.f32 %v2517_v59, %v2505_v47  ;;  %v8565_v47 = vld [vmem:[#allocation7 + $0x44] sm:$0xf]  ;;  %v7006_v59 = vor.u32 %v8597_v33, %v7003_v60  ;;  %v7451_v60 = vld [vmem:[#allocation7 + $0x4d0] sm:$0xf0] }
 0x22c   :  { %4338 = vmatpush.bf16.msrb.mxu3 %v7514_v13  ;;  %v2532_v0 = vpop.f32.mrf.mxu1  ;;  %v7035_v13 = vld [vmem:[#allocation7 + $0x190] sm:$0xf0]  ;;  %v8709_v33 = vld [vmem:[#allocation7 + $0x4c4] sm:$0xf] }
 0x22d   :  { %4302 = vmatmul.bf16.vlgmr.msrb.gmra.mxu0 %v9351_v34  ;;  %v2531_v2 = vadd.f32 %v2530_v31, %v2518_v53  ;;  %v6910_v31 = vor.u32 %v8573_v18, %v6907_v21  ;;  %v8645_v53 = vld [vmem:[#allocation7 + $0x2c4] sm:$0xf] }
 0x22e   :  { %4324 = vmatpush.bf16.msrb.mxu2 %v7402_v10  ;;  %4346 = vmatpush.bf16.msra.mxu0 %v7722_v23  ;;  %v7054_v10 = vor.u32 %v8609_v51, %v7051_v58  ;;  %v9363_v0 = vld [vmem:[%s9521_s6] sm:$0xff] }
 0x22f   :  { %vm2694_vm11 = vcmp.gt.f32.partialorder %v2531_v2, 0.0  ;;  %v2702_v9 = vmul.f32 0.01, %v2531_v2  ;;  %v983_v51 = vperm.slane %v9363_v0, 5  ;;  %v8713_v21 = vld [vmem:[#allocation7 + $0x4e4] sm:$0xf] }
 0x230   :  { %4339 = vmatpush.bf16.msrb.mxu3 %v7498_v26  ;;  %v7850_v26 = vor.u32 %v8811_v20, %v7849_v56  ;;  %v6843_v20 = vld [vmem:[#allocation7 + $0x10] sm:$0xf0] }
 0x231   :  { %v2710_v14 = vsel %vm2694_vm11, %v2531_v2, %v2702_v9  ;;  %v8561_v2 = vld [vmem:[#allocation7 + $0x24] sm:$0xf]  ;;  %v6971_v9 = vld [vmem:[#allocation7 + $0x110] sm:$0xf0] }
 0x232   :  { %4325 = vmatpush.bf16.msrb.mxu2 %v7386_v45  ;;  %4347 = vmatpush.bf16.msra.mxu0 %v7706_v28  ;;  %v9355_v23 = vpack.c.bf16 %v2710_v14, %v2710_v14  ;;  %v2519_v15 = vpop.f32.mrf.mxu0  ;;  %v7038_v45 = vor.u32 %v8605_v12, %v7035_v13  ;;  %v7019_v28 = vld [vmem:[#allocation7 + $0x170] sm:$0xf0]  ;;  %v7785_v13 = vld [vmem:[#allocation7 + $0x760] sm:$0xf]  ;;  %v8795_v14 = vld [vmem:[#allocation7 + $0x76c] sm:$0xf0] }
 0x233   :  { %4359 = vmatpush.bf16.msra.mxu1 %v7850_v26  ;;  %v7022_v7 = vor.u32 %v8601_v27, %v7019_v28  ;;  %v7179_v12 = vld [vmem:[#allocation7 + $0x2b0] sm:$0xf0]  ;;  %v7786_v15 = vor.u32 %v8795_v14, %v7785_v13  ;;  %v8637_v26 = vld [vmem:[#allocation7 + $0x284] sm:$0xf] }
 0x234   :  { %4340 = vmatpush.bf16.msrb.mxu3 %v7482_v39  ;;  %v7609_v39 = vld [vmem:[#allocation7 + $0x600] sm:$0xf]  ;;  %v7163_v27 = vld [vmem:[#allocation7 + $0x290] sm:$0xf0] }
 0x235   :  { %v7115_v13 = vld [vmem:[#allocation7 + $0x230] sm:$0xf0] }
 0x236   :  { %4326 = vmatpush.bf16.msrb.mxu2 %v7370_v35  ;;  %4348 = vmatpush.bf16.msra.mxu0 %v7690_v41  ;;  %v7626_v35 = vor.u32 %v8755_v24, %v7625_v22  ;;  %v8751_v41 = vld [vmem:[#allocation7 + $0x60c] sm:$0xf0]  ;;  %v6974_v22 = vor.u32 %v8589_v62, %v6971_v9  ;;  %v7182_v24 = vor.u32 %v8641_v11, %v7179_v12  ;;  %v7579_v62 = vld [vmem:[#allocation7 + $0x5d0] sm:$0xf0]  ;;  %v8625_v12 = vld [vmem:[#allocation7 + $0x224] sm:$0xf] }
 0x237   :  { %4360 = vmatpush.bf16.msra.mxu1 %v7834_v36  ;;  %v7610_v38 = vor.u32 %v8751_v41, %v7609_v39  ;;  %v8633_v39 = vld [vmem:[#allocation7 + $0x264] sm:$0xf]  ;;  %v7147_v41 = vld [vmem:[#allocation7 + $0x270] sm:$0xf0] }
 0x238   :  { %4385 = vmatpush.bf16.msra.mxu3 %v7086_v44  ;;  %v7211_v44 = vld [vmem:[#allocation7 + $0x2f0] sm:$0xf0] }
 0x239   :  { %v7214_v50 = vor.u32 %v8649_v43, %v7211_v44  ;;  %v7454_v44 = vor.u32 %v8709_v33, %v7451_v60  ;;  %v7339_v11 = vld [vmem:[#allocation7 + $0x3f0] sm:$0xf0]  ;;  %v8733_v60 = vld [vmem:[#allocation7 + $0x584] sm:$0xf] }
 0x23a   :  { %4327 = vmatpush.bf16.msrb.mxu2 %v7354_v48  ;;  %4349 = vmatpush.bf16.msra.mxu0 %v7674_v52  ;;  %v9358_v37 = vpop.f32.mrf.mxu3  ;;  %v6875_v48 = vld [vmem:[#allocation7 + $0x50] sm:$0xf0] }
 0x23b   :  { %v6987_v52 = vld [vmem:[#allocation7 + $0x130] sm:$0xf0]  ;;  %4361 = vmatpush.bf16.msra.mxu1 %v7818_v46  ;;  %v6878_v58 = vor.u32 %v8565_v47, %v6875_v48  ;;  %v8787_v46 = vld [vmem:[#allocation7 + $0x72c] sm:$0xf0]  ;;  %v7150_v47 = vor.u32 %v8633_v39, %v7147_v41 }
 0x23c   :  { %4386 = vmatpush.bf16.msra.mxu3 %v7070_v55  ;;  %v7754_v48 = vor.u32 %v8787_v46, %v7753_v40  ;;  %v7387_v33 = vld [vmem:[#allocation7 + $0x450] sm:$0xf0] }
 0x23d   :  { %4328 = vmatmul.bf16.vlgmr.msrb.gmra.mxu2 %v9355_v23  ;;  %v7291_v40 = vld [vmem:[#allocation7 + $0x390] sm:$0xf0] }
 0x23e   :  { %4372 = vmatpush.bf16.msra.mxu2 %v6958_v49  ;;  %4350 = vmatpush.bf16.msra.mxu0 %v7658_v5  ;;  %v8593_v49 = vld [vmem:[#allocation7 + $0x124] sm:$0xf]  ;;  %v7371_v46 = vld [vmem:[#allocation7 + $0x430] sm:$0xf0] }
 0x23f   :  { %v6990_v5 = vor.u32 %v8593_v49, %v6987_v52  ;;  %4362 = vmatpush.bf16.msra.mxu1 %v7802_v3  ;;  %v7595_v49 = vld [vmem:[#allocation7 + $0x5f0] sm:$0xf0] }
 0x240   :  { %4387 = vmatpush.bf16.msra.mxu3 %v7054_v10  ;;  %v2543_v55 = vpop.f32.mrf.mxu2  ;;  %v7198_v10 = vor.u32 %v8645_v53, %v7195_v54  ;;  %v7131_v53 = vld [vmem:[#allocation7 + $0x250] sm:$0xf0] }
 0x241   :  { %v2544_v56 = vadd.f32 %v2543_v55, %v983_v51  ;;  %v7737_v55 = vld [vmem:[#allocation7 + $0x700] sm:$0xf] }
 0x242   :  { %4373 = vmatpush.bf16.msra.mxu2 %v6942_v42  ;;  %4351 = vmatpush.bf16.msra.mxu0 %v7642_v19  ;;  %v6859_v42 = vld [vmem:[#allocation7 + $0x30] sm:$0xf0]  ;;  %v2558_v4 = vpop.f32.mrf.mxu3  ;;  %v8557_v19 = vld [vmem:[#allocation7 + $0x4] sm:$0xf]  ;;  %v7738_v3 = vor.u32 %v8783_v57, %v7737_v55 }
 0x243   :  { %v6862_v18 = vor.u32 %v8561_v2, %v6859_v42  ;;  %4363 = vmatpush.bf16.msra.mxu1 %v7786_v15  ;;  %v6846_v29 = vor.u32 %v8557_v19, %v6843_v20  ;;  %v2557_v63 = vadd.f32 %v9358_v37, %v2544_v56  ;;  %v7435_v37 = vld [vmem:[#allocation7 + $0x4b0] sm:$0xf0]  ;;  %v8741_v42 = vld [vmem:[#allocation7 + $0x5c4] sm:$0xf] }
 0x244   :  { %4388 = vmatpush.bf16.msra.mxu3 %v7038_v45  ;;  %v7467_v45 = vld [vmem:[#allocation7 + $0x4f0] sm:$0xf0]  ;;  %v8677_v19 = vld [vmem:[#allocation7 + $0x3c4] sm:$0xf] }
 0x245   :  { %v7470_v25 = vor.u32 %v8713_v21, %v7467_v45  ;;  %v7419_v2 = vld [vmem:[#allocation7 + $0x490] sm:$0xf0]  ;;  %v8737_v21 = vld [vmem:[#allocation7 + $0x5a4] sm:$0xf] }
 0x246   :  { %4374 = vmatpush.bf16.msra.mxu2 %v6926_v17  ;;  %4352 = vmatpush.bf16.msra.mxu0 %v7626_v35  ;;  %v2582_v17 = vpop.f32.mrf.mxu1  ;;  %v7166_v35 = vor.u32 %v8637_v26, %v7163_v27  ;;  %v7323_v56 = vld [vmem:[#allocation7 + $0x3d0] sm:$0xf0]  ;;  %v8621_v27 = vld [vmem:[#allocation7 + $0x204] sm:$0xf] }
 0x247   :  { %v7403_v20 = vld [vmem:[#allocation7 + $0x470] sm:$0xf0]  ;;  %v8725_v57 = vld [vmem:[#allocation7 + $0x544] sm:$0xf] }
 0x248   :  { %4389 = vmatpush.bf16.msra.mxu3 %v7022_v7  ;;  %v2545_v28 = vpop.f32.mrf.mxu2  ;;  %v7563_v45 = vld [vmem:[#allocation7 + $0x5b0] sm:$0xf0] }
 0x249   :  { %v7099_v28 = vld [vmem:[#allocation7 + $0x210] sm:$0xf0] }
 0x24a   :  { %4375 = vmatpush.bf16.msra.mxu2 %v6910_v31  ;;  %4353 = vmatpush.bf16.msra.mxu0 %v7610_v38  ;;  %v8791_v31 = vld [vmem:[#allocation7 + $0x74c] sm:$0xf0]  ;;  %v2569_v7 = vpop.f32.mrf.mxu0  ;;  %v8705_v38 = vld [vmem:[#allocation7 + $0x4a4] sm:$0xf]  ;;  %v7355_v55 = vld [vmem:[#allocation7 + $0x410] sm:$0xf0] }
 0x24b   :  { %v7770_v36 = vor.u32 %v8791_v31, %v7769_v30  ;;  %v2570_v32 = vadd.f32 %v2569_v7, %v2557_v63  ;;  %v7438_v54 = vor.u32 %v8705_v38, %v7435_v37  ;;  %v7566_v31 = vor.u32 %v8737_v21, %v7563_v45  ;;  %v8693_v63 = vld [vmem:[#allocation7 + $0x444] sm:$0xf]  ;;  %v7531_v38 = vld [vmem:[#allocation7 + $0x570] sm:$0xf0] }
 0x24c   :  { %4390 = vmatpush.bf16.msra.mxu3 %v7006_v59  ;;  %v8745_v59 = vld [vmem:[#allocation7 + $0x5e4] sm:$0xf]  ;;  %v7390_v41 = vor.u32 %v8693_v63, %v7387_v33  ;;  %v7243_v45 = vld [vmem:[#allocation7 + $0x330] sm:$0xf0]  ;;  %v7089_v33 = vld [vmem:[#allocation7 + $0x1e8] sm:$0xf] }
 0x24d   :  { %4364 = vmatpush.bf16.msra.mxu1 %v7770_v36  ;;  %v7598_v51 = vor.u32 %v8745_v59, %v7595_v49  ;;  %v7102_v36 = vor.u32 %v8621_v27, %v7099_v28  ;;  %v8657_v21 = vld [vmem:[#allocation7 + $0x324] sm:$0xf]  ;;  %v7483_v28 = vld [vmem:[#allocation7 + $0x510] sm:$0xf0] }
 0x24e   :  { %4376 = vmatpush.bf16.msra.mxu2 %v6894_v16  ;;  %4398 = vmatpush.bf16.msrb.mxu0 %v7214_v50  ;;  %v2584_v43 = vpop.f32.mrf.mxu1  ;;  %v2583_v16 = vadd.f32 %v2582_v17, %v2570_v32  ;;  %v8629_v50 = vld [vmem:[#allocation7 + $0x244] sm:$0xf]  ;;  %v7582_v17 = vor.u32 %v8741_v42, %v7579_v62  ;;  %v8588_v42 = vld [vmem:[#allocation7 + $0xf4] sm:$0xf0]  ;;  %v7723_v63 = vld [vmem:[#allocation7 + $0x6f0] sm:$0xf0] }
 0x24f   :  { %v7134_v9 = vor.u32 %v8629_v50, %v7131_v53  ;;  %v8689_v43 = vld [vmem:[#allocation7 + $0x424] sm:$0xf]  ;;  %v7275_v53 = vld [vmem:[#allocation7 + $0x370] sm:$0xf0] }
 0x250   :  { %4391 = vmatpush.bf16.msra.mxu3 %v6990_v5  ;;  %vm2695_vm12 = vcmp.gt.f32.partialorder %v2583_v16, 0.0  ;;  %v2703_v52 = vmul.f32 0.01, %v2583_v16  ;;  %v7374_v59 = vor.u32 %v8689_v43, %v7371_v46  ;;  %v8685_v50 = vld [vmem:[#allocation7 + $0x404] sm:$0xf] }
 0x251   :  { %4365 = vmatpush.bf16.msra.mxu1 %v7754_v48  ;;  %v8717_v27 = vld [vmem:[#allocation7 + $0x504] sm:$0xf]  ;;  %v6913_v46 = vld [vmem:[#allocation7 + $0x88] sm:$0xf] }
 0x252   :  { %4377 = vmatpush.bf16.msra.mxu2 %v6878_v58  ;;  %4399 = vmatpush.bf16.msrb.mxu0 %v7198_v10  ;;  %v2711_v61 = vsel %vm2695_vm12, %v2583_v16, %v2703_v52  ;;  %v8701_v58 = vld [vmem:[#allocation7 + $0x484] sm:$0xf]  ;;  %v2571_v5 = vpop.f32.mrf.mxu0 }
 0x253   :  { %v9368_v4 = vpack.c.bf16 %v2711_v61, %v2711_v61  ;;  %v8681_v10 = vld [vmem:[#allocation7 + $0x3e4] sm:$0xf]  ;;  %v7422_v15 = vor.u32 %v8701_v58, %v7419_v2  ;;  %v7515_v61 = vld [vmem:[#allocation7 + $0x550] sm:$0xf0]  ;;  %v6961_v2 = vld [vmem:[#allocation7 + $0xe8] sm:$0xf]  ;;  %v7358_v5 = vor.u32 %v8685_v50, %v7355_v55 }
 0x254   :  { %4392 = vmatpush.bf16.msra.mxu3 %v6974_v22  ;;  %v7342_v14 = vor.u32 %v8681_v10, %v7339_v11  ;;  %v7118_v22 = vor.u32 %v8625_v12, %v7115_v13  ;;  %v8729_v16 = vld [vmem:[#allocation7 + $0x564] sm:$0xf]  ;;  %v7518_v62 = vor.u32 %v8725_v57, %v7515_v61  ;;  %v7259_v10 = vld [vmem:[#allocation7 + $0x350] sm:$0xf0]  ;;  %v6962_v11 = vor.u32 %v8588_v42, %v6961_v2  ;;  %v6897_v55 = vld [vmem:[#allocation7 + $0x68] sm:$0xf] }
 0x255   :  { %4366 = vmatpush.bf16.msra.mxu1 %v7738_v3  ;;  %4341 = vmatmul.bf16.vlgmr.msrb.gmra.mxu3 %v9368_v4  ;;  %v7534_v49 = vor.u32 %v8729_v16, %v7531_v38  ;;  %v8665_v52 = vld [vmem:[#allocation7 + $0x364] sm:$0xf]  ;;  %v7499_v13 = vld [vmem:[#allocation7 + $0x530] sm:$0xf0]  ;;  %v8576_v16 = vld [vmem:[#allocation7 + $0x94] sm:$0xf0] }
 0x256   :  { %4378 = vmatpush.bf16.msra.mxu2 %v6862_v18  ;;  %4400 = vmatpush.bf16.msrb.mxu0 %v7182_v24  ;;  %v8697_v18 = vld [vmem:[#allocation7 + $0x464] sm:$0xf]  ;;  %v7326_v24 = vor.u32 %v8677_v19, %v7323_v56  ;;  %v6914_v50 = vor.u32 %v8576_v16, %v6913_v46  ;;  %v8572_v57 = vld [vmem:[#allocation7 + $0x74] sm:$0xf0]  ;;  %v7691_v61 = vld [vmem:[#allocation7 + $0x6b0] sm:$0xf0] }
 0x257   :  { %v7406_v30 = vor.u32 %v8697_v18, %v7403_v20  ;;  %v8721_v12 = vld [vmem:[#allocation7 + $0x524] sm:$0xf]  ;;  %v8584_v18 = vld [vmem:[#allocation7 + $0xd4] sm:$0xf0]  ;;  %v6898_v42 = vor.u32 %v8572_v57, %v6897_v55  ;;  %v7627_v46 = vld [vmem:[#allocation7 + $0x630] sm:$0xf0] }
 0x258   :  { %4437 = vmatpush.bf16.msrb.mxu3 %v7598_v51  ;;  %v7278_v51 = vor.u32 %v8665_v52, %v7275_v53  ;;  %v7502_v20 = vor.u32 %v8721_v12, %v7499_v13  ;;  %v7041_v12 = vld [vmem:[#allocation7 + $0x188] sm:$0xf]  ;;  %v8608_v13 = vld [vmem:[#allocation7 + $0x194] sm:$0xf0]  ;;  %v7611_v55 = vld [vmem:[#allocation7 + $0x610] sm:$0xf0] }
 0x259   :  { %4411 = vmatpush.bf16.msrb.mxu1 %v7342_v14  ;;  %v6993_v16 = vld [vmem:[#allocation7 + $0x128] sm:$0xf] }
 0x25a   :  { %4379 = vmatpush.bf16.msra.mxu2 %v6846_v29  ;;  %4401 = vmatpush.bf16.msrb.mxu0 %v7166_v35  ;;  %v2608_v26 = vpop.f32.mrf.mxu3  ;;  %v8673_v29 = vld [vmem:[#allocation7 + $0x3a4] sm:$0xf]  ;;  %v7547_v35 = vld [vmem:[#allocation7 + $0x590] sm:$0xf0] }
 0x25b   :  { %v7550_v32 = vor.u32 %v8733_v60, %v7547_v35  ;;  %v8620_v60 = vld [vmem:[#allocation7 + $0x1f4] sm:$0xf0] }
 0x25c   :  { %4438 = vmatpush.bf16.msrb.mxu3 %v7582_v17  ;;  %v6945_v17 = vld [vmem:[#allocation7 + $0xc8] sm:$0xf] }
 0x25d   :  { %4380 = vmatmul.bf16.vlgmr.msra.gmra.mxu2 %v9339_v8  ;;  %4412 = vmatpush.bf16.msrb.mxu1 %v7326_v24  ;;  %v6946_v24 = vor.u32 %v8584_v18, %v6945_v17  ;;  %v7042_v18 = vor.u32 %v8608_v13, %v7041_v12 }
 0x25e   :  { %4424 = vmatpush.bf16.msrb.mxu2 %v7470_v25  ;;  %4402 = vmatpush.bf16.msrb.mxu0 %v7150_v47  ;;  %v7307_v25 = vld [vmem:[#allocation7 + $0x3b0] sm:$0xf0]  ;;  %v984_v47 = vperm.slane %v9363_v0, 6 }
 0x25f   :  { %v7310_v7 = vor.u32 %v8673_v29, %v7307_v25  ;;  %v7246_v29 = vor.u32 %v8657_v21, %v7243_v45  ;;  %v7659_v21 = vld [vmem:[#allocation7 + $0x670] sm:$0xf0]  ;;  %v7025_v45 = vld [vmem:[#allocation7 + $0x168] sm:$0xf] }
 0x260   :  { %4439 = vmatpush.bf16.msrb.mxu3 %v7566_v31  ;;  %v2595_v39 = vpop.f32.mrf.mxu2  ;;  %v6929_v31 = vld [vmem:[#allocation7 + $0xa8] sm:$0xf] }
 0x261   :  { %4413 = vmatpush.bf16.msrb.mxu1 %v7310_v7  ;;  %v2596_v58 = vadd.f32 %v2595_v39, %v984_v47  ;;  %v8653_v7 = vld [vmem:[#allocation7 + $0x304] sm:$0xf]  ;;  %v7707_v47 = vld [vmem:[#allocation7 + $0x6d0] sm:$0xf0] }
 0x262   :  { %4425 = vmatpush.bf16.msrb.mxu2 %v7454_v44  ;;  %4403 = vmatpush.bf16.msrb.mxu0 %v7134_v9  ;;  %v8669_v44 = vld [vmem:[#allocation7 + $0x384] sm:$0xf]  ;;  %v2610_v48 = vpop.f32.mrf.mxu3 }
 0x263   :  { %v7294_v37 = vor.u32 %v8669_v44, %v7291_v40  ;;  %v8661_v9 = vld [vmem:[#allocation7 + $0x344] sm:$0xf]  ;;  %v7090_v44 = vor.u32 %v8620_v60, %v7089_v33  ;;  %v7073_v48 = vld [vmem:[#allocation7 + $0x1c8] sm:$0xf]  ;;  %v7643_v33 = vld [vmem:[#allocation7 + $0x650] sm:$0xf0] }
 0x264   :  { %4440 = vmatpush.bf16.msrb.mxu3 %v7550_v32  ;;  %v7262_v14 = vor.u32 %v8661_v9, %v7259_v10  ;;  %v8773_v40 = vld [vmem:[#allocation7 + $0x6c4] sm:$0xf]  ;;  %v6881_v9 = vld [vmem:[#allocation7 + $0x48] sm:$0xf]  ;;  %v8568_v10 = vld [vmem:[#allocation7 + $0x54] sm:$0xf0] }
 0x265   :  { %4414 = vmatpush.bf16.msrb.mxu1 %v7294_v37  ;;  %4393 = vmatmul.bf16.vlgmr.msra.gmra.mxu3 %v9330_v1  ;;  %v7710_v52 = vor.u32 %v8773_v40, %v7707_v47  ;;  %v7009_v60 = vld [vmem:[#allocation7 + $0x148] sm:$0xf] }
 0x266   :  { %4426 = vmatpush.bf16.msrb.mxu2 %v7438_v54  ;;  %4404 = vmatpush.bf16.msrb.mxu0 %v7118_v22  ;;  %v2634_v54 = vpop.f32.mrf.mxu1 }
 0x268   :  { %4441 = vmatpush.bf16.msrb.mxu3 %v7534_v49  ;;  %v2597_v3 = vpop.f32.mrf.mxu2 }
 0x269   :  { %4415 = vmatpush.bf16.msrb.mxu1 %v7278_v51  ;;  %v7057_v51 = vld [vmem:[#allocation7 + $0x1a8] sm:$0xf] }
 0x26a   :  { %4427 = vmatpush.bf16.msrb.mxu2 %v7422_v15  ;;  %4405 = vmatpush.bf16.msrb.mxu0 %v7102_v36  ;;  %v2609_v15 = vadd.f32 %v2608_v26, %v2596_v58  ;;  %v2621_v19 = vpop.f32.mrf.mxu0  ;;  %v8580_v26 = vld [vmem:[#allocation7 + $0xb4] sm:$0xf0]  ;;  %v7486_v36 = vor.u32 %v8717_v27, %v7483_v28 }
 0x26b   :  { %v6930_v39 = vor.u32 %v8580_v26, %v6929_v31  ;;  %v8612_v58 = vld [vmem:[#allocation7 + $0x1b4] sm:$0xf0]  ;;  %v6849_v31 = vld [vmem:[#allocation7 + $0x8] sm:$0xf] }
 0x26c   :  { %v2622_v56 = vadd.f32 %v2621_v19, %v2609_v15  ;;  %4442 = vmatpush.bf16.msrb.mxu3 %v7518_v62  ;;  %v8765_v62 = vld [vmem:[#allocation7 + $0x684] sm:$0xf]  ;;  %v8560_v26 = vld [vmem:[#allocation7 + $0x14] sm:$0xf0] }
 0x26d   :  { %4416 = vmatpush.bf16.msrb.mxu1 %v7262_v14  ;;  %v6882_v14 = vor.u32 %v8568_v10, %v6881_v9  ;;  %v8761_v19 = vld [vmem:[#allocation7 + $0x664] sm:$0xf]  ;;  %v7441_v9 = vld [vmem:[#allocation7 + $0x4a8] sm:$0xf]  ;;  %v8708_v10 = vld [vmem:[#allocation7 + $0x4b4] sm:$0xf0] }
 0x26e   :  { %4428 = vmatpush.bf16.msrb.mxu2 %v7406_v30  ;;  %v2636_v22 = vpop.f32.mrf.mxu1  ;;  %v2635_v25 = vadd.f32 %v2634_v54, %v2622_v56  ;;  %v8777_v30 = vld [vmem:[#allocation7 + $0x6e4] sm:$0xf]  ;;  %v6865_v56 = vld [vmem:[#allocation7 + $0x28] sm:$0xf] }
 0x26f   :  { %v7726_v43 = vor.u32 %v8777_v30, %v7723_v63  ;;  %v8769_v54 = vld [vmem:[#allocation7 + $0x6a4] sm:$0xf]  ;;  %v8604_v22 = vld [vmem:[#allocation7 + $0x174] sm:$0xf0] }
 0x270   :  { %vm2696_vm13 = vcmp.gt.f32.partialorder %v2635_v25, 0.0  ;;  %v2704_v35 = vmul.f32 0.01, %v2635_v25  ;;  %4443 = vmatpush.bf16.msrb.mxu3 %v7502_v20  ;;  %v7694_v3 = vor.u32 %v8769_v54, %v7691_v61  ;;  %v8564_v20 = vld [vmem:[#allocation7 + $0x34] sm:$0xf0] }
 0x271   :  { %4417 = vmatpush.bf16.msrb.mxu1 %v7246_v29  ;;  %v6866_v28 = vor.u32 %v8564_v20, %v6865_v56  ;;  %v7662_v29 = vor.u32 %v8761_v19, %v7659_v21  ;;  %v8757_v30 = vld [vmem:[#allocation7 + $0x644] sm:$0xf]  ;;  %v7442_v56 = vor.u32 %v8708_v10, %v7441_v9  ;;  %v7201_v21 = vld [vmem:[#allocation7 + $0x2c8] sm:$0xf]  ;;  %v7787_v10 = vld [vmem:[#allocation7 + $0x770] sm:$0xf0] }
 0x272   :  { %4429 = vmatpush.bf16.msrb.mxu2 %v7390_v41  ;;  %v7227_v41 = vld [vmem:[#allocation7 + $0x310] sm:$0xf0]  ;;  %v2712_v32 = vsel %vm2696_vm13, %v2635_v25, %v2704_v35  ;;  %v2623_v37 = vpop.f32.mrf.mxu0  ;;  %v7026_v25 = vor.u32 %v8604_v22, %v7025_v45  ;;  %v8600_v35 = vld [vmem:[#allocation7 + $0x154] sm:$0xf0]  ;;  %v8749_v54 = vld [vmem:[#allocation7 + $0x604] sm:$0xf] }
 0x273   :  { %v9374_v38 = vpack.c.bf16 %v2712_v32, %v2712_v32  ;;  %v7230_v49 = vor.u32 %v8653_v7, %v7227_v41  ;;  %v7473_v7 = vld [vmem:[#allocation7 + $0x4e8] sm:$0xf]  ;;  %v7646_v32 = vor.u32 %v8757_v30, %v7643_v33  ;;  %v8596_v37 = vld [vmem:[#allocation7 + $0x134] sm:$0xf0]  ;;  %v7614_v13 = vor.u32 %v8749_v54, %v7611_v55  ;;  %v8805_v20 = vld [vmem:[#allocation7 + $0x7c4] sm:$0xf] }
 0x274   :  { %4444 = vmatpush.bf16.msrb.mxu3 %v7486_v36  ;;  %v8648_v45 = vld [vmem:[#allocation7 + $0x2d4] sm:$0xf0]  ;;  %v7585_v30 = vld [vmem:[#allocation7 + $0x5c8] sm:$0xf] }
 0x275   :  { %4354 = vmatmul.bf16.vlgmr.msra.gmra.mxu0 %v9374_v38  ;;  %4418 = vmatpush.bf16.msrb.mxu1 %v7230_v49  ;;  %v8696_v54 = vld [vmem:[#allocation7 + $0x454] sm:$0xf0]  ;;  %v7553_v55 = vld [vmem:[#allocation7 + $0x588] sm:$0xf] }
 0x276   :  { %4430 = vmatpush.bf16.msrb.mxu2 %v7374_v59  ;;  %v8616_v59 = vld [vmem:[#allocation7 + $0x1d4] sm:$0xf0]  ;;  %4450 = vmatpush.bf16.msra.mxu0 %v7726_v43  ;;  %v7010_v43 = vor.u32 %v8600_v35, %v7009_v60  ;;  %v7185_v35 = vld [vmem:[#allocation7 + $0x2a8] sm:$0xf] }
 0x277   :  { %v7074_v53 = vor.u32 %v8616_v59, %v7073_v48  ;;  %4445 = vmatmul.bf16.vlgmr.msrb.gmra.mxu3 %v9368_v4  ;;  %v7457_v48 = vld [vmem:[#allocation7 + $0x4c8] sm:$0xf]  ;;  %v8712_v59 = vld [vmem:[#allocation7 + $0x4d4] sm:$0xf0] }
 0x278   :  { %4489 = vmatpush.bf16.msra.mxu3 %v7090_v44  ;;  %v8753_v44 = vld [vmem:[#allocation7 + $0x624] sm:$0xf]  ;;  %v7458_v61 = vor.u32 %v8712_v59, %v7457_v48  ;;  %v7169_v59 = vld [vmem:[#allocation7 + $0x288] sm:$0xf] }
 0x279   :  { %v8797_v48 = vld [vmem:[#allocation7 + $0x784] sm:$0xf] }
 0x27a   :  { %4431 = vmatpush.bf16.msrb.mxu2 %v7358_v5  ;;  %v2660_v2 = vpop.f32.mrf.mxu3  ;;  %4451 = vmatpush.bf16.msra.mxu0 %v7710_v52  ;;  %v7058_v5 = vor.u32 %v8612_v58, %v7057_v51  ;;  %v7630_v52 = vor.u32 %v8753_v44, %v7627_v46  ;;  %v6977_v51 = vld [vmem:[#allocation7 + $0x108] sm:$0xf]  ;;  %v8592_v58 = vld [vmem:[#allocation7 + $0x114] sm:$0xf0] }
 0x27b   :  { %v7569_v44 = vld [vmem:[#allocation7 + $0x5a8] sm:$0xf] }
 0x27c   :  { %4490 = vmatpush.bf16.msra.mxu3 %v7074_v53  ;;  %v6994_v53 = vor.u32 %v8596_v37, %v6993_v16 }
 0x27d   :  { %4432 = vmatmul.bf16.vlgmr.msrb.gmra.mxu2 %v9355_v23 }
 0x27e   :  { %4476 = vmatpush.bf16.msra.mxu2 %v6962_v11  ;;  %v7675_v11 = vld [vmem:[#allocation7 + $0x690] sm:$0xf0]  ;;  %4452 = vmatpush.bf16.msra.mxu0 %v7694_v3 }
 0x27f   :  { %v7678_v17 = vor.u32 %v8765_v62, %v7675_v11  ;;  %v8652_v62 = vld [vmem:[#allocation7 + $0x2f4] sm:$0xf0]  ;;  %v7601_v11 = vld [vmem:[#allocation7 + $0x5e8] sm:$0xf] }
 0x280   :  { %4491 = vmatpush.bf16.msra.mxu3 %v7058_v5  ;;  %v2647_v15 = vpop.f32.mrf.mxu2  ;;  %v7217_v5 = vld [vmem:[#allocation7 + $0x2e8] sm:$0xf] }
 0x282   :  { %4477 = vmatpush.bf16.msra.mxu2 %v6946_v24  ;;  %v985_v24 = vperm.slane %v9363_v0, 7  ;;  %v2662_v27 = vpop.f32.mrf.mxu3  ;;  %4453 = vmatpush.bf16.msra.mxu0 %v7678_v17  ;;  %v6850_v0 = vor.u32 %v8560_v26, %v6849_v31  ;;  %v7218_v17 = vor.u32 %v8652_v62, %v7217_v5  ;;  %v8744_v31 = vld [vmem:[#allocation7 + $0x5d4] sm:$0xf0]  ;;  %v7202_v26 = vor.u32 %v8648_v45, %v7201_v21  ;;  %v7153_v5 = vld [vmem:[#allocation7 + $0x268] sm:$0xf] }
 0x283   :  { %v8636_v62 = vld [vmem:[#allocation7 + $0x274] sm:$0xf0]  ;;  %v7771_v21 = vld [vmem:[#allocation7 + $0x750] sm:$0xf0]  ;;  %v7137_v45 = vld [vmem:[#allocation7 + $0x248] sm:$0xf] }
 0x284   :  { %4492 = vmatpush.bf16.msra.mxu3 %v7042_v18  ;;  %v2686_v63 = vpop.f32.mrf.mxu1  ;;  %v2648_v36 = vadd.f32 %v2647_v15, %v985_v24  ;;  %v8748_v15 = vld [vmem:[#allocation7 + $0x5f4] sm:$0xf0] }
 0x285   :  { %4406 = vmatmul.bf16.vlgmr.msrb.gmra.mxu0 %v9351_v34  ;;  %v7602_v27 = vor.u32 %v8748_v15, %v7601_v11  ;;  %v7377_v11 = vld [vmem:[#allocation7 + $0x428] sm:$0xf]  ;;  %v8732_v15 = vld [vmem:[#allocation7 + $0x574] sm:$0xf0] }
 0x286   :  { %4478 = vmatpush.bf16.msra.mxu2 %v6930_v39  ;;  %v8716_v39 = vld [vmem:[#allocation7 + $0x4f4] sm:$0xf0]  ;;  %4454 = vmatpush.bf16.msra.mxu0 %v7662_v29  ;;  %v2661_v47 = vadd.f32 %v2660_v2, %v2648_v36  ;;  %v7851_v2 = vld [vmem:[#allocation7 + $0x7f0] sm:$0xf0]  ;;  %v7425_v29 = vld [vmem:[#allocation7 + $0x488] sm:$0xf] }
 0x287   :  { %v7474_v40 = vor.u32 %v8716_v39, %v7473_v7  ;;  %v8644_v36 = vld [vmem:[#allocation7 + $0x2b4] sm:$0xf0]  ;;  %v2978_v7 = vld [vmem:[%s9523_s8] sm:$0xf]  ;;  %v7586_v39 = vor.u32 %v8744_v31, %v7585_v30  ;;  %v7521_v30 = vld [vmem:[#allocation7 + $0x548] sm:$0xf] }
 0x288   :  { %4493 = vmatpush.bf16.msra.mxu3 %v7026_v25  ;;  %v2649_v41 = vpop.f32.mrf.mxu2  ;;  %v8704_v25 = vld [vmem:[#allocation7 + $0x494] sm:$0xf0]  ;;  %v7186_v46 = vor.u32 %v8644_v36, %v7185_v35  ;;  %v2980_v16 = vperm.slane %v2978_v7, 0  ;;  %v7121_v7 = vld [vmem:[#allocation7 + $0x228] sm:$0xf] }
 0x289   :  { %v7426_v60 = vor.u32 %v8704_v25, %v7425_v29  ;;  %v7409_v41 = vld [vmem:[#allocation7 + $0x468] sm:$0xf]  ;;  %v8688_v25 = vld [vmem:[#allocation7 + $0x414] sm:$0xf0] }
 0x28a   :  { %4479 = vmatpush.bf16.msra.mxu2 %v6914_v50  ;;  %v2673_v49 = vpop.f32.mrf.mxu0  ;;  %4455 = vmatpush.bf16.msra.mxu0 %v7646_v32  ;;  %v8700_v32 = vld [vmem:[#allocation7 + $0x474] sm:$0xf0]  ;;  %v7361_v29 = vld [vmem:[#allocation7 + $0x408] sm:$0xf] }
 0x28b   :  { %v2674_v50 = vadd.f32 %v2673_v49, %v2661_v47  ;;  %v7410_v47 = vor.u32 %v8700_v32, %v7409_v41  ;;  %v8640_v49 = vld [vmem:[#allocation7 + $0x294] sm:$0xf0]  ;;  %v7362_v36 = vor.u32 %v8688_v25, %v7361_v29  ;;  %v8785_v32 = vld [vmem:[#allocation7 + $0x724] sm:$0xf]  ;;  %v8614_v29 = vld [vmem:[#allocation7 + $0x1cc] sm:$0xf] }
 0x28c   :  { %4494 = vmatpush.bf16.msra.mxu3 %v7010_v43  ;;  %v2688_v57 = vpop.f32.mrf.mxu1  ;;  %v8728_v31 = vld [vmem:[#allocation7 + $0x554] sm:$0xf0]  ;;  %v7075_v25 = vld [vmem:[#allocation7 + $0x1d8] sm:$0xf0] }
 0x28d   :  { %v2687_v3 = vadd.f32 %v2686_v63, %v2674_v50  ;;  %v8801_v63 = vld [vmem:[#allocation7 + $0x7a4] sm:$0xf]  ;;  %v8736_v57 = vld [vmem:[#allocation7 + $0x594] sm:$0xf0] }
 0x28e   :  { %4480 = vmatpush.bf16.msra.mxu2 %v6898_v42  ;;  %v8809_v42 = vld [vmem:[#allocation7 + $0x7e4] sm:$0xf]  ;;  %4456 = vmatpush.bf16.msra.mxu0 %v7630_v52  ;;  %v7803_v52 = vld [vmem:[#allocation7 + $0x790] sm:$0xf0]  ;;  %v7554_v9 = vor.u32 %v8736_v57, %v7553_v55 }
 0x28f   :  { %vm2697_vm14 = vcmp.gt.f32.partialorder %v2687_v3, 0.0  ;;  %v2705_v12 = vmul.f32 0.01, %v2687_v3  ;;  %v7854_v19 = vor.u32 %v8809_v42, %v7851_v2  ;;  %v7806_v42 = vor.u32 %v8797_v48, %v7803_v52  ;;  %v8793_v2 = vld [vmem:[#allocation7 + $0x764] sm:$0xf] }
 0x290   :  { %4495 = vmatpush.bf16.msra.mxu3 %v6994_v53  ;;  %v7393_v53 = vld [vmem:[#allocation7 + $0x448] sm:$0xf] }
 0x291   :  { %v2713_v18 = vsel %vm2697_vm14, %v2687_v3, %v2705_v12  ;;  %v7394_v3 = vor.u32 %v8696_v54, %v7393_v53  ;;  %v8692_v12 = vld [vmem:[#allocation7 + $0x434] sm:$0xf0]  ;;  %v7105_v52 = vld [vmem:[#allocation7 + $0x208] sm:$0xf] }
 0x292   :  { %4481 = vmatpush.bf16.msra.mxu2 %v6882_v14  ;;  %v6978_v14 = vor.u32 %v8592_v58, %v6977_v51  ;;  %v9381_v22 = vpack.c.bf16 %v2713_v18, %v2713_v18  ;;  %v2675_v24 = vpop.f32.mrf.mxu0  ;;  %4457 = vmatpush.bf16.msra.mxu0 %v7614_v13  ;;  %v7170_v51 = vor.u32 %v8640_v49, %v7169_v59  ;;  %v8781_v59 = vld [vmem:[#allocation7 + $0x704] sm:$0xf]  ;;  %v7739_v49 = vld [vmem:[#allocation7 + $0x710] sm:$0xf0]  ;;  %v8624_v53 = vld [vmem:[#allocation7 + $0x214] sm:$0xf0] }
 0x293   :  { %v7154_v18 = vor.u32 %v8636_v62, %v7153_v5  ;;  %v8632_v24 = vld [vmem:[#allocation7 + $0x254] sm:$0xf0]  ;;  %v7489_v54 = vld [vmem:[#allocation7 + $0x508] sm:$0xf]  ;;  %v8578_v62 = vld [vmem:[#allocation7 + $0xac] sm:$0xf] }
 0x294   :  { %4496 = vmatpush.bf16.msra.mxu3 %v6978_v14  ;;  %4367 = vmatmul.bf16.vlgmr.msra.gmra.mxu1 %v9381_v22  ;;  %v7537_v14 = vld [vmem:[#allocation7 + $0x568] sm:$0xf]  ;;  %v8684_v5 = vld [vmem:[#allocation7 + $0x3f4] sm:$0xf0] }
 0x295   :  { %4463 = vmatpush.bf16.msra.mxu1 %v7854_v19  ;;  %4458 = vmatmul.bf16.vlgmr.msra.gmra.mxu0 %v9374_v38  ;;  %v8789_v19 = vld [vmem:[#allocation7 + $0x744] sm:$0xf] }
 0x296   :  { %4482 = vmatpush.bf16.msra.mxu2 %v6866_v28  ;;  %v7835_v28 = vld [vmem:[#allocation7 + $0x7d0] sm:$0xf0]  ;;  %4502 = vmatpush.bf16.msrb.mxu0 %v7218_v17  ;;  %v7774_v35 = vor.u32 %v8789_v19, %v7771_v21  ;;  %v8776_v19 = vld [vmem:[#allocation7 + $0x6d4] sm:$0xf0] }
 0x297   :  { %v7838_v33 = vor.u32 %v8805_v20, %v7835_v28  ;;  %4497 = vmatmul.bf16.vlgmr.msra.gmra.mxu3 %v9330_v1  ;;  %v7378_v20 = vor.u32 %v8692_v12, %v7377_v11  ;;  %v7538_v28 = vor.u32 %v8732_v15, %v7537_v14  ;;  %v8618_v11 = vld [vmem:[#allocation7 + $0x1ec] sm:$0xf]  ;;  %v7091_v12 = vld [vmem:[#allocation7 + $0x1f8] sm:$0xf0] }
 0x298   :  { %4541 = vmatpush.bf16.msrb.mxu3 %v7602_v27  ;;  %v7094_v21 = vor.u32 %v8618_v11, %v7091_v12 }
 0x299   :  { %4464 = vmatpush.bf16.msra.mxu1 %v7838_v33 }
 0x29a   :  { %4483 = vmatpush.bf16.msra.mxu2 %v6850_v0  ;;  %v7819_v0 = vld [vmem:[#allocation7 + $0x7b0] sm:$0xf0]  ;;  %v4290_v43 = vpop.f32.mrf.mxu3  ;;  %4503 = vmatpush.bf16.msrb.mxu0 %v7202_v26  ;;  %v8586_v26 = vld [vmem:[#allocation7 + $0xec] sm:$0xf] }
 0x29b   :  { %v7822_v37 = vor.u32 %v8801_v63, %v7819_v0  ;;  %v6963_v63 = vld [vmem:[#allocation7 + $0xf8] sm:$0xf0]  ;;  %v7522_v0 = vor.u32 %v8728_v31, %v7521_v30 }
 0x29c   :  { %4542 = vmatpush.bf16.msrb.mxu3 %v7586_v39  ;;  %v8628_v39 = vld [vmem:[#allocation7 + $0x234] sm:$0xf0]  ;;  %v6966_v41 = vor.u32 %v8586_v26, %v6963_v63  ;;  %v7697_v26 = vld [vmem:[#allocation7 + $0x6a8] sm:$0xf] }
 0x29d   :  { %4484 = vmatmul.bf16.vlgmr.msra.gmra.mxu2 %v9339_v8  ;;  %4465 = vmatpush.bf16.msra.mxu1 %v7822_v37  ;;  %v6947_v37 = vld [vmem:[#allocation7 + $0xd8] sm:$0xf0]  ;;  %v7122_v48 = vor.u32 %v8628_v39, %v7121_v7  ;;  %v8772_v63 = vld [vmem:[#allocation7 + $0x6b4] sm:$0xf0]  ;;  %v8570_v7 = vld [vmem:[#allocation7 + $0x6c] sm:$0xf] }
 0x29e   :  { %4528 = vmatpush.bf16.msrb.mxu2 %v7474_v40  ;;  %v8740_v40 = vld [vmem:[#allocation7 + $0x5b4] sm:$0xf0]  ;;  %4504 = vmatpush.bf16.msrb.mxu0 %v7186_v46  ;;  %v6899_v39 = vld [vmem:[#allocation7 + $0x78] sm:$0xf0] }
 0x29f   :  { %v7570_v50 = vor.u32 %v8740_v40, %v7569_v44  ;;  %v7505_v44 = vld [vmem:[#allocation7 + $0x528] sm:$0xf]  ;;  %v8724_v46 = vld [vmem:[#allocation7 + $0x534] sm:$0xf0] }
 0x2a0   :  { %v7506_v57 = vor.u32 %v8724_v46, %v7505_v44  ;;  %v7681_v44 = vld [vmem:[#allocation7 + $0x688] sm:$0xf]  ;;  %v6902_v46 = vor.u32 %v8570_v7, %v6899_v39 }
 0x2a1   :  { %4543 = vmatpush.bf16.msrb.mxu3 %v7570_v50  ;;  %4466 = vmatpush.bf16.msra.mxu1 %v7806_v42  ;;  %v8780_v42 = vld [vmem:[#allocation7 + $0x6f4] sm:$0xf0] }
 0x2a2   :  { %4529 = vmatpush.bf16.msrb.mxu2 %v7458_v61  ;;  %v4277_v61 = vpop.f32.mrf.mxu2  ;;  %v4292_v13 = vpop.f32.mrf.mxu3  ;;  %4505 = vmatpush.bf16.msrb.mxu0 %v7170_v51  ;;  %v8720_v51 = vld [vmem:[#allocation7 + $0x514] sm:$0xf0] }
 0x2a3   :  { %v4278_v58 = vadd.f32 %v4277_v61, %v2980_v16  ;;  %v8582_v16 = vld [vmem:[#allocation7 + $0xcc] sm:$0xf]  ;;  %v7742_v13 = vor.u32 %v8781_v59, %v7739_v49  ;;  %v7490_v15 = vor.u32 %v8720_v51, %v7489_v54  ;;  %v6883_v59 = vld [vmem:[#allocation7 + $0x58] sm:$0xf0]  ;;  %v7665_v54 = vld [vmem:[#allocation7 + $0x668] sm:$0xf] }
 0x2a4   :  { %v4316_v27 = vpop.f32.mrf.mxu1  ;;  %4419 = vmatmul.bf16.vlgmr.msrb.gmra.mxu1 %v9347_v6  ;;  %v6950_v61 = vor.u32 %v8582_v16, %v6947_v37  ;;  %v7297_v37 = vld [vmem:[#allocation7 + $0x388] sm:$0xf]  ;;  %v8606_v49 = vld [vmem:[#allocation7 + $0x18c] sm:$0xf] }
 0x2a5   :  { %v4291_v17 = vadd.f32 %v4290_v43, %v4278_v58  ;;  %4544 = vmatpush.bf16.msrb.mxu3 %v7554_v9  ;;  %v7755_v43 = vld [vmem:[#allocation7 + $0x730] sm:$0xf0]  ;;  %v7729_v58 = vld [vmem:[#allocation7 + $0x6e8] sm:$0xf]  ;;  %v7106_v9 = vor.u32 %v8624_v53, %v7105_v52 }
 0x2a6   :  { %4530 = vmatpush.bf16.msrb.mxu2 %v7442_v56  ;;  %v7790_v56 = vor.u32 %v8793_v2, %v7787_v10  ;;  %4506 = vmatpush.bf16.msrb.mxu0 %v7154_v18  ;;  %v7758_v50 = vor.u32 %v8785_v32, %v7755_v43  ;;  %v7345_v2 = vld [vmem:[#allocation7 + $0x3e8] sm:$0xf]  ;;  %v6931_v10 = vld [vmem:[#allocation7 + $0xb8] sm:$0xf0]  ;;  %v7730_v14 = vor.u32 %v8780_v42, %v7729_v58  ;;  %v8668_v58 = vld [vmem:[#allocation7 + $0x374] sm:$0xf0] }
 0x2a7   :  { %v7713_v18 = vld [vmem:[#allocation7 + $0x6c8] sm:$0xf]  ;;  %v7698_v32 = vor.u32 %v8772_v63, %v7697_v26  ;;  %v8562_v42 = vld [vmem:[#allocation7 + $0x2c] sm:$0xf]  ;;  %v8660_v63 = vld [vmem:[#allocation7 + $0x334] sm:$0xf0] }
 0x2a8   :  { %4467 = vmatpush.bf16.msra.mxu1 %v7790_v56  ;;  %v7714_v30 = vor.u32 %v8776_v19, %v7713_v18  ;;  %v7281_v51 = vld [vmem:[#allocation7 + $0x368] sm:$0xf]  ;;  %v8664_v19 = vld [vmem:[#allocation7 + $0x354] sm:$0xf0] }
 0x2a9   :  { %4545 = vmatpush.bf16.msrb.mxu3 %v7538_v28  ;;  %v6915_v28 = vld [vmem:[#allocation7 + $0x98] sm:$0xf0]  ;;  %v7282_v12 = vor.u32 %v8668_v58, %v7281_v51  ;;  %v7265_v18 = vld [vmem:[#allocation7 + $0x348] sm:$0xf] }
 0x2aa   :  { %4531 = vmatpush.bf16.msrb.mxu2 %v7426_v60  ;;  %v4279_v33 = vpop.f32.mrf.mxu2  ;;  %v7138_v60 = vor.u32 %v8632_v24, %v7137_v45  ;;  %v4303_v40 = vpop.f32.mrf.mxu0  ;;  %v7329_v45 = vld [vmem:[#allocation7 + $0x3c8] sm:$0xf]  ;;  %v8680_v24 = vld [vmem:[#allocation7 + $0x3d4] sm:$0xf0] }
 0x2ab   :  { %v7330_v31 = vor.u32 %v8680_v24, %v7329_v45  ;;  %v7011_v45 = vld [vmem:[#allocation7 + $0x158] sm:$0xf0]  ;;  %v7249_v26 = vld [vmem:[#allocation7 + $0x328] sm:$0xf] }
 0x2ac   :  { %4507 = vmatpush.bf16.msrb.mxu0 %v7138_v60  ;;  %4468 = vmatpush.bf16.msra.mxu1 %v7774_v35  ;;  %v4318_v55 = vpop.f32.mrf.mxu1  ;;  %v7078_v60 = vor.u32 %v8614_v29, %v7075_v25  ;;  %v7313_v35 = vld [vmem:[#allocation7 + $0x3a8] sm:$0xf]  ;;  %v8756_v25 = vld [vmem:[#allocation7 + $0x634] sm:$0xf0] }
 0x2ad   :  { %4546 = vmatpush.bf16.msrb.mxu3 %v7522_v0  ;;  %v8610_v0 = vld [vmem:[#allocation7 + $0x1ac] sm:$0xf]  ;;  %v8764_v55 = vld [vmem:[#allocation7 + $0x674] sm:$0xf0]  ;;  %v7633_v29 = vld [vmem:[#allocation7 + $0x628] sm:$0xf] }
 0x2ae   :  { %4532 = vmatpush.bf16.msrb.mxu2 %v7410_v47  ;;  %v4304_v47 = vadd.f32 %v4303_v40, %v4291_v17  ;;  %v7346_v17 = vor.u32 %v8684_v5, %v7345_v2  ;;  %v8768_v40 = vld [vmem:[#allocation7 + $0x694] sm:$0xf0]  ;;  %v6867_v2 = vld [vmem:[#allocation7 + $0x38] sm:$0xf0]  ;;  %v8602_v5 = vld [vmem:[#allocation7 + $0x16c] sm:$0xf]  ;;  %v7634_v39 = vor.u32 %v8756_v25, %v7633_v29 }
 0x2af   :  { %v7682_v52 = vor.u32 %v8768_v40, %v7681_v44  ;;  %v7617_v44 = vld [vmem:[#allocation7 + $0x608] sm:$0xf]  ;;  %v8752_v40 = vld [vmem:[#allocation7 + $0x614] sm:$0xf0]  ;;  %v7571_v29 = vld [vmem:[#allocation7 + $0x5b8] sm:$0xf0] }
 0x2b0   :  { %4508 = vmatpush.bf16.msrb.mxu0 %v7122_v48  ;;  %4469 = vmatpush.bf16.msra.mxu1 %v7758_v50  ;;  %v8566_v48 = vld [vmem:[#allocation7 + $0x4c] sm:$0xf]  ;;  %v7043_v50 = vld [vmem:[#allocation7 + $0x198] sm:$0xf0] }
 0x2b1   :  { %4547 = vmatpush.bf16.msrb.mxu3 %v7506_v57  ;;  %v6886_v57 = vor.u32 %v8566_v48, %v6883_v59  ;;  %v7219_v48 = vld [vmem:[#allocation7 + $0x2f8] sm:$0xf0] }
 0x2b2   :  { %4533 = vmatpush.bf16.msrb.mxu2 %v7394_v3  ;;  %v9390_v3 = vadd.f32 %v4316_v27, %v4304_v47  ;;  %v4305_v56 = vpop.f32.mrf.mxu0  ;;  %v8574_v27 = vld [vmem:[#allocation7 + $0x8c] sm:$0xf]  ;;  %v8672_v47 = vld [vmem:[#allocation7 + $0x394] sm:$0xf0] }
 0x2b3   :  { %v6918_v33 = vor.u32 %v8574_v27, %v6915_v28  ;;  %v7298_v53 = vor.u32 %v8672_v47, %v7297_v37  ;;  %v8558_v56 = vld [vmem:[#allocation7 + $0xc] sm:$0xf]  ;;  %v7475_v28 = vld [vmem:[#allocation7 + $0x4f8] sm:$0xf0] }
 0x2b4   :  { %4509 = vmatpush.bf16.msrb.mxu0 %v7106_v9  ;;  %4470 = vmatpush.bf16.msra.mxu1 %v7742_v13  ;;  %v7649_v13 = vld [vmem:[#allocation7 + $0x648] sm:$0xf]  ;;  %v8714_v27 = vld [vmem:[#allocation7 + $0x4ec] sm:$0xf]  ;;  %v6979_v37 = vld [vmem:[#allocation7 + $0x118] sm:$0xf0] }
 0x2b5   :  { %4548 = vmatpush.bf16.msrb.mxu3 %v7490_v15  ;;  %v6870_v15 = vor.u32 %v8562_v42, %v6867_v2  ;;  %v8650_v47 = vld [vmem:[#allocation7 + $0x2ec] sm:$0xf] }
 0x2b6   :  { %4534 = vmatpush.bf16.msrb.mxu2 %v7378_v20  ;;  %v6934_v20 = vor.u32 %v8578_v62, %v6931_v10  ;;  %v7027_v62 = vld [vmem:[#allocation7 + $0x178] sm:$0xf0]  ;;  %v7666_v10 = vor.u32 %v8764_v55, %v7665_v54  ;;  %v8746_v55 = vld [vmem:[#allocation7 + $0x5ec] sm:$0xf]  ;;  %v7222_v51 = vor.u32 %v8650_v47, %v7219_v48 }
 0x2b7   :  { %4510 = vmatmul.bf16.vlgmr.msrb.gmra.mxu0 %v9351_v34  ;;  %4471 = vmatmul.bf16.vlgmr.msra.gmra.mxu1 %v9381_v22  ;;  %v7443_v54 = vld [vmem:[#allocation7 + $0x4b8] sm:$0xf0]  ;;  %v8646_v2 = vld [vmem:[#allocation7 + $0x2cc] sm:$0xf] }
 0x2b8   :  { %4554 = vmatpush.bf16.msra.mxu0 %v7730_v14  ;;  %4515 = vmatpush.bf16.msrb.mxu1 %v7346_v17  ;;  %v8760_v14 = vld [vmem:[#allocation7 + $0x654] sm:$0xf0]  ;;  %v7030_v17 = vor.u32 %v8602_v5, %v7027_v62  ;;  %v7203_v5 = vld [vmem:[#allocation7 + $0x2d8] sm:$0xf0]  ;;  %v8690_v47 = vld [vmem:[#allocation7 + $0x42c] sm:$0xf] }
 0x2b9   :  { %4593 = vmatpush.bf16.msra.mxu3 %v7094_v21  ;;  %v8598_v21 = vld [vmem:[#allocation7 + $0x14c] sm:$0xf]  ;;  %v7650_v24 = vor.u32 %v8760_v14, %v7649_v13  ;;  %v7427_v14 = vld [vmem:[#allocation7 + $0x498] sm:$0xf0] }
 0x2ba   :  { %4535 = vmatpush.bf16.msrb.mxu2 %v7362_v36  ;;  %v8676_v36 = vld [vmem:[#allocation7 + $0x3b4] sm:$0xf0]  ;;  %4549 = vmatmul.bf16.vlgmr.msrb.gmra.mxu3 %v9368_v4  ;;  %v8702_v13 = vld [vmem:[#allocation7 + $0x48c] sm:$0xf]  ;;  %v7379_v48 = vld [vmem:[#allocation7 + $0x438] sm:$0xf0] }
 0x2bb   :  { %v7314_v43 = vor.u32 %v8676_v36, %v7313_v35  ;;  %v6995_v35 = vld [vmem:[#allocation7 + $0x138] sm:$0xf0]  ;;  %v8710_v36 = vld [vmem:[#allocation7 + $0x4cc] sm:$0xf] }
 0x2bc   :  { %4555 = vmatpush.bf16.msra.mxu0 %v7714_v30  ;;  %4516 = vmatpush.bf16.msrb.mxu1 %v7330_v31  ;;  %v7014_v31 = vor.u32 %v8598_v21, %v7011_v45  ;;  %v7825_v45 = vld [vmem:[#allocation7 + $0x7a8] sm:$0xf] }
 0x2bd   :  { %4536 = vmatmul.bf16.vlgmr.msrb.gmra.mxu2 %v9355_v23  ;;  %4594 = vmatpush.bf16.msra.mxu3 %v7078_v60  ;;  %v8594_v60 = vld [vmem:[#allocation7 + $0x12c] sm:$0xf] }
 0x2be   :  { %4580 = vmatpush.bf16.msra.mxu2 %v6966_v41  ;;  %v7059_v41 = vld [vmem:[#allocation7 + $0x1b8] sm:$0xf0] }
 0x2bf   :  { %v7062_v16 = vor.u32 %v8610_v0, %v7059_v41  ;;  %v7459_v0 = vld [vmem:[#allocation7 + $0x4d8] sm:$0xf0]  ;;  %v7233_v41 = vld [vmem:[#allocation7 + $0x308] sm:$0xf] }
 0x2c0   :  { %4556 = vmatpush.bf16.msra.mxu0 %v7698_v32  ;;  %4517 = vmatpush.bf16.msrb.mxu1 %v7314_v43  ;;  %v4329_v9 = vpop.f32.mrf.mxu2  ;;  %v8656_v32 = vld [vmem:[#allocation7 + $0x314] sm:$0xf0]  ;;  %v7250_v43 = vor.u32 %v8660_v63, %v7249_v26  ;;  %v7462_v59 = vor.u32 %v8710_v36, %v7459_v0  ;;  %v7171_v26 = vld [vmem:[#allocation7 + $0x298] sm:$0xf0]  ;;  %v8694_v36 = vld [vmem:[#allocation7 + $0x44c] sm:$0xf] }
 0x2c1   :  { %4595 = vmatpush.bf16.msra.mxu3 %v7062_v16  ;;  %v9397_v11 = vadd.f32 %v4329_v9, %v9390_v3  ;;  %v7266_v3 = vor.u32 %v8664_v19, %v7265_v18  ;;  %v6998_v16 = vor.u32 %v8594_v60, %v6995_v35  ;;  %v8642_v19 = vld [vmem:[#allocation7 + $0x2ac] sm:$0xf]  ;;  %v7809_v60 = vld [vmem:[#allocation7 + $0x788] sm:$0xf]  ;;  %v8800_v35 = vld [vmem:[#allocation7 + $0x794] sm:$0xf0] }
 0x2c2   :  { %4581 = vmatpush.bf16.msra.mxu2 %v6950_v61  ;;  %v7046_v61 = vor.u32 %v8606_v49, %v7043_v50  ;;  %v7857_v49 = vld [vmem:[#allocation7 + $0x7e8] sm:$0xf]  ;;  %v8812_v50 = vld [vmem:[#allocation7 + $0x7f4] sm:$0xf0]  ;;  %v7555_v0 = vld [vmem:[#allocation7 + $0x598] sm:$0xf0] }
 0x2c3   :  { %v7858_v42 = vor.u32 %v8812_v50, %v7857_v49  ;;  %v7539_v49 = vld [vmem:[#allocation7 + $0x578] sm:$0xf0] }
 0x2c4   :  { %4557 = vmatpush.bf16.msra.mxu0 %v7682_v52  ;;  %4518 = vmatpush.bf16.msrb.mxu1 %v7298_v53  ;;  %v8706_v52 = vld [vmem:[#allocation7 + $0x4ac] sm:$0xf]  ;;  %v7618_v53 = vor.u32 %v8752_v40, %v7617_v44  ;;  %v7155_v44 = vld [vmem:[#allocation7 + $0x278] sm:$0xf0] }
 0x2c5   :  { %4596 = vmatpush.bf16.msra.mxu3 %v7046_v61  ;;  %v7234_v61 = vor.u32 %v8656_v32, %v7233_v41  ;;  %v7446_v62 = vor.u32 %v8706_v52, %v7443_v54  ;;  %v7810_v32 = vor.u32 %v8800_v35, %v7809_v60  ;;  %v8630_v54 = vld [vmem:[#allocation7 + $0x24c] sm:$0xf]  ;;  %v7731_v35 = vld [vmem:[#allocation7 + $0x6f8] sm:$0xf0] }
 0x2c6   :  { %4582 = vmatpush.bf16.msra.mxu2 %v6934_v20  ;;  %v6851_v20 = vld [vmem:[#allocation7 + $0x18] sm:$0xf0]  ;;  %v8778_v60 = vld [vmem:[#allocation7 + $0x6ec] sm:$0xf] }
 0x2c7   :  { %v6854_v30 = vor.u32 %v8558_v56, %v6851_v20  ;;  %v7187_v56 = vld [vmem:[#allocation7 + $0x2b8] sm:$0xf0]  ;;  %v7430_v20 = vor.u32 %v8702_v13, %v7427_v14  ;;  %v8828_v13 = vld [vmem:[#allocation8 + $0x74] sm:$0xf0] }
 0x2c8   :  { %4558 = vmatpush.bf16.msra.mxu0 %v7666_v10  ;;  %4519 = vmatpush.bf16.msrb.mxu1 %v7282_v12  ;;  %v4331_v7 = vpop.f32.mrf.mxu2  ;;  %v7841_v10 = vld [vmem:[#allocation7 + $0x7c8] sm:$0xf]  ;;  %v8808_v12 = vld [vmem:[#allocation7 + $0x7d4] sm:$0xf0]  ;;  %v7190_v25 = vor.u32 %v8642_v19, %v7187_v56 }
 0x2c9   :  { %4597 = vmatpush.bf16.msra.mxu3 %v7030_v17  ;;  %v7587_v17 = vld [vmem:[#allocation7 + $0x5d8] sm:$0xf0]  ;;  %v7842_v18 = vor.u32 %v8808_v12, %v7841_v10  ;;  %v7921_v12 = vld [vmem:[#allocation8 + $0x70] sm:$0xf]  ;;  %v7761_v19 = vld [vmem:[#allocation7 + $0x728] sm:$0xf] }
 0x2ca   :  { %4583 = vmatpush.bf16.msra.mxu2 %v6918_v33  ;;  %v7478_v33 = vor.u32 %v8714_v27, %v7475_v28  ;;  %v8698_v27 = vld [vmem:[#allocation7 + $0x46c] sm:$0xf]  ;;  %v7411_v28 = vld [vmem:[#allocation7 + $0x478] sm:$0xf0]  ;;  %v8788_v56 = vld [vmem:[#allocation7 + $0x734] sm:$0xf0] }
 0x2cb   :  { %v7414_v63 = vor.u32 %v8698_v27, %v7411_v28  ;;  %v7395_v7 = vld [vmem:[#allocation7 + $0x458] sm:$0xf0]  ;;  %v7745_v27 = vld [vmem:[#allocation7 + $0x708] sm:$0xf]  ;;  %v7913_v28 = vld [vmem:[#allocation8 + $0x60] sm:$0xf] }
 0x2cc   :  { %4559 = vmatpush.bf16.msra.mxu0 %v7650_v24  ;;  %4520 = vmatpush.bf16.msrb.mxu1 %v7266_v3  ;;  %v8804_v24 = vld [vmem:[#allocation7 + $0x7b4] sm:$0xf0]  ;;  %v8738_v3 = vld [vmem:[#allocation7 + $0x5ac] sm:$0xf]  ;;  %v7398_v40 = vor.u32 %v8694_v36, %v7395_v7  ;;  %v7491_v36 = vld [vmem:[#allocation7 + $0x518] sm:$0xf0] }
 0x2cd   :  { %4598 = vmatpush.bf16.msra.mxu3 %v7014_v31  ;;  %v8638_v31 = vld [vmem:[#allocation7 + $0x28c] sm:$0xf] }
 0x2ce   :  { %4584 = vmatpush.bf16.msra.mxu2 %v6902_v46  ;;  %v8590_v46 = vld [vmem:[#allocation7 + $0x10c] sm:$0xf] }
 0x2cf   :  { %v6982_v58 = vor.u32 %v8590_v46, %v6979_v37  ;;  %v8796_v37 = vld [vmem:[#allocation7 + $0x774] sm:$0xf0]  ;;  %v8682_v7 = vld [vmem:[#allocation7 + $0x3ec] sm:$0xf] }
 0x2d0   :  { %4560 = vmatpush.bf16.msra.mxu0 %v7634_v39  ;;  %4521 = vmatpush.bf16.msrb.mxu1 %v7250_v43  ;;  %v8734_v39 = vld [vmem:[#allocation7 + $0x58c] sm:$0xf] }
 0x2d1   :  { %4599 = vmatpush.bf16.msra.mxu3 %v6998_v16  ;;  %v8634_v43 = vld [vmem:[#allocation7 + $0x26c] sm:$0xf]  ;;  %v7558_v46 = vor.u32 %v8734_v39, %v7555_v0  ;;  %v7793_v16 = vld [vmem:[#allocation7 + $0x768] sm:$0xf]  ;;  %v7347_v39 = vld [vmem:[#allocation7 + $0x3f8] sm:$0xf0] }
 0x2d2   :  { %4585 = vmatpush.bf16.msra.mxu2 %v6886_v57  ;;  %v7603_v57 = vld [vmem:[#allocation7 + $0x5f8] sm:$0xf0]  ;;  %v7158_v50 = vor.u32 %v8634_v43, %v7155_v44  ;;  %v8824_v43 = vld [vmem:[#allocation8 + $0x54] sm:$0xf0] }
 0x2d3   :  { %v7606_v9 = vor.u32 %v8746_v55, %v7603_v57  ;;  %v7139_v55 = vld [vmem:[#allocation7 + $0x258] sm:$0xf0]  ;;  %v7382_v57 = vor.u32 %v8690_v47, %v7379_v48  ;;  %v8678_v48 = vld [vmem:[#allocation7 + $0x3cc] sm:$0xf] }
 0x2d4   :  { %4561 = vmatpush.bf16.msra.mxu0 %v7618_v53  ;;  %4522 = vmatpush.bf16.msrb.mxu1 %v7234_v61  ;;  %v7794_v53 = vor.u32 %v8796_v37, %v7793_v16  ;;  %v7142_v10 = vor.u32 %v8630_v54, %v7139_v55  ;;  %v7350_v16 = vor.u32 %v8682_v7, %v7347_v39  ;;  %v8774_v37 = vld [vmem:[#allocation7 + $0x6cc] sm:$0xf]  ;;  %v7715_v47 = vld [vmem:[#allocation7 + $0x6d8] sm:$0xf0] }
 0x2d5   :  { %4600 = vmatpush.bf16.msra.mxu3 %v6982_v58  ;;  %v8792_v58 = vld [vmem:[#allocation7 + $0x754] sm:$0xf0]  ;;  %v8770_v55 = vld [vmem:[#allocation7 + $0x6ac] sm:$0xf] }
 0x2d6   :  { %4586 = vmatpush.bf16.msra.mxu2 %v6870_v15  ;;  %v8742_v15 = vld [vmem:[#allocation7 + $0x5cc] sm:$0xf] }
 0x2d7   :  { %v7590_v21 = vor.u32 %v8742_v15, %v7587_v17  ;;  %4523 = vmatmul.bf16.vlgmr.msrb.gmra.mxu1 %v9347_v6  ;;  %4562 = vmatmul.bf16.vlgmr.msra.gmra.mxu0 %v9374_v38  ;;  %v8626_v15 = vld [vmem:[#allocation7 + $0x22c] sm:$0xf]  ;;  %v7123_v17 = vld [vmem:[#allocation7 + $0x238] sm:$0xf0] }
 0x2d8   :  { %4606 = vmatpush.bf16.msrb.mxu0 %v7222_v51  ;;  %4567 = vmatpush.bf16.msra.mxu1 %v7858_v42  ;;  %v9405_v52 = vpop.f32.mrf.mxu3  ;;  %v7777_v51 = vld [vmem:[#allocation7 + $0x748] sm:$0xf]  ;;  %v8686_v42 = vld [vmem:[#allocation7 + $0x40c] sm:$0xf] }
 0x2d9   :  { %4645 = vmatpush.bf16.msrb.mxu3 %v7606_v9  ;;  %v7778_v14 = vor.u32 %v8792_v58, %v7777_v51  ;;  %v7985_v51 = vld [vmem:[#allocation8 + $0xf0] sm:$0xf]  ;;  %v8844_v58 = vld [vmem:[#allocation8 + $0xf4] sm:$0xf0]  ;;  %v8758_v7 = vld [vmem:[#allocation7 + $0x64c] sm:$0xf] }
 0x2da   :  { %4587 = vmatpush.bf16.msra.mxu2 %v6854_v30  ;;  %4601 = vmatmul.bf16.vlgmr.msra.gmra.mxu3 %v9330_v1  ;;  %v7826_v30 = vor.u32 %v8804_v24, %v7825_v45  ;;  %v7174_v1 = vor.u32 %v8638_v31, %v7171_v26  ;;  %v7922_v45 = vor.u32 %v8828_v13, %v7921_v12  ;;  %v8622_v31 = vld [vmem:[#allocation7 + $0x20c] sm:$0xf]  ;;  %v7107_v26 = vld [vmem:[#allocation7 + $0x218] sm:$0xf0] }
 0x2db   :  { %v7126_v24 = vor.u32 %v8626_v15, %v7123_v17  ;;  %v8766_v13 = vld [vmem:[#allocation7 + $0x68c] sm:$0xf]  ;;  %v7683_v15 = vld [vmem:[#allocation7 + $0x698] sm:$0xf0]  ;;  %v7977_v17 = vld [vmem:[#allocation8 + $0xe0] sm:$0xf] }
 0x2dc   :  { %4568 = vmatpush.bf16.msra.mxu1 %v7842_v18 }
 0x2dd   :  { %4588 = vmatmul.bf16.vlgmr.msra.gmra.mxu2 %v9339_v8  ;;  %v7206_v8 = vor.u32 %v8646_v2, %v7203_v5  ;;  %4646 = vmatpush.bf16.msrb.mxu3 %v7590_v21  ;;  %v7363_v2 = vld [vmem:[#allocation7 + $0x418] sm:$0xf0]  ;;  %v8726_v5 = vld [vmem:[#allocation7 + $0x54c] sm:$0xf] }
 0x2de   :  { %4632 = vmatpush.bf16.msrb.mxu2 %v7478_v33  ;;  %v7574_v33 = vor.u32 %v8738_v3, %v7571_v29  ;;  %v7507_v21 = vld [vmem:[#allocation7 + $0x538] sm:$0xf0]  ;;  %v8826_v3 = vld [vmem:[#allocation8 + $0x64] sm:$0xf0] }
 0x2df   :  { %4607 = vmatpush.bf16.msrb.mxu0 %v7206_v8  ;;  %v7366_v8 = vor.u32 %v8686_v42, %v7363_v2  ;;  %v7914_v0 = vor.u32 %v8826_v3, %v7913_v28  ;;  %v8674_v42 = vld [vmem:[#allocation7 + $0x3ac] sm:$0xf]  ;;  %v7315_v2 = vld [vmem:[#allocation7 + $0x3b8] sm:$0xf0] }
 0x2e0   :  { %v9403_v41 = vpop.f32.mrf.mxu2  ;;  %4569 = vmatpush.bf16.msra.mxu1 %v7826_v30  ;;  %v4344_v29 = vpop.f32.mrf.mxu3  ;;  %v8784_v30 = vld [vmem:[#allocation7 + $0x714] sm:$0xf0] }
 0x2e1   :  { %4647 = vmatpush.bf16.msrb.mxu3 %v7574_v33  ;;  %v8718_v33 = vld [vmem:[#allocation7 + $0x50c] sm:$0xf]  ;;  %v7746_v44 = vor.u32 %v8784_v30, %v7745_v27  ;;  %v7667_v29 = vld [vmem:[#allocation7 + $0x678] sm:$0xf0]  ;;  %v8840_v30 = vld [vmem:[#allocation8 + $0xd4] sm:$0xf0] }
 0x2e2   :  { %4633 = vmatpush.bf16.msrb.mxu2 %v7462_v59  ;;  %v8730_v59 = vld [vmem:[#allocation7 + $0x56c] sm:$0xf] }
 0x2e3   :  { %4608 = vmatpush.bf16.msrb.mxu0 %v7190_v25  ;;  %v7542_v61 = vor.u32 %v8730_v59, %v7539_v49  ;;  %v7762_v25 = vor.u32 %v8788_v56, %v7761_v19  ;;  %v7331_v59 = vld [vmem:[#allocation7 + $0x3d8] sm:$0xf0]  ;;  %v8762_v27 = vld [vmem:[#allocation7 + $0x66c] sm:$0xf] }
 0x2e4   :  { %4570 = vmatpush.bf16.msra.mxu1 %v7810_v32  ;;  %v7905_v32 = vld [vmem:[#allocation8 + $0x50] sm:$0xf] }
 0x2e5   :  { %4648 = vmatpush.bf16.msrb.mxu3 %v7558_v46  ;;  %v7494_v46 = vor.u32 %v8718_v33, %v7491_v36  ;;  %v7906_v49 = vor.u32 %v8824_v43, %v7905_v32  ;;  %v7670_v36 = vor.u32 %v8762_v27, %v7667_v29  ;;  %v8838_v32 = vld [vmem:[#allocation8 + $0xc4] sm:$0xf0]  ;;  %v8662_v43 = vld [vmem:[#allocation7 + $0x34c] sm:$0xf] }
 0x2e6   :  { %4634 = vmatpush.bf16.msrb.mxu2 %v7446_v62  ;;  %v7523_v62 = vld [vmem:[#allocation7 + $0x558] sm:$0xf0] }
 0x2e7   :  { %4609 = vmatpush.bf16.msrb.mxu0 %v7174_v1  ;;  %v7526_v18 = vor.u32 %v8726_v5, %v7523_v62  ;;  %v7110_v1 = vor.u32 %v8622_v31, %v7107_v26  ;;  %v7986_v62 = vor.u32 %v8844_v58, %v7985_v51  ;;  %v8666_v31 = vld [vmem:[#allocation7 + $0x36c] sm:$0xf]  ;;  %v7283_v26 = vld [vmem:[#allocation7 + $0x378] sm:$0xf0]  ;;  %v8836_v51 = vld [vmem:[#allocation8 + $0xb4] sm:$0xf0] }
 0x2e8   :  { %v4383_v9 = vpop.f32.mrf.mxu2  ;;  %4571 = vmatpush.bf16.msra.mxu1 %v7794_v53  ;;  %v8822_v53 = vld [vmem:[#allocation8 + $0x44] sm:$0xf0]  ;;  %v9408_v54 = vpop.f32.mrf.mxu3  ;;  %v7286_v39 = vor.u32 %v8666_v31, %v7283_v26  ;;  %v8658_v58 = vld [vmem:[#allocation7 + $0x32c] sm:$0xf]  ;;  %v8832_v31 = vld [vmem:[#allocation8 + $0x94] sm:$0xf0] }
 0x2e9   :  { %4649 = vmatpush.bf16.msrb.mxu3 %v7542_v61  ;;  %v7699_v61 = vld [vmem:[#allocation7 + $0x6b8] sm:$0xf0]  ;;  %v7889_v9 = vld [vmem:[#allocation8 + $0x30] sm:$0xf] }
 0x2ea   :  { %4635 = vmatpush.bf16.msrb.mxu2 %v7430_v20  ;;  %v8722_v20 = vld [vmem:[#allocation7 + $0x52c] sm:$0xf]  ;;  %v7702_v12 = vor.u32 %v8770_v55, %v7699_v61  ;;  %v7953_v61 = vld [vmem:[#allocation8 + $0xb0] sm:$0xf] }
 0x2eb   :  { %4610 = vmatpush.bf16.msrb.mxu0 %v7158_v50  ;;  %v7897_v50 = vld [vmem:[#allocation8 + $0x40] sm:$0xf] }
 0x2ec   :  { %4572 = vmatpush.bf16.msra.mxu1 %v7778_v14  ;;  %v7898_v5 = vor.u32 %v8822_v53, %v7897_v50  ;;  %v7318_v14 = vor.u32 %v8674_v42, %v7315_v2  ;;  %v8827_v50 = vld [vmem:[#allocation8 + $0x74] sm:$0xf]  ;;  %v7923_v53 = vld [vmem:[#allocation8 + $0x78] sm:$0xf0] }
 0x2ed   :  { %4650 = vmatpush.bf16.msrb.mxu3 %v7526_v18  ;;  %v7299_v18 = vld [vmem:[#allocation7 + $0x398] sm:$0xf0] }
 0x2ee   :  { %4636 = vmatpush.bf16.msrb.mxu2 %v7414_v63  ;;  %v7510_v63 = vor.u32 %v8722_v20, %v7507_v21  ;;  %v7881_v20 = vld [vmem:[#allocation8 + $0x20] sm:$0xf]  ;;  %v8818_v21 = vld [vmem:[#allocation8 + $0x24] sm:$0xf0]  ;;  %v7251_v42 = vld [vmem:[#allocation7 + $0x338] sm:$0xf0] }
 0x2ef   :  { %4611 = vmatpush.bf16.msrb.mxu0 %v7142_v10  ;;  %v8820_v10 = vld [vmem:[#allocation8 + $0x34] sm:$0xf0] }
 0x2f0   :  { %4573 = vmatpush.bf16.msra.mxu1 %v7762_v25  ;;  %v7890_v19 = vor.u32 %v8820_v10, %v7889_v9  ;;  %v4396_v28 = vpop.f32.mrf.mxu3  ;;  %v7969_v25 = vld [vmem:[#allocation8 + $0xd0] sm:$0xf]  ;;  %v8750_v10 = vld [vmem:[#allocation7 + $0x60c] sm:$0xf] }
 0x2f1   :  { %4651 = vmatpush.bf16.msrb.mxu3 %v7510_v63  ;;  %v7882_v63 = vor.u32 %v8818_v21, %v7881_v20  ;;  %v7970_v33 = vor.u32 %v8840_v30, %v7969_v25  ;;  %v7859_v20 = vld [vmem:[#allocation7 + $0x7f8] sm:$0xf0]  ;;  %v8823_v28 = vld [vmem:[#allocation8 + $0x54] sm:$0xf]  ;;  %v7937_v30 = vld [vmem:[#allocation8 + $0x90] sm:$0xf] }
 0x2f2   :  { %4637 = vmatpush.bf16.msrb.mxu2 %v7398_v40  ;;  %v7734_v40 = vor.u32 %v8778_v60, %v7731_v35  ;;  %v7873_v60 = vld [vmem:[#allocation8 + $0x10] sm:$0xf]  ;;  %v8816_v35 = vld [vmem:[#allocation8 + $0x14] sm:$0xf0] }
 0x2f3   :  { %4612 = vmatpush.bf16.msrb.mxu0 %v7126_v24  ;;  %v7686_v24 = vor.u32 %v8766_v13, %v7683_v15  ;;  %v7915_v13 = vld [vmem:[#allocation8 + $0x68] sm:$0xf0]  ;;  %v7619_v15 = vld [vmem:[#allocation7 + $0x618] sm:$0xf0] }
 0x2f4   :  { %4574 = vmatpush.bf16.msra.mxu1 %v7746_v44  ;;  %v7267_v44 = vld [vmem:[#allocation7 + $0x358] sm:$0xf0]  ;;  %v7622_v27 = vor.u32 %v8750_v10, %v7619_v15 }
 0x2f5   :  { %4652 = vmatpush.bf16.msrb.mxu3 %v7494_v46  ;;  %v7270_v55 = vor.u32 %v8662_v43, %v7267_v44  ;;  %v8843_v43 = vld [vmem:[#allocation8 + $0xf4] sm:$0xf]  ;;  %v7987_v44 = vld [vmem:[#allocation8 + $0xf8] sm:$0xf0] }
 0x2f6   :  { %4638 = vmatpush.bf16.msrb.mxu2 %v7382_v57  ;;  %v7334_v57 = vor.u32 %v8678_v48, %v7331_v59  ;;  %v7971_v10 = vld [vmem:[#allocation8 + $0xd8] sm:$0xf0] }
 0x2f7   :  { %4613 = vmatpush.bf16.msrb.mxu0 %v7110_v1  ;;  %4575 = vmatmul.bf16.vlgmr.msra.gmra.mxu1 %v9381_v22  ;;  %v7961_v1 = vld [vmem:[#allocation8 + $0xc0] sm:$0xf] }
 0x2f8   :  { %4619 = vmatpush.bf16.msrb.mxu1 %v7350_v16  ;;  %4653 = vmatmul.bf16.vlgmr.msrb.gmra.mxu3 %v9368_v4  ;;  %v7962_v46 = vor.u32 %v8838_v32, %v7961_v1  ;;  %v7865_v16 = vld [vmem:[#allocation8] sm:$0xf] }
 0x2f9   :  { %5103 = vmatpush.bf16.msra.mxu3 %v7986_v62  ;;  %v7926_v62 = vor.u32 %v8827_v50, %v7923_v53  ;;  %v8841_v50 = vld [vmem:[#allocation8 + $0xe4] sm:$0xf]  ;;  %v7979_v53 = vld [vmem:[#allocation8 + $0xe8] sm:$0xf0] }
 0x2fa   :  { %4639 = vmatpush.bf16.msrb.mxu2 %v7366_v8  ;;  %4614 = vmatmul.bf16.vlgmr.msrb.gmra.mxu0 %v9351_v34  ;;  %v8842_v34 = vld [vmem:[#allocation8 + $0xe4] sm:$0xf0]  ;;  %v8670_v8 = vld [vmem:[#allocation7 + $0x38c] sm:$0xf] }
 0x2fb   :  { %4658 = vmatpush.bf16.msra.mxu0 %v7734_v40  ;;  %v7978_v56 = vor.u32 %v8842_v34, %v7977_v17  ;;  %v7302_v3 = vor.u32 %v8670_v8, %v7299_v18  ;;  %v7874_v40 = vor.u32 %v8816_v35, %v7873_v60  ;;  %v7945_v17 = vld [vmem:[#allocation8 + $0xa0] sm:$0xf]  ;;  %v8834_v34 = vld [vmem:[#allocation8 + $0xa4] sm:$0xf0]  ;;  %v8654_v8 = vld [vmem:[#allocation7 + $0x30c] sm:$0xf] }
 0x2fc   :  { %4620 = vmatpush.bf16.msrb.mxu1 %v7334_v57  ;;  %v7635_v57 = vld [vmem:[#allocation7 + $0x638] sm:$0xf0] }
 0x2fd   :  { %4640 = vmatmul.bf16.vlgmr.msrb.gmra.mxu2 %v9355_v23  ;;  %v7718_v23 = vor.u32 %v8774_v37, %v7715_v47  ;;  %5104 = vmatpush.bf16.msra.mxu3 %v7978_v56  ;;  %v8814_v37 = vld [vmem:[#allocation8 + $0x4] sm:$0xf0]  ;;  %v7235_v18 = vld [vmem:[#allocation7 + $0x318] sm:$0xf0]  ;;  %v8810_v56 = vld [vmem:[#allocation7 + $0x7ec] sm:$0xf] }
 0x2fe   :  { %5090 = vmatpush.bf16.msra.mxu2 %v7922_v45  ;;  %v9413_v45 = vpop.f32.mrf.mxu0  ;;  %v7866_v2 = vor.u32 %v8814_v37, %v7865_v16  ;;  %v7238_v25 = vor.u32 %v8654_v8, %v7235_v18  ;;  %v7862_v26 = vor.u32 %v8810_v56, %v7859_v20  ;;  %v7843_v60 = vld [vmem:[#allocation7 + $0x7d8] sm:$0xf0]  ;;  %v7990_v37 = vor.u32 %v8843_v43, %v7987_v44  ;;  %v8837_v56 = vld [vmem:[#allocation8 + $0xc4] sm:$0xf]  ;;  %v7963_v20 = vld [vmem:[#allocation8 + $0xc8] sm:$0xf0] }
 0x2ff   :  { %4659 = vmatpush.bf16.msra.mxu0 %v7718_v23  ;;  %v9417_v23 = vpop.f32.mrf.mxu3 }
 0x300   :  { %v9415_v4 = vpop.f32.mrf.mxu2  ;;  %4621 = vmatpush.bf16.msrb.mxu1 %v7318_v14  ;;  %v7254_v14 = vor.u32 %v8658_v58, %v7251_v42  ;;  %v8817_v58 = vld [vmem:[#allocation8 + $0x24] sm:$0xf]  ;;  %v7883_v42 = vld [vmem:[#allocation8 + $0x28] sm:$0xf0] }
 0x301   :  { %5105 = vmatpush.bf16.msra.mxu3 %v7970_v33  ;;  %v8806_v33 = vld [vmem:[#allocation7 + $0x7cc] sm:$0xf] }
 0x302   :  { %5091 = vmatpush.bf16.msra.mxu2 %v7914_v0  ;;  %v7651_v0 = vld [vmem:[#allocation7 + $0x658] sm:$0xf0]  ;;  %v7846_v1 = vor.u32 %v8806_v33, %v7843_v60 }
 0x303   :  { %4660 = vmatpush.bf16.msra.mxu0 %v7702_v12  ;;  %v7654_v59 = vor.u32 %v8758_v7, %v7651_v0  ;;  %v8825_v12 = vld [vmem:[#allocation8 + $0x64] sm:$0xf]  ;;  %v7899_v7 = vld [vmem:[#allocation8 + $0x48] sm:$0xf0]  ;;  %v8830_v0 = vld [vmem:[#allocation8 + $0x84] sm:$0xf0] }
 0x304   :  { %4622 = vmatpush.bf16.msrb.mxu1 %v7302_v3  ;;  %v7918_v21 = vor.u32 %v8825_v12, %v7915_v13  ;;  %v7907_v3 = vld [vmem:[#allocation8 + $0x58] sm:$0xf0]  ;;  %v8794_v13 = vld [vmem:[#allocation7 + $0x76c] sm:$0xf] }
 0x305   :  { %5106 = vmatpush.bf16.msra.mxu3 %v7962_v46  ;;  %v7910_v35 = vor.u32 %v8823_v28, %v7907_v3  ;;  %v7827_v46 = vld [vmem:[#allocation7 + $0x7b8] sm:$0xf0] }
 0x306   :  { %5092 = vmatpush.bf16.msra.mxu2 %v7906_v49  ;;  %v4357_v47 = vpop.f32.mrf.mxu0  ;;  %v8754_v49 = vld [vmem:[#allocation7 + $0x62c] sm:$0xf]  ;;  %v7779_v28 = vld [vmem:[#allocation7 + $0x758] sm:$0xf0] }
 0x307   :  { %4661 = vmatpush.bf16.msra.mxu0 %v7686_v24  ;;  %v7638_v9 = vor.u32 %v8754_v49, %v7635_v57  ;;  %v4448_v29 = vpop.f32.mrf.mxu3  ;;  %v7811_v57 = vld [vmem:[#allocation7 + $0x798] sm:$0xf0] }
 0x308   :  { %v4435_v48 = vpop.f32.mrf.mxu2  ;;  %4623 = vmatpush.bf16.msrb.mxu1 %v7286_v39  ;;  %v7929_v39 = vld [vmem:[#allocation8 + $0x80] sm:$0xf]  ;;  %v7966_v29 = vor.u32 %v8837_v56, %v7963_v20 }
 0x309   :  { %v7930_v32 = vor.u32 %v8830_v0, %v7929_v39  ;;  %v8819_v48 = vld [vmem:[#allocation8 + $0x34] sm:$0xf]  ;;  %v8786_v0 = vld [vmem:[#allocation7 + $0x72c] sm:$0xf] }
 0x30a   :  { %5093 = vmatpush.bf16.msra.mxu2 %v7898_v5  ;;  %v7954_v5 = vor.u32 %v8836_v51, %v7953_v61  ;;  %v7982_v51 = vor.u32 %v8841_v50, %v7979_v53  ;;  %v8831_v53 = vld [vmem:[#allocation8 + $0x94] sm:$0xf] }
 0x30b   :  { %4662 = vmatpush.bf16.msra.mxu0 %v7670_v36  ;;  %v8821_v36 = vld [vmem:[#allocation8 + $0x44] sm:$0xf] }
 0x30c   :  { %4624 = vmatpush.bf16.msrb.mxu1 %v7270_v55  ;;  %5107 = vmatpush.bf16.msra.mxu3 %v7954_v5  ;;  %v7902_v16 = vor.u32 %v8821_v36, %v7899_v7  ;;  %v4343_v55 = vadd.f32 %v9405_v52, %v9397_v11  ;;  %v7886_v11 = vor.u32 %v8817_v58, %v7883_v42  ;;  %v7955_v36 = vld [vmem:[#allocation8 + $0xb8] sm:$0xf0] }
 0x30e   :  { %5094 = vmatpush.bf16.msra.mxu2 %v7890_v19  ;;  %v7946_v19 = vor.u32 %v8834_v34, %v7945_v17  ;;  %v9419_v24 = vpop.f32.mrf.mxu0  ;;  %v8815_v17 = vld [vmem:[#allocation8 + $0x14] sm:$0xf]  ;;  %v7875_v34 = vld [vmem:[#allocation8 + $0x18] sm:$0xf0] }
 0x30f   :  { %4663 = vmatpush.bf16.msra.mxu0 %v7654_v59  ;;  %v7891_v59 = vld [vmem:[#allocation8 + $0x38] sm:$0xf0]  ;;  %v7878_v3 = vor.u32 %v8815_v17, %v7875_v34 }
 0x310   :  { %4625 = vmatpush.bf16.msrb.mxu1 %v7254_v14  ;;  %5108 = vmatpush.bf16.msra.mxu3 %v7946_v19  ;;  %v7894_v61 = vor.u32 %v8819_v48, %v7891_v59  ;;  %v7795_v14 = vld [vmem:[#allocation7 + $0x778] sm:$0xf0]  ;;  %v8782_v48 = vld [vmem:[#allocation7 + $0x70c] sm:$0xf] }
 0x311   :  { %v4368_v5 = vpop.f32.mrf.mxu1  ;;  %v7798_v19 = vor.u32 %v8794_v13, %v7795_v14  ;;  %v7747_v59 = vld [vmem:[#allocation7 + $0x718] sm:$0xf0]  ;;  %v8858_v13 = vld [vmem:[#allocation8 + $0x164] sm:$0xf0] }
 0x312   :  { %5095 = vmatpush.bf16.msra.mxu2 %v7882_v63  ;;  %v7938_v63 = vor.u32 %v8832_v31, %v7937_v30  ;;  %v8813_v30 = vld [vmem:[#allocation8 + $0x4] sm:$0xf]  ;;  %v7867_v31 = vld [vmem:[#allocation8 + $0x8] sm:$0xf0] }
 0x313   :  { %4664 = vmatpush.bf16.msra.mxu0 %v7638_v9  ;;  %v8839_v9 = vld [vmem:[#allocation8 + $0xd4] sm:$0xf] }
 0x314   :  { %4626 = vmatpush.bf16.msrb.mxu1 %v7238_v25  ;;  %5109 = vmatpush.bf16.msra.mxu3 %v7938_v63  ;;  %v7974_v52 = vor.u32 %v8839_v9, %v7971_v10 }
 0x316   :  { %5096 = vmatpush.bf16.msra.mxu2 %v7874_v40  ;;  %v8802_v40 = vld [vmem:[#allocation7 + $0x7ac] sm:$0xf]  ;;  %v4409_v47 = vpop.f32.mrf.mxu0 }
 0x317   :  { %4665 = vmatpush.bf16.msra.mxu0 %v7622_v27  ;;  %4627 = vmatmul.bf16.vlgmr.msrb.gmra.mxu1 %v9347_v6  ;;  %v7830_v49 = vor.u32 %v8802_v40, %v7827_v46  ;;  %v4356_v6 = vadd.f32 %v9413_v45, %v4343_v55  ;;  %v9431_v45 = vld [vmem:[%s9523_s8] sm:$0xf]  ;;  %v8790_v27 = vld [vmem:[#allocation7 + $0x74c] sm:$0xf]  ;;  %v7939_v55 = vld [vmem:[#allocation8 + $0x98] sm:$0xf0] }
 0x318   :  { %4671 = vmatpush.bf16.msra.mxu1 %v7862_v26  ;;  %5110 = vmatpush.bf16.msra.mxu3 %v7930_v32  ;;  %v2982_v18 = vperm.slane %v9431_v45, 2  ;;  %v7782_v60 = vor.u32 %v8790_v27, %v7779_v28  ;;  %v2981_v7 = vperm.slane %v9431_v45, 1  ;;  %v7870_v32 = vor.u32 %v8813_v30, %v7867_v31  ;;  %v8852_v27 = vld [vmem:[#allocation8 + $0x134] sm:$0xf0] }
 0x319   :  { %v4369_v12 = vadd.f32 %v4368_v5, %v4356_v6  ;;  %v4370_v33 = vpop.f32.mrf.mxu1  ;;  %v7942_v6 = vor.u32 %v8831_v53, %v7939_v55  ;;  %v7931_v5 = vld [vmem:[#allocation8 + $0x88] sm:$0xf0]  ;;  %v8853_v55 = vld [vmem:[#allocation8 + $0x144] sm:$0xf] }
 0x31a   :  { %5097 = vmatpush.bf16.msra.mxu2 %v7866_v2  ;;  %4666 = vmatmul.bf16.vlgmr.msra.gmra.mxu0 %v9374_v38  ;;  %v8798_v38 = vld [vmem:[#allocation7 + $0x78c] sm:$0xf]  ;;  %v4498_v39 = vpop.f32.mrf.mxu3  ;;  %v4382_v47 = vadd.f32 %v9403_v41, %v2981_v7 }
 0x31b   :  { %vm4684_vm15 = vcmp.gt.f32.partialorder %v4369_v12, 0.0  ;;  %v4688_v8 = vmul.f32 0.01, %v4369_v12 }
 0x31c   :  { %4672 = vmatpush.bf16.msra.mxu1 %v7846_v1  ;;  %5155 = vmatpush.bf16.msrb.mxu3 %v7990_v37  ;;  %v7763_v1 = vld [vmem:[#allocation7 + $0x738] sm:$0xf0]  ;;  %v7947_v37 = vld [vmem:[#allocation8 + $0xa8] sm:$0xf0]  ;;  %v4395_v50 = vadd.f32 %v9408_v54, %v4382_v47  ;;  %v8855_v47 = vld [vmem:[#allocation8 + $0x154] sm:$0xf] }
 0x31d   :  { %v7766_v46 = vor.u32 %v8786_v0, %v7763_v1  ;;  %v8859_v0 = vld [vmem:[#allocation8 + $0x174] sm:$0xf]  ;;  %v8051_v1 = vld [vmem:[#allocation8 + $0x178] sm:$0xf0] }
 0x31e   :  { %5142 = vmatpush.bf16.msrb.mxu2 %v7926_v62  ;;  %v7814_v62 = vor.u32 %v8798_v38, %v7811_v57  ;;  %v9426_v15 = vpop.f32.mrf.mxu0  ;;  %v8049_v38 = vld [vmem:[#allocation8 + $0x170] sm:$0xf]  ;;  %v4408_v58 = vadd.f32 %v9419_v24, %v4395_v50 }
 0x320   :  { %v4485_v2 = vpop.f32.mrf.mxu2  ;;  %4673 = vmatpush.bf16.msra.mxu1 %v7830_v49  ;;  %5156 = vmatpush.bf16.msrb.mxu3 %v7982_v51  ;;  %v8860_v51 = vld [vmem:[#allocation8 + $0x174] sm:$0xf0] }
 0x321   :  { %v4486_v63 = vadd.f32 %v4485_v2, %v2982_v18  ;;  %v4420_v57 = vpop.f32.mrf.mxu1  ;;  %v8050_v41 = vor.u32 %v8860_v51, %v8049_v38  ;;  %v8829_v2 = vld [vmem:[#allocation8 + $0x84] sm:$0xf]  ;;  %v8025_v18 = vld [vmem:[#allocation8 + $0x140] sm:$0xf]  ;;  %v8027_v38 = vld [vmem:[#allocation8 + $0x148] sm:$0xf0] }
 0x322   :  { %5143 = vmatpush.bf16.msrb.mxu2 %v7918_v21  ;;  %v4692_v21 = vsel %vm4684_vm15, %v4369_v12, %v4688_v8  ;;  %v4500_v42 = vpop.f32.mrf.mxu3  ;;  %v7934_v54 = vor.u32 %v8829_v2, %v7931_v5  ;;  %v8041_v12 = vld [vmem:[#allocation8 + $0x160] sm:$0xf]  ;;  %v8851_v51 = vld [vmem:[#allocation8 + $0x134] sm:$0xf] }
 0x323   :  { %v4696_v25 = vpack.c.bf16 %v4692_v21, %v4692_v21  ;;  %v9435_v44 = vadd.f32 %v4498_v39, %v4486_v63  ;;  %5116 = vmatpush.bf16.msrb.mxu0 %v8050_v41  ;;  %v8042_v24 = vor.u32 %v8858_v13, %v8041_v12  ;;  %v8846_v39 = vld [vmem:[#allocation8 + $0x104] sm:$0xf0]  ;;  %v8011_v41 = vld [vmem:[#allocation8 + $0x128] sm:$0xf0]  ;;  %v8847_v13 = vld [vmem:[#allocation8 + $0x114] sm:$0xf] }
 0x324   :  { %4674 = vmatpush.bf16.msra.mxu1 %v7814_v62  ;;  %5157 = vmatpush.bf16.msrb.mxu3 %v7974_v52  ;;  %v4421_v62 = vadd.f32 %v4420_v57, %v4408_v58  ;;  %v8856_v52 = vld [vmem:[#allocation8 + $0x154] sm:$0xf0]  ;;  %v8030_v57 = vor.u32 %v8853_v55, %v8027_v38  ;;  %v8019_v58 = vld [vmem:[#allocation8 + $0x138] sm:$0xf0]  ;;  %v8875_v55 = vld [vmem:[#allocation8 + $0x1f4] sm:$0xf] }
 0x325   :  { %5098 = vmatmul.bf16.vlgmr.msra.gmra.mxu2 %v4696_v25  ;;  %v8022_v42 = vor.u32 %v8851_v51, %v8019_v58  ;;  %v8115_v38 = vld [vmem:[#allocation8 + $0x1f8] sm:$0xf0]  ;;  %v8107_v51 = vld [vmem:[#allocation8 + $0x1e8] sm:$0xf0] }
 0x326   :  { %5144 = vmatpush.bf16.msrb.mxu2 %v7910_v35  ;;  %v8835_v35 = vld [vmem:[#allocation8 + $0xb4] sm:$0xf]  ;;  %v4461_v40 = vpop.f32.mrf.mxu0  ;;  %v4434_v9 = vadd.f32 %v9415_v4, %v4421_v62 }
 0x327   :  { %v7958_v43 = vor.u32 %v8835_v35, %v7955_v36  ;;  %5117 = vmatpush.bf16.msrb.mxu0 %v8042_v24  ;;  %v8848_v35 = vld [vmem:[#allocation8 + $0x114] sm:$0xf0]  ;;  %v7993_v36 = vld [vmem:[#allocation8 + $0x100] sm:$0xf]  ;;  %v8054_v40 = vor.u32 %v8859_v0, %v8051_v1  ;;  %v8003_v24 = vld [vmem:[#allocation8 + $0x118] sm:$0xf0] }
 0x328   :  { %v4487_v26 = vpop.f32.mrf.mxu2  ;;  %4675 = vmatpush.bf16.msra.mxu1 %v7798_v19  ;;  %5158 = vmatpush.bf16.msrb.mxu3 %v7966_v29  ;;  %v4447_v14 = vadd.f32 %v9417_v23, %v4434_v9  ;;  %v8854_v19 = vld [vmem:[#allocation8 + $0x144] sm:$0xf0]  ;;  %v8017_v23 = vld [vmem:[#allocation8 + $0x130] sm:$0xf]  ;;  %v8009_v29 = vld [vmem:[#allocation8 + $0x120] sm:$0xf] }
 0x329   :  { %v4422_v10 = vpop.f32.mrf.mxu1  ;;  %v8026_v20 = vor.u32 %v8854_v19, %v8025_v18  ;;  %v8866_v0 = vld [vmem:[#allocation8 + $0x1a4] sm:$0xf0] }
 0x32a   :  { %5145 = vmatpush.bf16.msrb.mxu2 %v7902_v16  ;;  %v8833_v16 = vld [vmem:[#allocation8 + $0xa4] sm:$0xf]  ;;  %v4460_v8 = vadd.f32 %v9426_v15, %v4447_v14 }
 0x32b   :  { %v7950_v49 = vor.u32 %v8833_v16, %v7947_v37  ;;  %v8043_v16 = vld [vmem:[#allocation8 + $0x168] sm:$0xf0]  ;;  %v8845_v14 = vld [vmem:[#allocation8 + $0x104] sm:$0xf] }
 0x32c   :  { %4676 = vmatpush.bf16.msra.mxu1 %v7782_v60  ;;  %5159 = vmatpush.bf16.msrb.mxu3 %v7958_v43  ;;  %v8001_v60 = vld [vmem:[#allocation8 + $0x110] sm:$0xf]  ;;  %v7994_v43 = vor.u32 %v8846_v39, %v7993_v36  ;;  %v8073_v39 = vld [vmem:[#allocation8 + $0x1a0] sm:$0xf] }
 0x32d   :  { %v8002_v7 = vor.u32 %v8848_v35, %v8001_v60  ;;  %v8081_v35 = vld [vmem:[#allocation8 + $0x1b0] sm:$0xf] }
 0x32e   :  { %5146 = vmatpush.bf16.msrb.mxu2 %v7894_v61  ;;  %v7750_v61 = vor.u32 %v8782_v48, %v7747_v59  ;;  %v8035_v48 = vld [vmem:[#allocation8 + $0x158] sm:$0xf0] }
 0x32f   :  { %v8038_v59 = vor.u32 %v8855_v47, %v8035_v48  ;;  %v8864_v47 = vld [vmem:[#allocation8 + $0x194] sm:$0xf0] }
 0x330   :  { %4677 = vmatpush.bf16.msra.mxu1 %v7766_v46  ;;  %5160 = vmatpush.bf16.msrb.mxu3 %v7950_v49  ;;  %v8857_v46 = vld [vmem:[#allocation8 + $0x164] sm:$0xf] }
 0x331   :  { %v8046_v37 = vor.u32 %v8857_v46, %v8043_v16 }
 0x332   :  { %5147 = vmatpush.bf16.msrb.mxu2 %v7886_v11  ;;  %v8033_v11 = vld [vmem:[#allocation8 + $0x150] sm:$0xf] }
 0x333   :  { %v8034_v17 = vor.u32 %v8856_v52, %v8033_v11  ;;  %v7995_v11 = vld [vmem:[#allocation8 + $0x108] sm:$0xf0]  ;;  %v8113_v52 = vld [vmem:[#allocation8 + $0x1f0] sm:$0xf] }
 0x334   :  { %4678 = vmatpush.bf16.msra.mxu1 %v7750_v61  ;;  %5161 = vmatpush.bf16.msrb.mxu3 %v7942_v6  ;;  %v9446_v4 = vpop.f32.mrf.mxu0  ;;  %v2983_v61 = vperm.slane %v9431_v45, 3  ;;  %v8849_v6 = vld [vmem:[#allocation8 + $0x124] sm:$0xf]  ;;  %v8006_v45 = vor.u32 %v8847_v13, %v8003_v24  ;;  %v7998_v19 = vor.u32 %v8845_v14, %v7995_v11  ;;  %v8083_v13 = vld [vmem:[#allocation8 + $0x1b8] sm:$0xf0] }
 0x335   :  { %5118 = vmatpush.bf16.msrb.mxu0 %v8034_v17  ;;  %v8876_v17 = vld [vmem:[#allocation8 + $0x1f4] sm:$0xf0]  ;;  %v8865_v14 = vld [vmem:[#allocation8 + $0x1a4] sm:$0xf] }
 0x336   :  { %5148 = vmatpush.bf16.msrb.mxu2 %v7878_v3  ;;  %v8018_v3 = vor.u32 %v8852_v27, %v8017_v23  ;;  %v8874_v23 = vld [vmem:[#allocation8 + $0x1e4] sm:$0xf0] }
 0x337   :  { %4679 = vmatmul.bf16.vlgmr.msra.gmra.mxu1 %v9381_v22  ;;  %v4472_v22 = vpop.f32.mrf.mxu1 }
 0x338   :  { %5162 = vmatpush.bf16.msrb.mxu3 %v7934_v54  ;;  %v4473_v56 = vadd.f32 %v4472_v22, %v4460_v8  ;;  %v8014_v54 = vor.u32 %v8849_v6, %v8011_v41  ;;  %v4512_v8 = vadd.f32 %v9446_v4, %v9435_v44  ;;  %v8114_v22 = vor.u32 %v8876_v17, %v8113_v52  ;;  %v8099_v6 = vld [vmem:[#allocation8 + $0x1d8] sm:$0xf0] }
 0x339   :  { %5119 = vmatpush.bf16.msrb.mxu0 %v8026_v20 }
 0x33a   :  { %5149 = vmatpush.bf16.msrb.mxu2 %v7870_v32  ;;  %vm4685_vm0 = vcmp.gt.f32.partialorder %v4473_v56, 0.0  ;;  %v4689_v21 = vmul.f32 0.01, %v4473_v56  ;;  %5129 = vmatpush.bf16.msrb.mxu1 %v8114_v22  ;;  %v8067_v22 = vld [vmem:[#allocation8 + $0x198] sm:$0xf0] }
 0x33c   :  { %v4693_v28 = vsel %vm4685_vm0, %v4473_v56, %v4689_v21  ;;  %v4513_v63 = vpop.f32.mrf.mxu0  ;;  %v8105_v21 = vld [vmem:[#allocation8 + $0x1e0] sm:$0xf] }
 0x33d   :  { %5150 = vmatmul.bf16.vlgmr.msrb.gmra.mxu2 %v4696_v25  ;;  %v8850_v25 = vld [vmem:[#allocation8 + $0x124] sm:$0xf0]  ;;  %v4697_v30 = vpack.c.bf16 %v4693_v28, %v4693_v28  ;;  %v9448_v15 = vpop.f32.mrf.mxu3  ;;  %5120 = vmatpush.bf16.msrb.mxu0 %v8018_v3  ;;  %v8106_v27 = vor.u32 %v8874_v23, %v8105_v21  ;;  %v8097_v3 = vld [vmem:[#allocation8 + $0x1d0] sm:$0xf] }
 0x33e   :  { %v8010_v26 = vor.u32 %v8850_v25, %v8009_v29  ;;  %v8872_v29 = vld [vmem:[#allocation8 + $0x1d4] sm:$0xf0]  ;;  %v8870_v63 = vld [vmem:[#allocation8 + $0x1c4] sm:$0xf0] }
 0x33f   :  { %v4474_v33 = vpop.f32.mrf.mxu1  ;;  %5111 = vmatmul.bf16.vlgmr.msra.gmra.mxu3 %v4697_v30  ;;  %5130 = vmatpush.bf16.msrb.mxu1 %v8106_v27  ;;  %v8098_v25 = vor.u32 %v8872_v29, %v8097_v3 }
 0x340   :  { %v9443_v34 = vpop.f32.mrf.mxu2 }
 0x341   :  { %5121 = vmatpush.bf16.msrb.mxu0 %v8010_v26  ;;  %v8089_v26 = vld [vmem:[#allocation8 + $0x1c0] sm:$0xf] }
 0x343   :  { %5131 = vmatpush.bf16.msrb.mxu1 %v8098_v25 }
 0x345   :  { %v4552_v32 = vpop.f32.mrf.mxu3  ;;  %5122 = vmatpush.bf16.msrb.mxu0 %v8002_v7 }
 0x348   :  { %v4539_v31 = vpop.f32.mrf.mxu2 }
 0x349   :  { %5123 = vmatpush.bf16.msrb.mxu0 %v7994_v43 }
 0x34d   :  { %5168 = vmatpush.bf16.msra.mxu0 %v8054_v40  ;;  %v8074_v40 = vor.u32 %v8866_v0, %v8073_v39 }
 0x34f   :  { %5163 = vmatmul.bf16.vlgmr.msrb.gmra.mxu3 %v4697_v30 }
 0x351   :  { %5169 = vmatpush.bf16.msra.mxu0 %v8046_v37  ;;  %v8065_v37 = vld [vmem:[#allocation8 + $0x190] sm:$0xf] }
 0x352   :  { %v8066_v48 = vor.u32 %v8864_v47, %v8065_v37  ;;  %v8891_v37 = vld [vmem:[#allocation10 + $0x70] sm:$0xff]  ;;  %v8882_v47 = vld [vmem:[#allocation10 + $0x28] sm:$0xff] }
 0x354   :  { %v4524_v50 = vpop.f32.mrf.mxu1  ;;  %v4563_v53 = vpop.f32.mrf.mxu0 }
 0x355   :  { %5170 = vmatpush.bf16.msra.mxu0 %v8038_v59  ;;  %v4525_v56 = vadd.f32 %v4524_v50, %v4512_v8  ;;  %v8862_v50 = vld [vmem:[#allocation8 + $0x184] sm:$0xf0]  ;;  %v8863_v8 = vld [vmem:[#allocation8 + $0x194] sm:$0xf] }
 0x357   :  { %v4538_v20 = vadd.f32 %v9443_v34, %v4525_v56  ;;  %v8090_v34 = vor.u32 %v8870_v63, %v8089_v26  ;;  %v8059_v56 = vld [vmem:[#allocation8 + $0x188] sm:$0xf0] }
 0x359   :  { %5171 = vmatpush.bf16.msra.mxu0 %v8030_v57  ;;  %v4551_v28 = vadd.f32 %v9448_v15, %v4538_v20  ;;  %5132 = vmatpush.bf16.msrb.mxu1 %v8090_v34  ;;  %v8868_v15 = vld [vmem:[#allocation8 + $0x1b4] sm:$0xf0]  ;;  %v8118_v57 = vor.u32 %v8875_v55, %v8115_v38 }
 0x35a   :  { %v8082_v7 = vor.u32 %v8868_v15, %v8081_v35 }
 0x35b   :  { %v4564_v30 = vadd.f32 %v4563_v53, %v4551_v28 }
 0x35c   :  { %v4526_v10 = vpop.f32.mrf.mxu1  ;;  %v4565_v12 = vpop.f32.mrf.mxu0 }
 0x35d   :  { %v4602_v62 = vpop.f32.mrf.mxu3  ;;  %5172 = vmatpush.bf16.msra.mxu0 %v8022_v42  ;;  %5133 = vmatpush.bf16.msrb.mxu1 %v8082_v7  ;;  %v8871_v42 = vld [vmem:[#allocation8 + $0x1d4] sm:$0xf] }
 0x35e   :  { %v8102_v41 = vor.u32 %v8871_v42, %v8099_v6  ;;  %v8867_v12 = vld [vmem:[#allocation8 + $0x1b4] sm:$0xf]  ;;  %v8888_v42 = vld [vmem:[#allocation10 + $0x58] sm:$0xff] }
 0x35f   :  { %v8086_v24 = vor.u32 %v8867_v12, %v8083_v13  ;;  %v8887_v6 = vld [vmem:[#allocation10 + $0x50] sm:$0xff] }
 0x360   :  { %v4589_v49 = vpop.f32.mrf.mxu2 }
 0x361   :  { %v4590_v2 = vadd.f32 %v4589_v49, %v2983_v61  ;;  %5173 = vmatpush.bf16.msra.mxu0 %v8014_v54  ;;  %5134 = vmatpush.bf16.msrb.mxu1 %v8074_v40  ;;  %v8057_v49 = vld [vmem:[#allocation8 + $0x180] sm:$0xf]  ;;  %v8873_v61 = vld [vmem:[#allocation8 + $0x1e4] sm:$0xf]  ;;  %v8091_v54 = vld [vmem:[#allocation8 + $0x1c8] sm:$0xf0] }
 0x362   :  { %v8058_v53 = vor.u32 %v8862_v50, %v8057_v49  ;;  %v8110_v58 = vor.u32 %v8873_v61, %v8107_v51  ;;  %v8884_v40 = vld [vmem:[#allocation10 + $0x38] sm:$0xff]  ;;  %v8890_v61 = vld [vmem:[#allocation10 + $0x68] sm:$0xff]  ;;  %v8877_v51 = vld [vmem:[#allocation10] sm:$0xff] }
 0x363   :  { %v9451_v9 = vadd.f32 %v4602_v62, %v4590_v2  ;;  %v8869_v62 = vld [vmem:[#allocation8 + $0x1c4] sm:$0xf]  ;;  %5334 = vmatpush.bf16.msra.mxu2 %v8884_v40  ;;  %v8880_v49 = vld [vmem:[#allocation10 + $0x18] sm:$0xff] }
 0x364   :  { %v8094_v10 = vor.u32 %v8869_v62, %v8091_v54  ;;  %v8899_v62 = vld [vmem:[%s9528_s13 + $0x30] sm:$0xff] }
 0x365   :  { %v4604_v18 = vpop.f32.mrf.mxu3  ;;  %5174 = vmatpush.bf16.msra.mxu0 %v8006_v45  ;;  %5135 = vmatpush.bf16.msrb.mxu1 %v8066_v48  ;;  %v8075_v45 = vld [vmem:[#allocation8 + $0x1a8] sm:$0xf0] }
 0x366   :  { %v8078_v52 = vor.u32 %v8865_v14, %v8075_v45  ;;  %v8861_v18 = vld [vmem:[#allocation8 + $0x184] sm:$0xf] }
 0x367   :  { %v8062_v21 = vor.u32 %v8861_v18, %v8059_v56  ;;  %v8898_v56 = vld [vmem:[%s9528_s13 + $0x28] sm:$0xff] }
 0x368   :  { %v4591_v5 = vpop.f32.mrf.mxu2 }
 0x369   :  { %5175 = vmatpush.bf16.msra.mxu0 %v7998_v19  ;;  %5136 = vmatpush.bf16.msrb.mxu1 %v8058_v53  ;;  %v8070_v19 = vor.u32 %v8863_v8, %v8067_v22  ;;  %v8879_v53 = vld [vmem:[#allocation10 + $0x10] sm:$0xff] }
 0x36d   :  { %5181 = vmatpush.bf16.msra.mxu1 %v8118_v57  ;;  %v8878_v57 = vld [vmem:[#allocation10 + $0x8] sm:$0xff] }
 0x371   :  { %5182 = vmatpush.bf16.msra.mxu1 %v8110_v58  ;;  %v8889_v58 = vld [vmem:[#allocation10 + $0x60] sm:$0xff] }
 0x374   :  { %v4576_v31 = vpop.f32.mrf.mxu1 }
 0x375   :  { %v4577_v33 = vadd.f32 %v4576_v31, %v4564_v30  ;;  %5183 = vmatpush.bf16.msra.mxu1 %v8102_v41  ;;  %v8886_v41 = vld [vmem:[#allocation10 + $0x48] sm:$0xff] }
 0x377   :  { %v9459_v4 = vpop.f32.mrf.mxu0  ;;  %vm4686_vm1 = vcmp.gt.f32.partialorder %v4577_v33, 0.0  ;;  %v4690_v60 = vmul.f32 0.01, %v4577_v33 }
 0x378   :  { %v4616_v20 = vadd.f32 %v9459_v4, %v9451_v9  ;;  %v4764_v9 = vld [vmem:[%s9525_s10] sm:$0x3] }
 0x379   :  { %v4694_v36 = vsel %vm4686_vm1, %v4577_v33, %v4690_v60  ;;  %5184 = vmatpush.bf16.msra.mxu1 %v8094_v10  ;;  %v4766_v35 = vperm.slane %v4764_v9, 0  ;;  %v4767_v39 = vperm.slane %v4764_v9, 1 }
 0x37a   :  { %v4698_v1 = vpack.c.bf16 %v4694_v36, %v4694_v36 }
 0x37b   :  { %v4654_v43 = vpop.f32.mrf.mxu3 }
 0x37c   :  { %v4578_v46 = vpop.f32.mrf.mxu1  ;;  %5124 = vmatmul.bf16.vlgmr.msrb.gmra.mxu0 %v4698_v1 }
 0x37d   :  { %5185 = vmatpush.bf16.msra.mxu1 %v8086_v24  ;;  %v8892_v46 = vld [vmem:[#allocation10 + $0x78] sm:$0xff] }
 0x37e   :  { %5347 = vmatpush.bf16.msra.mxu3 %v8892_v46 }
 0x37f   :  { %v4617_v16 = vpop.f32.mrf.mxu0 }
 0x380   :  { %v9457_v44 = vpop.f32.mrf.mxu2  ;;  %v8883_v16 = vld [vmem:[#allocation10 + $0x30] sm:$0xff] }
 0x381   :  { %5186 = vmatpush.bf16.msra.mxu1 %v8078_v52  ;;  %5335 = vmatpush.bf16.msra.mxu2 %v8883_v16 }
 0x382   :  { %5348 = vmatpush.bf16.msra.mxu3 %v8891_v37 }
 0x383   :  { %v4656_v59 = vpop.f32.mrf.mxu3 }
 0x384   :  { %v8881_v59 = vld [vmem:[#allocation10 + $0x20] sm:$0xff] }
 0x385   :  { %5187 = vmatpush.bf16.msra.mxu1 %v8070_v19  ;;  %5336 = vmatpush.bf16.msra.mxu2 %v8882_v47 }
 0x386   :  { %5349 = vmatpush.bf16.msra.mxu3 %v8890_v61 }
 0x388   :  { %v4643_v32 = vpop.f32.mrf.mxu2 }
 0x389   :  { %5188 = vmatpush.bf16.msra.mxu1 %v8062_v21  ;;  %5337 = vmatpush.bf16.msra.mxu2 %v8881_v59  ;;  %v8896_v21 = vld [vmem:[%s9528_s13 + $0x18] sm:$0xff] }
 0x38a   :  { %5350 = vmatpush.bf16.msra.mxu3 %v8889_v58 }
 0x38c   :  { %5176 = vmatmul.bf16.vlgmr.msra.gmra.mxu0 %v4698_v1 }
 0x38d   :  { %5338 = vmatpush.bf16.msra.mxu2 %v8880_v49 }
 0x38e   :  { %5351 = vmatpush.bf16.msra.mxu3 %v8888_v42 }
 0x391   :  { %5339 = vmatpush.bf16.msra.mxu2 %v8879_v53 }
 0x392   :  { %5352 = vmatpush.bf16.msra.mxu3 %v8887_v6 }
 0x394   :  { %v4628_v5 = vpop.f32.mrf.mxu1 }
 0x395   :  { %v4629_v23 = vadd.f32 %v4628_v5, %v4616_v20  ;;  %5340 = vmatpush.bf16.msra.mxu2 %v8878_v57  ;;  %v8900_v5 = vld [vmem:[%s9528_s13 + $0x38] sm:$0xff]  ;;  %v8897_v20 = vld [vmem:[%s9528_s13 + $0x20] sm:$0xff] }
 0x396   :  { %5353 = vmatpush.bf16.msra.mxu3 %v8886_v41  ;;  %5432 = vmatpush.bf16.msrb.mxu0 %v8900_v5 }
 0x397   :  { %v4667_v2 = vpop.f32.mrf.mxu0  ;;  %v4642_v27 = vadd.f32 %v9457_v44, %v4629_v23  ;;  %v8895_v23 = vld [vmem:[%s9528_s13 + $0x10] sm:$0xff] }
 0x399   :  { %v4655_v3 = vadd.f32 %v4654_v43, %v4642_v27  ;;  %5341 = vmatpush.bf16.msra.mxu2 %v8877_v51  ;;  %v8894_v27 = vld [vmem:[%s9528_s13 + $0x8] sm:$0xff] }
 0x39a   :  { %5433 = vmatpush.bf16.msrb.mxu0 %v8899_v62 }
 0x39b   :  { %v4668_v29 = vadd.f32 %v4667_v2, %v4655_v3  ;;  %v8885_v2 = vld [vmem:[#allocation10 + $0x40] sm:$0xff]  ;;  %v8904_v3 = vld [vmem:[%s9530_s15 + $0x18] sm:$0xff] }
 0x39c   :  { %v4630_v17 = vpop.f32.mrf.mxu1  ;;  %5354 = vmatpush.bf16.msra.mxu3 %v8885_v2 }
 0x39e   :  { %5434 = vmatpush.bf16.msrb.mxu0 %v8898_v56 }
 0x39f   :  { %v4669_v11 = vpop.f32.mrf.mxu0 }
 0x3a2   :  { %5435 = vmatpush.bf16.msrb.mxu0 %v8897_v20 }
 0x3a6   :  { %5436 = vmatpush.bf16.msrb.mxu0 %v8896_v21 }
 0x3a8   :  { %v5099_v28 = vpop.f32.mrf.mxu2 }
 0x3a9   :  { %v5100_v44 = vadd.f32 %v5099_v28, %v4766_v35  ;;  %v8893_v28 = vld [vmem:[%s9528_s13] sm:$0xff]  ;;  %v8902_v35 = vld [vmem:[%s9530_s15 + $0x8] sm:$0xff] }
 0x3aa   :  { %5437 = vmatpush.bf16.msrb.mxu0 %v8895_v23 }
 0x3ae   :  { %5438 = vmatpush.bf16.msrb.mxu0 %v8894_v27 }
 0x3b0   :  { %v5101_v25 = vpop.f32.mrf.mxu2 }
 0x3b2   :  { %5439 = vmatpush.bf16.msrb.mxu0 %v8893_v28 }
 0x3b4   :  { %v4680_v30 = vpop.f32.mrf.mxu1 }
 0x3b5   :  { %v4681_v31 = vadd.f32 %v4680_v30, %v4668_v29  ;;  %v8903_v29 = vld [vmem:[%s9530_s15 + $0x10] sm:$0xff] }
 0x3b7   :  { %vm4687_vm2 = vcmp.gt.f32.partialorder %v4681_v31, 0.0  ;;  %v4691_v26 = vmul.f32 0.01, %v4681_v31 }
 0x3b9   :  { %v4695_v63 = vsel %vm4687_vm2, %v4681_v31, %v4691_v26  ;;  %v8919_v31 = vld [vmem:[%s9527_s12] ss:$0 sm:$0xff] }
 0x3ba   :  { %v4699_v33 = vpack.c.bf16 %v4695_v63, %v4695_v63 }
 0x3bc   :  { %v4682_v60 = vpop.f32.mrf.mxu1  ;;  %5137 = vmatmul.bf16.vlgmr.msrb.gmra.mxu1 %v4699_v33 }
 0x3bd   :  { %5493 = vmatpush.bf16.msrb.mxu1 %v8904_v3 }
 0x3c0   :  { %v5151_v34 = vpop.f32.mrf.mxu2 }
 0x3c1   :  { %v5152_v0 = vadd.f32 %v5151_v34, %v4767_v39  ;;  %5494 = vmatpush.bf16.msrb.mxu1 %v8903_v29 }
 0x3c2   :  { %v5112_v15 = vpop.f32.mrf.mxu3 }
 0x3c3   :  { %v5113_v36 = vadd.f32 %v5112_v15, %v5100_v44  ;;  %v8901_v44 = vld [vmem:[%s9530_s15] sm:$0xff] }
 0x3c4   :  { %v8920_v15 = vld [vmem:[%s9529_s14] ss:$0 sm:$0xff]  ;;  %s9093_s14 = smov [#allocation11]  }
 0x3c5   :  { %5495 = vmatpush.bf16.msrb.mxu1 %v8902_v35  ;;  %s5527_s15 = sshll.u32 %s9093_s14, 4  ;;  %s5528_s15 = int_to_ptr.vmem [resolvable:$true] %s5527_s15 }
 0x3c8   :  { %v5153_v4 = vpop.f32.mrf.mxu2 }
 0x3c9   :  { %5496 = vmatpush.bf16.msrb.mxu1 %v8901_v44 }
 0x3ca   :  { %v5114_v7 = vpop.f32.mrf.mxu3 }
 0x3cc   :  { %5189 = vmatmul.bf16.vlgmr.msra.gmra.mxu1 %v4699_v33 }
 0x3d2   :  { %v5164_v1 = vpop.f32.mrf.mxu3 }
 0x3d3   :  { %v5165_v32 = vadd.f32 %v5164_v1, %v5152_v0 }
 0x3da   :  { %v5166_v43 = vpop.f32.mrf.mxu3 }
 0x3db   :  { %v8921_v43 = vld [vmem:[%s9531_s16] ss:$0 sm:$0xff]  ;;  %s5529_s16 = sshll.u32 %s9532_s17, 4  ;;  %s5530_s16 = int_to_ptr.hbm [resolvable:$true] %s5529_s16 }
 0x3f9   :  { %v5125_v48 = vpop.f32.mrf.mxu0 }
 0x3fa   :  { %v5126_v54 = vadd.f32 %v5125_v48, %v5113_v36 }
 0x401   :  { %v5127_v50 = vpop.f32.mrf.mxu0 }
 0x409   :  { %v5177_v55 = vpop.f32.mrf.mxu0 }
 0x40a   :  { %v5178_v11 = vadd.f32 %v5177_v55, %v5165_v32 }
 0x411   :  { %v5179_v38 = vpop.f32.mrf.mxu0 }
 0x439   :  { %v5138_v10 = vpop.f32.mrf.mxu1 }
 0x43a   :  { %v5139_v12 = vadd.f32 %v5138_v10, %v5126_v54 }
 0x43c   :  { %vm5194_vm3 = vcmp.gt.f32.partialorder %v5139_v12, 0.0  ;;  %v5196_v13 = vmul.f32 0.01, %v5139_v12 }
 0x43e   :  { %v5198_v24 = vsel %vm5194_vm3, %v5139_v12, %v5196_v13 }
 0x43f   :  { %v5200_v14 = vpack.c.bf16 %v5198_v24, %v5198_v24 }
 0x441   :  { %v5140_v45 = vpop.f32.mrf.mxu1  ;;  %5342 = vmatmul.bf16.vlgmr.msra.gmra.mxu2 %v5200_v14 }
 0x449   :  { %v5190_v52 = vpop.f32.mrf.mxu1 }
 0x44a   :  { %v5191_v17 = vadd.f32 %v5190_v52, %v5178_v11 }
 0x44c   :  { %vm5195_vm4 = vcmp.gt.f32.partialorder %v5191_v17, 0.0  ;;  %v5197_v8 = vmul.f32 0.01, %v5191_v17 }
 0x44e   :  { %v5199_v22 = vsel %vm5195_vm4, %v5191_v17, %v5197_v8 }
 0x44f   :  { %v5201_v18 = vpack.c.bf16 %v5199_v22, %v5199_v22 }
 0x451   :  { %v5192_v19 = vpop.f32.mrf.mxu1  ;;  %5355 = vmatmul.bf16.vlgmr.msra.gmra.mxu3 %v5201_v18 }
 0x4c4   :  { %v5343_v25 = vpop.f32.mrf.mxu2 }
 0x4c5   :  { %v5344_v26 = vadd.f32 %v8919_v31, %v5343_v25 }
 0x4cc   :  { %v5345_v30 = vpop.f32.mrf.mxu2 }
 0x4d4   :  { %v5356_v63 = vpop.f32.mrf.mxu3 }
 0x4d5   :  { %v5357_v33 = vadd.f32 %v5356_v63, %v5344_v26 }
 0x4d7   :  { %vm5360_vm5 = vcmp.gt.f32.partialorder %v5357_v33, 0.0  ;;  %v5361_v34 = vmul.f32 0.01, %v5357_v33 }
 0x4d9   :  { %v5362_v60 = vsel %vm5360_vm5, %v5357_v33, %v5361_v34 }
 0x4da   :  { %v5363_v9 = vpack.c.bf16 %v5362_v60, %v5362_v60 }
 0x4dc   :  { %v5358_v4 = vpop.f32.mrf.mxu3  ;;  %5440 = vmatmul.bf16.vlgmr.msrb.gmra.mxu0 %v5363_v9 }
 0x559   :  { %v5441_v36 = vpop.f32.mrf.mxu0 }
 0x55a   :  { %v5442_v7 = vadd.f32 %v8920_v15, %v5441_v36 }
 0x55c   :  { %vm5445_vm6 = vcmp.gt.f32.partialorder %v5442_v7, 0.0  ;;  %v5446_v39 = vmul.f32 0.01, %v5442_v7 }
 0x55e   :  { %v5447_v0 = vsel %vm5445_vm6, %v5442_v7, %v5446_v39 }
 0x55f   :  { %v5448_v1 = vpack.c.bf16 %v5447_v0, %v5447_v0 }
 0x561   :  { %v5443_v32 = vpop.f32.mrf.mxu0  ;;  %8231 = vmatmul.msk.bf16.vlgmr.msrb.gmra.mxu1 %vm5485_vm7, %v5448_v1 }
 0x5de   :  { %v5498_v40 = vpop.f32.mrf.mxu1 }
 0x5df   :  { %v5499_v46 = vadd.f32 %v8921_v43, %v5498_v40 }
 0x5e1   :  { %v8232_v16 = vmul.f32 -1.442695, %v5499_v46 }
 0x5e3   :  { %8922 = vpow2.f32 %v8232_v16 }
 0x5e6   :  { %v5500_v37 = vpop.f32.mrf.mxu1 }
 0x5e9   :  { %v8923_v47 = vpop.eup %8922 }
 0x5ea   :  { %v5505_v48 = vadd.f32 1.0, %v8923_v47 }
 0x5ec   :  { %8924 = vrcp.f32 %v5505_v48  ;;  %v5517_v53 = vand.u32 2147483648, %v5505_v48  ;;  %v5515_v38 = vand.u32 2147483647, %v5505_v48  ;;  %vm5511_vm9 = vweird.f32 %v5505_v48 }
 0x5ee   :  { %v5518_v61 = vor.u32 1.1754944e-38, %v5517_v53  ;;  %vm5516_vm11 = vcmp.eq.f32.partialorder %v5515_v38, 8.507059e+37 }
 0x5f2   :  { %v8925_v59 = vpop.eup %8924 }
 0x5f3   :  { %v5507_v49 = vmul.f32 %v8925_v59, %v5505_v48  ;;  %vm5512_vm8 = vweird.f32 %v8925_v59 }
 0x5f4   :  { %vm5513_vm10 = vmor %vm5511_vm9, %vm5512_vm8 }
 0x5f5   :  { %v5508_v50 = vsub.f32 1.0, %v5507_v49 }
 0x5f7   :  { %v5509_v55 = vmul.f32 %v8925_v59, %v5508_v50 }
 0x5f9   :  { %v5510_v57 = vadd.f32 %v8925_v59, %v5509_v55 }
 0x5fb   :  { %v5514_v51 = vsel %vm5513_vm10, %v8925_v59, %v5510_v57 }
 0x5fc   :  { %v5519_v58 = vsel %vm5516_vm11, %v5518_v61, %v5514_v51 }
 0x5fd   :  { %5521 = vst [vmem:[#allocation11] sm:$0xff] %v5519_v58 }
 0x5fe   :  { %5532 = dma.vmem_to_hbm [thread:$0]  %s5528_s15, 128, %s5530_s16, [#allocation4]  }
 0x5ff   :  { %9078 = dma.done.wait [#allocation4], 128  }
 0x600   :  { %9079 = vsyncadd [#allocation4], 4294967168 }
 0x601   :  { %5537 = vsyncpa [#allocation3], 1 }
 0x602   :  { %5538 = vsyncpa [#allocation6], 1 }
 0x603   :  { %5539 = vsyncpa [#allocation9], 1 }
 0x604   :  { %5540 = vsyncpa [#allocation4], 1 }

</bundles_post_ra>
